<compile_context>
chip_gen: v6e
topology: v6e:2x2x1
jax: 0.10.0
libtpu: 0.0.40
codegen_flags: <defaults>
</compile_context>

<pallas_src>
import functools
import math

import jax
import jax.numpy as jnp
import numpy as np
from jax.experimental import pallas as pl
from jax.experimental.pallas import tpu as pltpu


def _gap_kernel(x_ref, sel_eo_ref, sel_s_ref, w1e_ref, b1_ref, w2_ref, b2_ref,
                mix_ref, out_ref, *, temperature: float, batch_tile: int,
                img_w: int, wp: int, inv_hw: float):
    """One grid step: `batch_tile` images.

    x_ref      : (Bt, C*Hp, 2*W)  lane layout [even image row | odd image row]
    sel_eo_ref : (W, 2*Wp)        one-hot even/odd column selectors
    sel_s_ref  : (W, Wp)          column-pair sum selector
    w1e_ref    : (C//2, C*Hp)     W1 with each column repeated Hp times
    b1_ref     : (C//2, 1)   w2_ref : (1, C//2)   b2_ref : (1, 1)
    mix_ref    : (1,) SMEM        sigmoid(mix_param)
    out_ref    : (Bt, C*Hp, Wp)
    """
    bt = batch_tile
    wmix = mix_ref[0]
    inv_t = 1.0 / temperature
    eps = 1e-10

    xt = x_ref[...]                          # (Bt, CHp, 2W)
    chp = xt.shape[1]

    # --- 2x2 pooling, batch-folded -------------------------------------
    top = xt[:, :, :img_w]                   # even image rows  (Bt, CHp, W)
    bot = xt[:, :, img_w:]                   # odd  image rows
    hmax = jnp.maximum(top, bot)             # row-pair max (VPU, exact)
    hsum = top + bot                         # row-pair sum

    hmax2 = hmax.reshape(bt * chp, img_w)    # leading-dim merge (no relayout)
    hsum2 = hsum.reshape(bt * chp, img_w)

    # column pairing via tiny one-hot selectors on the MXU; HIGHEST keeps the
    # gathered f32 activations exact.
    mm = jnp.dot(hmax2, sel_eo_ref[...],
                 preferred_element_type=jnp.float32,
                 precision=jax.lax.Precision.HIGHEST)          # (Bt*CHp, 2Wp)
    max_p = jnp.maximum(mm[:, :wp], mm[:, wp:])                # (Bt*CHp, Wp)
    avg_p = jnp.dot(hsum2, sel_s_ref[...],
                    preferred_element_type=jnp.float32,
                    precision=jax.lax.Precision.HIGHEST) * 0.25

    max_p3 = max_p.reshape(bt, chp, wp)
    avg_p3 = avg_p.reshape(bt, chp, wp)

    # mixed pooling; lerp algebra hoisted to a single full-size multiply.
    wd3 = wmix * (avg_p3 - max_p3)
    x1_3 = max_p3 + wd3                      # torch.lerp(max, avg, w)
    x2_3 = avg_p3 - wd3                      # torch.lerp(avg, max, w)

    # --- score MLP gates, batch-folded ----------------------------------
    # lane sums per (b, c, i) row; the sum over Hp rows per channel is folded
    # into w1e (W1 columns repeated Hp times), so one dot serves all b.
    rs_max = jnp.sum(max_p3, axis=2, keepdims=True)            # (Bt, CHp, 1)
    rs_avg = jnp.sum(avg_p3, axis=2, keepdims=True)
    rdelta = wmix * (rs_avg - rs_max)
    rs1 = rs_max + rdelta
    rs2 = rs_avg - rdelta
    cols = [rs1[b] for b in range(bt)] + [rs2[b] for b in range(bt)]
    rs_all = jnp.concatenate(cols, axis=1)                     # (CHp, 2*Bt)

    h = jnp.dot(w1e_ref[...], rs_all,
                preferred_element_type=jnp.float32,
                precision=jax.lax.Precision.HIGHEST) * inv_hw + b1_ref[...]
    h = jnp.maximum(h, 0.0)
    s = jnp.dot(w2_ref[...], h,
                preferred_element_type=jnp.float32,
                precision=jax.lax.Precision.HIGHEST) + b2_ref[...]  # (1, 2Bt)
    g = 1.0 / (1.0 + jnp.exp(-s))                               # sigmoid

    # training-branch gate (Gumbel noise unused upstream => deterministic):
    # softmax([log(1-g), log(g)] / T)[1] == sigmoid((log(g) - log(1-g)) / T)
    diff = (jnp.log(g + eps) - jnp.log(1.0 - g + eps)) * inv_t
    gate = 1.0 / (1.0 + jnp.exp(-diff))                         # (1, 2*Bt)

    # --- gated combine: per-b scalar gate broadcast + max + store --------
    for b in range(bt):                      # bounded static unroll (<= 16)
        g1 = gate[:, b:b + 1]                # (1, 1)
        g2 = gate[:, bt + b:bt + b + 1]      # (1, 1)
        out_ref[b] = jnp.maximum(g1 * x1_3[b], g2 * x2_3[b])


def _make_col_selectors(W):
    """Tiny one-hot selectors for the column (lane) pairing of 2x2 pooling."""
    Wp = W // 2
    sel_eo = np.zeros((W, 2 * Wp), np.float32)
    j = np.arange(Wp)
    sel_eo[2 * j, j] = 1.0            # even columns -> left half
    sel_eo[2 * j + 1, Wp + j] = 1.0   # odd columns  -> right half
    sel_s = sel_eo[:, :Wp] + sel_eo[:, Wp:]
    return sel_eo, sel_s


def gated_attention_pool(x, w1, b1, w2, b2, mix_param, *, temperature=1.0,
                         batch_tile=None, vmem_limit_bytes=None):
    """x: (B, C, H, W) float32. Returns (B, C, H//2, W//2) float32."""
    B, C, H, W = x.shape
    if H % 2 or W % 2:
        raise ValueError("even H and W required (torch pooling floors odd sizes)")
    Hp, Wp = H // 2, W // 2
    CHp = C * Hp

    # Free, contiguous views only — no HBM transpose pass.
    x3 = x.astype(jnp.float32).reshape(B, CHp, 2 * W)

    sel_eo_np, sel_s_np = _make_col_selectors(W)
    sel_eo = jnp.asarray(sel_eo_np)                    # (W, 2*Wp)
    sel_s = jnp.asarray(sel_s_np)                      # (W, Wp)

    # W1 with each input column repeated Hp times -> channel-mean grouping is
    # absorbed into the first MLP matmul.
    w1e = jnp.repeat(w1.astype(jnp.float32), Hp, axis=1)   # (C//2, C*Hp)
    b1c = b1.reshape(-1, 1).astype(jnp.float32)            # (C//2, 1)
    w2c = w2.astype(jnp.float32)                           # (1, C//2)
    b2c = b2.reshape(1, 1).astype(jnp.float32)             # (1, 1)
    mix_w = jax.nn.sigmoid(mix_param.astype(jnp.float32)).reshape(1)

    const_bytes = 4 * int(sel_eo.size + sel_s.size + w1e.size + b1c.size +
                          w2c.size + b2c.size)

    def tile_bytes(bt):
        in_blk = bt * C * H * W * 4
        out_blk = in_blk // 4
        # 2x (double-buffered) input + output blocks, 2x constants, headroom.
        return 2 * in_blk + 2 * out_blk + 2 * const_bytes + (2 << 20)

    try:
        vmem_cap = int(getattr(pltpu.get_tpu_info(), "vmem_capacity_bytes",
                               64 << 20))
    except Exception:
        vmem_cap = 64 << 20                                # conservative (v7x)
    budget = int(vmem_cap * 0.45)

    if batch_tile is None:
        # keep grid >= 2 so the ("parallel",) axis can use both v7x cores;
        # cap the static unroll of the final combine loop at 16.
        bt_cap = max(1, min(B // 2 if B > 1 else 1, 16))
        batch_tile = 1
        for cand in range(bt_cap, 0, -1):
            if B % cand == 0 and tile_bytes(cand) <= budget:
                batch_tile = cand
                break
    batch_tile = int(batch_tile)
    assert B % batch_tile == 0

    if vmem_limit_bytes is None:
        vmem_limit_bytes = int(min(vmem_cap * 3 // 4,
                                   max(tile_bytes(batch_tile) + (8 << 20),
                                       32 << 20)))

    kernel = functools.partial(_gap_kernel,
                               temperature=float(temperature),
                               batch_tile=batch_tile,
                               img_w=W, wp=Wp,
                               inv_hw=1.0 / float(Hp * Wp))

    grid_spec = pltpu.PrefetchScalarGridSpec(
        num_scalar_prefetch=0,
        grid=(B // batch_tile,),
        in_specs=[
            pl.BlockSpec((batch_tile, CHp, 2 * W), lambda b: (b, 0, 0)),
            pl.BlockSpec(sel_eo.shape, lambda b: (0, 0)),
            pl.BlockSpec(sel_s.shape, lambda b: (0, 0)),
            pl.BlockSpec(w1e.shape, lambda b: (0, 0)),
            pl.BlockSpec(b1c.shape, lambda b: (0, 0)),
            pl.BlockSpec(w2c.shape, lambda b: (0, 0)),
            pl.BlockSpec(b2c.shape, lambda b: (0, 0)),
            pl.BlockSpec(memory_space=pltpu.MemorySpace.SMEM),
        ],
        out_specs=pl.BlockSpec((batch_tile, CHp, Wp), lambda b: (b, 0, 0)),
    )

    out_flat = pl.pallas_call(
        kernel,
        out_shape=jax.ShapeDtypeStruct((B, CHp, Wp), jnp.float32),
        grid_spec=grid_spec,
        compiler_params=pltpu.CompilerParams(
            dimension_semantics=("parallel",),
            vmem_limit_bytes=int(vmem_limit_bytes)),
    )(x3, sel_eo, sel_s, w1e, b1c, w2c, b2c, mix_w)

    return out_flat.reshape(B, C, Hp, Wp)                 # free view back


def _reference(x, w1, b1, w2, b2, mix_param, temperature=1.0):
    """Pure-JAX reference mirroring the PyTorch forward (training-mode gate)."""
    B, C, H, W = x.shape
    Hp, Wp = H // 2, W // 2
    xw = x.reshape(B, C, Hp, 2, Wp, 2)
    maxp = xw.max(axis=(3, 5))
    avgp = xw.mean(axis=(3, 5))
    w = jax.nn.sigmoid(mix_param)[0]
    x1 = maxp + w * (avgp - maxp)
    x2 = avgp + w * (maxp - avgp)

    def gate(xi):
        pooled = xi.mean(axis=(2, 3))                       # (B, C)
        h = jnp.maximum(
            jnp.dot(pooled, w1.T, precision=jax.lax.Precision.HIGHEST) + b1, 0.0)
        s = jnp.dot(h, w2.T, precision=jax.lax.Precision.HIGHEST) + b2  # (B, 1)
        g = jax.nn.sigmoid(s)
        eps = 1e-10
        lg = jnp.log(g + eps) / temperature
        lig = jnp.log(1.0 - g + eps) / temperature
        gg = jnp.exp(lg) / (jnp.exp(lg) + jnp.exp(lig))
        return gg[:, :, None, None] * xi

    return jnp.maximum(gate(x1), gate(x2))


if __name__ == "__main__":
    dim = 32          # channels
    B, H, W = 2, 16, 16

    key = jax.random.PRNGKey(0)
    k1, k2, k3, k4, kx = jax.random.split(key, 5)

    # score_proj parameters (deterministic init; shapes from the module).
    bound1 = 1.0 / math.sqrt(dim)
    bound2 = 1.0 / math.sqrt(dim // 2)
    w1 = jax.random.uniform(k1, (dim // 2, dim), jnp.float32, -bound1, bound1)
    b1 = jax.random.uniform(k2, (dim // 2,), jnp.float32, -bound1, bound1)
    w2 = jax.random.uniform(k3, (1, dim // 2), jnp.float32, -bound2, bound2)
    b2 = jax.random.uniform(k4, (1,), jnp.float32, -bound2, bound2)
    mix_param = jnp.zeros((1,), jnp.float32)    # nn.Parameter(torch.zeros(1))

    x = jax.random.normal(kx, (B, dim, H, W), jnp.float32)

    fn = jax.jit(functools.partial(gated_attention_pool, temperature=1.0))
    out = jax.block_until_ready(fn(x, w1, b1, w2, b2, mix_param))

    ref = jax.block_until_ready(_reference(x, w1, b1, w2, b2, mix_param, 1.0))
    assert out.shape == (B, dim, H // 2, W // 2)
    np.testing.assert_allclose(np.asarray(out), np.asarray(ref),
                               rtol=1e-4, atol=1e-4)
    print("KERNEL_OK")
</pallas_src>

<mosaic_0001>
module attributes {stable_mosaic.version = 11 : i64} {
  func.func @_gap_kernel(%arg0: i32, %arg1: memref<1x256x32xf32, #tpu.memory_space<vmem>>, %arg2: memref<16x16xf32, #tpu.memory_space<vmem>>, %arg3: memref<16x8xf32, #tpu.memory_space<vmem>>, %arg4: memref<16x256xf32, #tpu.memory_space<vmem>>, %arg5: memref<16x1xf32, #tpu.memory_space<vmem>>, %arg6: memref<1x16xf32, #tpu.memory_space<vmem>>, %arg7: memref<1x1xf32, #tpu.memory_space<vmem>>, %arg8: memref<1xf32, #tpu.memory_space<smem>>, %arg9: memref<1x256x8xf32, #tpu.memory_space<vmem>>) attributes {dimension_semantics = [#tpu.dimension_semantics<parallel>], iteration_bounds = array<i64: 2>, scalar_prefetch = 0 : i64, scratch_operands = 0 : i64, tpu.core_type = #tpu.core_type<tc>, window_params = [{transform_indices = @transform_0, window_bounds = array<i64: 1, 256, 32>}, {pipeline_mode = #tpu.pipeline_mode<synchronous>, transform_indices = @transform_1, window_bounds = array<i64: 16, 16>}, {pipeline_mode = #tpu.pipeline_mode<synchronous>, transform_indices = @transform_2, window_bounds = array<i64: 16, 8>}, {pipeline_mode = #tpu.pipeline_mode<synchronous>, transform_indices = @transform_3, window_bounds = array<i64: 16, 256>}, {pipeline_mode = #tpu.pipeline_mode<synchronous>, transform_indices = @transform_4, window_bounds = array<i64: 16, 1>}, {pipeline_mode = #tpu.pipeline_mode<synchronous>, transform_indices = @transform_5, window_bounds = array<i64: 1, 16>}, {pipeline_mode = #tpu.pipeline_mode<synchronous>, transform_indices = @transform_6, window_bounds = array<i64: 1, 1>}, {transform_indices = @transform_7, window_bounds = array<i64: 1>}, {transform_indices = @transform_8, window_bounds = array<i64: 1, 256, 8>}]} {
    %c0 = arith.constant 0 : index
    %0 = memref.load %arg8[%c0] : memref<1xf32, #tpu.memory_space<smem>>
    %c0_0 = arith.constant 0 : index
    %c0_1 = arith.constant 0 : index
    %c0_2 = arith.constant 0 : index
    %1 = vector.load %arg1[%c0_0, %c0_1, %c0_2] : memref<1x256x32xf32, #tpu.memory_space<vmem>>, vector<1x256x32xf32>
    %2 = vector.extract_strided_slice %1 {offsets = [0, 0, 0], sizes = [1, 256, 16], strides = [1, 1, 1]} : vector<1x256x32xf32> to vector<1x256x16xf32>
    %3 = vector.extract_strided_slice %1 {offsets = [0, 0, 16], sizes = [1, 256, 16], strides = [1, 1, 1]} : vector<1x256x32xf32> to vector<1x256x16xf32>
    %4 = arith.maximumf %2, %3 : vector<1x256x16xf32>
    %5 = arith.addf %2, %3 : vector<1x256x16xf32>
    %6 = vector.shape_cast %4 : vector<1x256x16xf32> to vector<256x16xf32>
    %7 = vector.shape_cast %5 : vector<1x256x16xf32> to vector<256x16xf32>
    %c0_3 = arith.constant 0 : index
    %c0_4 = arith.constant 0 : index
    %8 = vector.load %arg2[%c0_3, %c0_4] : memref<16x16xf32, #tpu.memory_space<vmem>>, vector<16x16xf32>
    %cst = arith.constant dense<0.000000e+00> : vector<256x16xf32>
    %9 = tpu.matmul %6, %8, %cst {dimension_numbers = #tpu.dot_dimension_numbers<[1], [0], [0], [1], [0, 0, 1, 1], [], []>, precision = #tpu.contract_precision<fp32>} : vector<256x16xf32>, vector<16x16xf32>, vector<256x16xf32> -> vector<256x16xf32>
    %10 = vector.extract_strided_slice %9 {offsets = [0, 0], sizes = [256, 8], strides = [1, 1]} : vector<256x16xf32> to vector<256x8xf32>
    %11 = vector.extract_strided_slice %9 {offsets = [0, 8], sizes = [256, 8], strides = [1, 1]} : vector<256x16xf32> to vector<256x8xf32>
    %12 = arith.maximumf %10, %11 : vector<256x8xf32>
    %c0_5 = arith.constant 0 : index
    %c0_6 = arith.constant 0 : index
    %13 = vector.load %arg3[%c0_5, %c0_6] : memref<16x8xf32, #tpu.memory_space<vmem>>, vector<16x8xf32>
    %cst_7 = arith.constant dense<0.000000e+00> : vector<256x8xf32>
    %14 = tpu.matmul %7, %13, %cst_7 {dimension_numbers = #tpu.dot_dimension_numbers<[1], [0], [0], [1], [0, 0, 1, 1], [], []>, precision = #tpu.contract_precision<fp32>} : vector<256x16xf32>, vector<16x8xf32>, vector<256x8xf32> -> vector<256x8xf32>
    %cst_8 = arith.constant 2.500000e-01 : f32
    %15 = vector.broadcast %cst_8 : f32 to vector<256x8xf32>
    %16 = arith.mulf %14, %15 : vector<256x8xf32>
    %17 = vector.shape_cast %12 : vector<256x8xf32> to vector<1x256x8xf32>
    %18 = vector.shape_cast %16 : vector<256x8xf32> to vector<1x256x8xf32>
    %19 = arith.subf %18, %17 : vector<1x256x8xf32>
    %20 = vector.broadcast %0 : f32 to vector<1x256x8xf32>
    %21 = arith.mulf %20, %19 : vector<1x256x8xf32>
    %22 = arith.addf %17, %21 : vector<1x256x8xf32>
    %23 = arith.subf %18, %21 : vector<1x256x8xf32>
    %cst_9 = arith.constant dense<0.000000e+00> : vector<1x256xf32>
    %24 = vector.multi_reduction <add>, %17, %cst_9 [2] : vector<1x256x8xf32> to vector<1x256xf32>
    %25 = vector.shape_cast %24 : vector<1x256xf32> to vector<1x256x1xf32>
    %cst_10 = arith.constant dense<0.000000e+00> : vector<1x256xf32>
    %26 = vector.multi_reduction <add>, %18, %cst_10 [2] : vector<1x256x8xf32> to vector<1x256xf32>
    %27 = vector.shape_cast %26 : vector<1x256xf32> to vector<1x256x1xf32>
    %28 = arith.subf %27, %25 : vector<1x256x1xf32>
    %29 = vector.broadcast %0 : f32 to vector<1x256x1xf32>
    %30 = arith.mulf %29, %28 : vector<1x256x1xf32>
    %31 = arith.addf %25, %30 : vector<1x256x1xf32>
    %32 = arith.subf %27, %30 : vector<1x256x1xf32>
    %33 = vector.shape_cast %31 : vector<1x256x1xf32> to vector<256x1xf32>
    %34 = vector.shape_cast %32 : vector<1x256x1xf32> to vector<256x1xf32>
    %35 = tpu.concatenate %33, %34 in 1 : vector<256x1xf32>, vector<256x1xf32> -> vector<256x2xf32>
    %c0_11 = arith.constant 0 : index
    %c0_12 = arith.constant 0 : index
    %36 = vector.load %arg4[%c0_11, %c0_12] : memref<16x256xf32, #tpu.memory_space<vmem>>, vector<16x256xf32>
    %cst_13 = arith.constant dense<0.000000e+00> : vector<16x2xf32>
    %37 = tpu.matmul %36, %35, %cst_13 {dimension_numbers = #tpu.dot_dimension_numbers<[1], [0], [0], [1], [0, 0, 1, 1], [], []>, precision = #tpu.contract_precision<fp32>} : vector<16x256xf32>, vector<256x2xf32>, vector<16x2xf32> -> vector<16x2xf32>
    %cst_14 = arith.constant 1.562500e-02 : f32
    %38 = vector.broadcast %cst_14 : f32 to vector<16x2xf32>
    %39 = arith.mulf %37, %38 : vector<16x2xf32>
    %c0_15 = arith.constant 0 : index
    %c0_16 = arith.constant 0 : index
    %40 = vector.load %arg5[%c0_15, %c0_16] : memref<16x1xf32, #tpu.memory_space<vmem>>, vector<16x1xf32>
    %41 = vector.broadcast %40 : vector<16x1xf32> to vector<16x2xf32>
    %42 = arith.addf %39, %41 : vector<16x2xf32>
    %cst_17 = arith.constant 0.000000e+00 : f32
    %43 = vector.broadcast %cst_17 : f32 to vector<16x2xf32>
    %44 = arith.maximumf %42, %43 : vector<16x2xf32>
    %c0_18 = arith.constant 0 : index
    %c0_19 = arith.constant 0 : index
    %45 = vector.load %arg6[%c0_18, %c0_19] : memref<1x16xf32, #tpu.memory_space<vmem>>, vector<1x16xf32>
    %cst_20 = arith.constant dense<0.000000e+00> : vector<1x2xf32>
    %46 = tpu.matmul %45, %44, %cst_20 {dimension_numbers = #tpu.dot_dimension_numbers<[1], [0], [0], [1], [0, 0, 1, 1], [], []>, precision = #tpu.contract_precision<fp32>} : vector<1x16xf32>, vector<16x2xf32>, vector<1x2xf32> -> vector<1x2xf32>
    %c0_21 = arith.constant 0 : index
    %c0_22 = arith.constant 0 : index
    %47 = vector.load %arg7[%c0_21, %c0_22] : memref<1x1xf32, #tpu.memory_space<vmem>>, vector<1x1xf32>
    %48 = vector.broadcast %47 : vector<1x1xf32> to vector<1x2xf32>
    %49 = arith.addf %46, %48 : vector<1x2xf32>
    %cst_23 = arith.constant 0.000000e+00 : f32
    %50 = vector.broadcast %cst_23 : f32 to vector<1x2xf32>
    %51 = arith.subf %50, %49 : vector<1x2xf32>
    %52 = math.exp %51 : vector<1x2xf32>
    %cst_24 = arith.constant 1.000000e+00 : f32
    %53 = vector.broadcast %cst_24 : f32 to vector<1x2xf32>
    %54 = arith.addf %53, %52 : vector<1x2xf32>
    %cst_25 = arith.constant 1.000000e+00 : f32
    %55 = vector.broadcast %cst_25 : f32 to vector<1x2xf32>
    %56 = arith.divf %55, %54 : vector<1x2xf32>
    %cst_26 = arith.constant 1.000000e-10 : f32
    %57 = vector.broadcast %cst_26 : f32 to vector<1x2xf32>
    %58 = arith.addf %56, %57 : vector<1x2xf32>
    %59 = math.log %58 : vector<1x2xf32>
    %cst_27 = arith.constant 1.000000e+00 : f32
    %60 = vector.broadcast %cst_27 : f32 to vector<1x2xf32>
    %61 = arith.subf %60, %56 : vector<1x2xf32>
    %cst_28 = arith.constant 1.000000e-10 : f32
    %62 = vector.broadcast %cst_28 : f32 to vector<1x2xf32>
    %63 = arith.addf %61, %62 : vector<1x2xf32>
    %64 = math.log %63 : vector<1x2xf32>
    %65 = arith.subf %59, %64 : vector<1x2xf32>
    %cst_29 = arith.constant 1.000000e+00 : f32
    %66 = vector.broadcast %cst_29 : f32 to vector<1x2xf32>
    %67 = arith.mulf %65, %66 : vector<1x2xf32>
    %cst_30 = arith.constant 0.000000e+00 : f32
    %68 = vector.broadcast %cst_30 : f32 to vector<1x2xf32>
    %69 = arith.subf %68, %67 : vector<1x2xf32>
    %70 = math.exp %69 : vector<1x2xf32>
    %cst_31 = arith.constant 1.000000e+00 : f32
    %71 = vector.broadcast %cst_31 : f32 to vector<1x2xf32>
    %72 = arith.addf %71, %70 : vector<1x2xf32>
    %cst_32 = arith.constant 1.000000e+00 : f32
    %73 = vector.broadcast %cst_32 : f32 to vector<1x2xf32>
    %74 = arith.divf %73, %72 : vector<1x2xf32>
    %75 = vector.extract_strided_slice %74 {offsets = [0, 0], sizes = [1, 1], strides = [1, 1]} : vector<1x2xf32> to vector<1x1xf32>
    %76 = vector.extract_strided_slice %74 {offsets = [0, 1], sizes = [1, 1], strides = [1, 1]} : vector<1x2xf32> to vector<1x1xf32>
    %77 = vector.shape_cast %22 : vector<1x256x8xf32> to vector<256x8xf32>
    %78 = vector.broadcast %75 : vector<1x1xf32> to vector<256x8xf32>
    %79 = arith.mulf %78, %77 : vector<256x8xf32>
    %80 = vector.shape_cast %23 : vector<1x256x8xf32> to vector<256x8xf32>
    %81 = vector.broadcast %76 : vector<1x1xf32> to vector<256x8xf32>
    %82 = arith.mulf %81, %80 : vector<256x8xf32>
    %83 = arith.maximumf %79, %82 : vector<256x8xf32>
    %c0_33 = arith.constant 0 : index
    %c0_34 = arith.constant 0 : index
    %c0_35 = arith.constant 0 : index
    %84 = vector.load %arg9[%c0_33, %c0_34, %c0_35] : memref<1x256x8xf32, #tpu.memory_space<vmem>>, vector<1x256x8xf32>
    %85 = vector.shape_cast %84 : vector<1x256x8xf32> to vector<256x8xf32>
    %86 = vector.shape_cast %83 : vector<256x8xf32> to vector<1x256x8xf32>
    tpu.vector_store %arg9[%c0_33, %c0_34, %c0_35], %86 {strides = array<i32>} : memref<1x256x8xf32, #tpu.memory_space<vmem>>, vector<1x256x8xf32>,
    return
  }
  func.func @transform_0(%arg0: i32) -> (i32, i32, i32) {
    %c0_i32 = arith.constant 0 : i32
    %c0_i32_0 = arith.constant 0 : i32
    %c0_i32_1 = arith.constant 0 : i32
    return %arg0, %c0_i32, %c0_i32_0 : i32, i32, i32
  }
  func.func @transform_1(%arg0: i32) -> (i32, i32) {
    %c0_i32 = arith.constant 0 : i32
    %c0_i32_0 = arith.constant 0 : i32
    %c0_i32_1 = arith.constant 0 : i32
    return %c0_i32, %c0_i32_0 : i32, i32
  }
  func.func @transform_2(%arg0: i32) -> (i32, i32) {
    %c0_i32 = arith.constant 0 : i32
    %c0_i32_0 = arith.constant 0 : i32
    %c0_i32_1 = arith.constant 0 : i32
    return %c0_i32, %c0_i32_0 : i32, i32
  }
  func.func @transform_3(%arg0: i32) -> (i32, i32) {
    %c0_i32 = arith.constant 0 : i32
    %c0_i32_0 = arith.constant 0 : i32
    %c0_i32_1 = arith.constant 0 : i32
    return %c0_i32, %c0_i32_0 : i32, i32
  }
  func.func @transform_4(%arg0: i32) -> (i32, i32) {
    %c0_i32 = arith.constant 0 : i32
    %c0_i32_0 = arith.constant 0 : i32
    %c0_i32_1 = arith.constant 0 : i32
    return %c0_i32, %c0_i32_0 : i32, i32
  }
  func.func @transform_5(%arg0: i32) -> (i32, i32) {
    %c0_i32 = arith.constant 0 : i32
    %c0_i32_0 = arith.constant 0 : i32
    %c0_i32_1 = arith.constant 0 : i32
    return %c0_i32, %c0_i32_0 : i32, i32
  }
  func.func @transform_6(%arg0: i32) -> (i32, i32) {
    %c0_i32 = arith.constant 0 : i32
    %c0_i32_0 = arith.constant 0 : i32
    %c0_i32_1 = arith.constant 0 : i32
    return %c0_i32, %c0_i32_0 : i32, i32
  }
  func.func @transform_7(%arg0: i32) -> i32 {
    %c0_i32 = arith.constant 0 : i32
    %c0_i32_0 = arith.constant 0 : i32
    return %c0_i32 : i32
  }
  func.func @transform_8(%arg0: i32) -> (i32, i32, i32) {
    %c0_i32 = arith.constant 0 : i32
    %c0_i32_0 = arith.constant 0 : i32
    %c0_i32_1 = arith.constant 0 : i32
    return %arg0, %c0_i32, %c0_i32_0 : i32, i32, i32
  }
}

</mosaic_0001>

<bundles_post_ra>
// kernel: gated_attention_pool.1
= control target key start
LH: loop header
LB: loop body
LE: loop exit
PB: predicated region body
PF: predicated region fallthrough
CT: control target
= control target key end

     0   :  { %s8077_s9 = smov 0   ;;  %s12449_s0 = inlined_call_operand.vmem [shape: f32[2,256,32], index: 0, kind: input, shape index: {}]   ;;  %s12450_s1 = inlined_call_operand.vmem [shape: f32[16,16], index: 1, kind: input, shape index: {}]   ;;  %s12451_s2 = inlined_call_operand.vmem [shape: f32[16,8], index: 2, kind: input, shape index: {}]   ;;  %s12452_s3 = inlined_call_operand.vmem [shape: f32[16,256], index: 3, kind: input, shape index: {}]   ;;  %s12453_s4 = inlined_call_operand.vmem [shape: f32[16,1], index: 4, kind: input, shape index: {}]   ;;  %s12454_s5 = inlined_call_operand.vmem [shape: f32[1,16], index: 5, kind: input, shape index: {}]   ;;  %s12455_s6 = inlined_call_operand.<no memory space> [shape: f32[1,1], index: 6, kind: input, shape index: {}]   ;;  %s12456_s7 = inlined_call_operand.<no memory space> [shape: f32[1], index: 7, kind: input, shape index: {}]   ;;  %s12457_s8 = inlined_call_operand.vmem [shape: f32[2,256,8], index: 8, kind: output, shape index: {}]  }
   0x1   :  { %v13_v0 = vstv %s12455_s6  ;;  %15 = sst [smem:[#allocation3]] %s12456_s7 }
   0x2   :  { %14 = vst [vmem:[#allocation2] sm:$0x1] %v13_v0 }
   0x3 LB: > { %s6615_s10 = sadd.s32 4294967295, %s8018_s9   ;;  %p6619_p0 = scmp.ge.s32.totalorder %s8018_s9, 1  ;;  %s8018_s9 = sphi %s8077_s9, %s21_s9  }
   0x4   : > { %p265_p1 = scmp.lt.s32.totalorder %s8018_s9, 3 }
   0x6   : > { %p266_p2 = pnand %p6619_p0, %p265_p1 }
   0x8   : > { %269 = sbr.rel (%p266_p2) target bundleno = 1765 (0x6e5), region = 52 }
   0xd   : > { %p299_p3 = scmp.lt.s32.totalorder %s6615_s10, 1  ;;  %v535_v1 = vld [vmem:[%s12450_s1 + $0x8] sm:$0xff]  ;;  %v534_v2 = vld [vmem:[%s12450_s1] sm:$0xff]  ;;  %s8020_s17 = smov 112   ;;  %vm536_vm0 = vcmask 130048   ;;  %vm4636_vm1 = vcmask 64512  }
   0xe   : > { %v8091_v3 = vand.u32 4294901760, %v535_v1  ;;  %v8093_v4 = vand.u32 4294901760, %v534_v2  ;;  %s8021_s22 = smov 120   ;;  %s10618_s23 = sld [smem:[#allocation3]]  ;;  %vm4957_vm2 = vcmask 7168   ;;  %vm8024_vm3 = vmmov 0  }
   0xf   : > { %s13585_s10 = smov (!%p299_p3, %s6615_s10), 1 }
  0x10   : > { %v8098_v5 = vsub.f32 %v535_v1, %v8091_v3  ;;  %v8101_v6 = vsub.f32 %v534_v2, %v8093_v4  ;;  %7282 = vmatprep.subr.mxu0 %v8091_v3  ;;  %s6626_s13 = sshll.u32 %s13585_s10, 8 }
  0x11   : > { %7283 = vmatpush3.msra.mxu0 %v8091_v3  ;;  %s8111_s16 = scalar_lea.vmem %s12449_s0, %s6626_s13 }
  0x12   : > { %v8114_v7 = vand.u32 4294901760, %v8098_v5  ;;  %v8117_v8 = vand.u32 4294901760, %v8101_v6  ;;  %7284 = vmatprep.subr.mxu0 %v8093_v4  ;;  %v8121_v9 = vld [vmem:[%s8111_s16 + $0x10] sm:$0xff]  ;;  %v8124_v10 = vld [vmem:[%s8111_s16] sm:$0xff]  ;;  %v8136_v13 = vld [vmem:[%s8111_s16 + $0x18] sm:$0xff] }
  0x13   : > { %7285 = vmatpush3.msra.mxu0 %v8093_v4  ;;  %378 = vrot.lane.b32.xlu1 %v8121_v9, %s8020_s17  ;;  %v8139_v14 = vld [vmem:[%s8111_s16 + $0x8] sm:$0xff]  ;;  %v8150_v18 = vld [vmem:[%s8111_s16 + $0x20] sm:$0xff]  ;;  %v8157_v19 = vld [vmem:[%s8111_s16 + $0x38] sm:$0xff] }
  0x14   : > { %374 = vrot.lane.b32.xlu0 %v8124_v10, %s8020_s17  ;;  %v1052_v11 = vsub.f32 %v8098_v5, %v8114_v7  ;;  %v1059_v12 = vsub.f32 %v8101_v6, %v8117_v8  ;;  %7386 = vmatprep.subr.mxu0 %v8098_v5  ;;  %v8147_v17 = vld [vmem:[%s8111_s16 + $0x28] sm:$0xff]  ;;  %v8160_v20 = vld [vmem:[%s8111_s16 + $0x30] sm:$0xff]  ;;  %v8171_v22 = vld [vmem:[%s8111_s16 + $0x40] sm:$0xff] }
  0x15   : > { %v8168_v21 = vld [vmem:[%s8111_s16 + $0x48] sm:$0xff]  ;;  %v8178_v23 = vld [vmem:[%s8111_s16 + $0x58] sm:$0xff]  ;;  %v8181_v24 = vld [vmem:[%s8111_s16 + $0x50] sm:$0xff] }
  0x16   : > { %v1053_v15 = vand.u32 4294901760, %v1052_v11  ;;  %v1060_v16 = vand.u32 4294901760, %v1059_v12  ;;  %v8188_v25 = vld [vmem:[%s8111_s16 + $0x68] sm:$0xff]  ;;  %v8191_v26 = vld [vmem:[%s8111_s16 + $0x60] sm:$0xff]  ;;  %v8198_v27 = vld [vmem:[%s8111_s16 + $0x78] sm:$0xff] }
  0x17   : > { %380 = vrot.lane.b32.xlu1 %v8136_v13, %s8020_s17  ;;  %v8201_v28 = vld [vmem:[%s8111_s16 + $0x70] sm:$0xff]  ;;  %v8208_v29 = vld [vmem:[%s8111_s16 + $0x88] sm:$0xff]  ;;  %v8211_v30 = vld [vmem:[%s8111_s16 + $0x80] sm:$0xff] }
  0x18   : > { %376 = vrot.lane.b32.xlu0 %v8139_v14, %s8020_s17  ;;  %7334 = vmatprep.subr.mxu1 %v1053_v15  ;;  %v8218_v31 = vld [vmem:[%s8111_s16 + $0x98] sm:$0xff]  ;;  %v8221_v32 = vld [vmem:[%s8111_s16 + $0x90] sm:$0xff]  ;;  %v8228_v33 = vld [vmem:[%s8111_s16 + $0xa8] sm:$0xff] }
  0x19   : > { %7335 = vmatpush3.msra.mxu1 %v1053_v15  ;;  %v8231_v34 = vld [vmem:[%s8111_s16 + $0xa0] sm:$0xff]  ;;  %v8238_v35 = vld [vmem:[%s8111_s16 + $0xb8] sm:$0xff]  ;;  %v8241_v36 = vld [vmem:[%s8111_s16 + $0xb0] sm:$0xff] }
  0x1a   : > { %7336 = vmatprep.subr.mxu1 %v1060_v16  ;;  %v8248_v37 = vld [vmem:[%s8111_s16 + $0xc8] sm:$0xff]  ;;  %v8251_v38 = vld [vmem:[%s8111_s16 + $0xc0] sm:$0xff]  ;;  %v8258_v39 = vld [vmem:[%s8111_s16 + $0xd8] sm:$0xff] }
  0x1b   : > { %384 = vrot.lane.b32.xlu1 %v8147_v17, %s8020_s17  ;;  %7337 = vmatpush3.msra.mxu1 %v1060_v16  ;;  %v8261_v40 = vld [vmem:[%s8111_s16 + $0xd0] sm:$0xff]  ;;  %v8268_v41 = vld [vmem:[%s8111_s16 + $0xe8] sm:$0xff]  ;;  %v8271_v42 = vld [vmem:[%s8111_s16 + $0xe0] sm:$0xff] }
  0x1c   : > { %382 = vrot.lane.b32.xlu0 %v8150_v18, %s8020_s17  ;;  %7438 = vmatprep.subr.mxu1 %v8091_v3  ;;  %v8278_v43 = vld [vmem:[%s8111_s16 + $0xf8] sm:$0xff]  ;;  %v8281_v44 = vld [vmem:[%s8111_s16 + $0xf0] sm:$0xff] }
  0x1f   : > { %388 = vrot.lane.b32.xlu1 %v8157_v19, %s8020_s17 }
  0x20   : > { %386 = vrot.lane.b32.xlu0 %v8160_v20, %s8020_s17 }
  0x23   : > { %392 = vrot.lane.b32.xlu1 %v8168_v21, %s8020_s17 }
  0x24   : > { %390 = vrot.lane.b32.xlu0 %v8171_v22, %s8020_s17 }
  0x27   : > { %396 = vrot.lane.b32.xlu1 %v8178_v23, %s8020_s17 }
  0x28   : > { %394 = vrot.lane.b32.xlu0 %v8181_v24, %s8020_s17 }
  0x2b   : > { %400 = vrot.lane.b32.xlu1 %v8188_v25, %s8020_s17 }
  0x2c   : > { %398 = vrot.lane.b32.xlu0 %v8191_v26, %s8020_s17 }
  0x2f   : > { %404 = vrot.lane.b32.xlu1 %v8198_v27, %s8020_s17 }
  0x30   : > { %402 = vrot.lane.b32.xlu0 %v8201_v28, %s8020_s17 }
  0x33   : > { %408 = vrot.lane.b32.xlu1 %v8208_v29, %s8020_s17 }
  0x34   : > { %406 = vrot.lane.b32.xlu0 %v8211_v30, %s8020_s17 }
  0x37   : > { %412 = vrot.lane.b32.xlu1 %v8218_v31, %s8020_s17 }
  0x38   : > { %410 = vrot.lane.b32.xlu0 %v8221_v32, %s8020_s17 }
  0x3b   : > { %416 = vrot.lane.b32.xlu1 %v8228_v33, %s8020_s17 }
  0x3c   : > { %414 = vrot.lane.b32.xlu0 %v8231_v34, %s8020_s17 }
  0x3f   : > { %420 = vrot.lane.b32.xlu1 %v8238_v35, %s8020_s17 }
  0x40   : > { %418 = vrot.lane.b32.xlu0 %v8241_v36, %s8020_s17 }
  0x43   : > { %424 = vrot.lane.b32.xlu1 %v8248_v37, %s8020_s17 }
  0x44   : > { %422 = vrot.lane.b32.xlu0 %v8251_v38, %s8020_s17 }
  0x47   : > { %428 = vrot.lane.b32.xlu1 %v8258_v39, %s8020_s17 }
  0x48   : > { %426 = vrot.lane.b32.xlu0 %v8261_v40, %s8020_s17 }
  0x4b   : > { %432 = vrot.lane.b32.xlu1 %v8268_v41, %s8020_s17 }
  0x4c   : > { %430 = vrot.lane.b32.xlu0 %v8271_v42, %s8020_s17 }
  0x4f   : > { %436 = vrot.lane.b32.xlu1 %v8278_v43, %s8020_s17 }
  0x50   : > { %434 = vrot.lane.b32.xlu0 %v8281_v44, %s8020_s17  ;;  %s8025_s17 = smov 127  }
  0x85   : > { %v8287_v45 = vpop.permute.xlu1 %378 }
  0x86   : > { %12828 = vst [vmem:[#allocation4_spill] sm:$0xff] %v8287_v45  ;;  %v8289_v46 = vpop.permute.xlu0 %374  ;;  %v472_v48 = vmax.f32 %v8121_v9, %v8287_v45 }
  0x87   : > { %12829 = vst [vmem:[#allocation5_spill] sm:$0xff] %v8289_v46  ;;  %v470_v47 = vmax.f32 %v8124_v10, %v8289_v46 }
  0x88   : > { %v544_v55 = vsel %vm536_vm0, %v472_v48, 0 }
  0x89   : > { %v538_v49 = vsel %vm536_vm0, %v470_v47, 0  ;;  %v8298_v51 = vpop.permute.xlu1 %380  ;;  %v8315_v60 = vand.u32 4294901760, %v544_v55 }
  0x8a   : > { %v8296_v50 = vand.u32 4294901760, %v538_v49  ;;  %12830 = vst [vmem:[#allocation6_spill] sm:$0xff] %v8298_v51  ;;  %v8300_v52 = vpop.permute.xlu0 %376  ;;  %v473_v53 = vmax.f32 %v8136_v13, %v8298_v51 }
  0x8b   : > { %12831 = vst [vmem:[#allocation7_spill] sm:$0xff] %v8300_v52  ;;  %v471_v54 = vmax.f32 %v8139_v14, %v8300_v52 }
  0x8c   : > { %7338 = vmatprep.mubr.f32.mxu1 %v8296_v50  ;;  %v547_v61 = vsel %vm536_vm0, %v473_v53, 0  ;;  %v8333_v10 = vsub.f32 %v538_v49, %v8296_v50  ;;  %v8366_v53 = vsub.f32 %v544_v55, %v8315_v60 }
  0x8d   : > { %v541_v56 = vsel %vm536_vm0, %v471_v54, 0  ;;  %v8311_v58 = vpop.permute.xlu1 %384  ;;  %v8326_v1 = vand.u32 4294901760, %v547_v61 }
  0x8e   : > { %v8309_v57 = vand.u32 4294901760, %v541_v56  ;;  %12832 = vst [vmem:[#allocation8_spill] sm:$0xff] %v8311_v58  ;;  %v8313_v59 = vpop.permute.xlu0 %382  ;;  %v475_v62 = vmax.f32 %v8147_v17, %v8311_v58  ;;  %v12458_v48 = vand.u32 4294901760, %v8333_v10 }
  0x8f   : > { %12833 = vst [vmem:[#allocation9_spill] sm:$0xff] %v8313_v59  ;;  %v474_v63 = vmax.f32 %v8150_v18, %v8313_v59 }
  0x90   : > { %7339 = vmatmul.mubr.f32.vlgmr.msra.gmra.mxu1 %v8309_v57  ;;  %v553_v11 = vsel %vm536_vm0, %v475_v62, 0  ;;  %v8348_v15 = vsub.f32 %v541_v56, %v8309_v57  ;;  %v703_v54 = vsub.f32 %v8333_v10, %v12458_v48 }
  0x91   : > { %v550_v0 = vsel %vm536_vm0, %v474_v63, 0  ;;  %7341 = vmatprep.mubr.f32.mxu1 %v8315_v60  ;;  %7439 = vmatpush3.msra.mxu1 %v8091_v3  ;;  %v8328_v2 = vpop.permute.xlu1 %388  ;;  %v8350_v16 = vand.u32 4294901760, %v553_v11 }
  0x92   : > { %12834 = vst [vmem:[#allocation10_spill] sm:$0xff] %v8328_v2  ;;  %v8330_v9 = vpop.permute.xlu0 %386  ;;  %7440 = vmatprep.subr.mxu1 %v8093_v4  ;;  %v8337_v12 = vand.u32 4294901760, %v550_v0  ;;  %v477_v13 = vmax.f32 %v8157_v19, %v8328_v2  ;;  %v704_v55 = vand.u32 4294901760, %v703_v54  ;;  %v12464_v48 = vand.u32 4294901760, %v8348_v15 }
  0x93   : > { %12835 = vst [vmem:[#allocation11_spill] sm:$0xff] %v8330_v9  ;;  %v476_v14 = vmax.f32 %v8160_v20, %v8330_v9  ;;  %7441 = vmatpush3.msra.mxu1 %v8093_v4 }
  0x94   : > { %7342 = vmatmul.mubr.f32.gmra.mxu1 %v8326_v1  ;;  %7542 = vmatprep.subr.mxu1 %v8091_v3  ;;  %v8358_v20 = vsel %vm536_vm0, %v477_v13, 0  ;;  %v713_v54 = vsub.f32 %v8348_v15, %v12464_v48 }
  0x95   : > { %7344 = vmatprep.mubr.f32.mxu1 %v8337_v12  ;;  %v556_v17 = vsel %vm536_vm0, %v476_v14, 0  ;;  %v8353_v18 = vpop.permute.xlu1 %392  ;;  %v8376_v62 = vand.u32 4294901760, %v8358_v20  ;;  %7286 = vmatprep.mubr.f32.mxu0 %v704_v55 }
  0x96   : > { %12836 = vst [vmem:[#allocation12_spill] sm:$0xff] %v8353_v18  ;;  %v8355_v19 = vpop.permute.xlu0 %390  ;;  %v8360_v47 = vand.u32 4294901760, %v556_v17  ;;  %v479_v49 = vmax.f32 %v8168_v21, %v8353_v18 }
  0x97   : > { %12837 = vst [vmem:[#allocation13_spill] sm:$0xff] %v8355_v19  ;;  %v478_v56 = vmax.f32 %v8171_v22, %v8355_v19  ;;  %v12466_v22 = vand.u32 4294901760, %v8366_v53  ;;  %v8392_v19 = vsub.f32 %v547_v61, %v8326_v1 }
  0x98   : > { %7345 = vmatmul.mubr.f32.gmra.mxu1 %v8350_v16  ;;  %v8383_v13 = vsel %vm536_vm0, %v479_v49, 0 }
  0x99   : > { %7347 = vmatprep.mubr.f32.mxu1 %v8360_v47  ;;  %v8378_v63 = vpop.permute.xlu1 %396  ;;  %v562_v14 = vsel %vm536_vm0, %v478_v56, 0  ;;  %v8400_v56 = vsub.f32 %v550_v0, %v8337_v12  ;;  %v8403_v2 = vand.u32 4294901760, %v8383_v13  ;;  %v723_v9 = vsub.f32 %v8366_v53, %v12466_v22 }
  0x9a   : > { %12838 = vst [vmem:[#allocation14_spill] sm:$0xff] %v8378_v63  ;;  %v8380_v21 = vpop.permute.xlu0 %394  ;;  %v8387_v18 = vand.u32 4294901760, %v562_v14  ;;  %v481_v49 = vmax.f32 %v8178_v23, %v8378_v63  ;;  %v714_v23 = vand.u32 4294901760, %v713_v54 }
  0x9b   : > { %12839 = vst [vmem:[#allocation15_spill] sm:$0xff] %v8380_v21  ;;  %12840 = vst [vmem:[#allocation16_spill] sm:$0xff] %v8403_v2  ;;  %v480_v61 = vmax.f32 %v8181_v24, %v8380_v21  ;;  %v724_v48 = vand.u32 4294901760, %v723_v9  ;;  %v12469_v24 = vand.u32 4294901760, %v8392_v19  ;;  %v8424_v21 = vsub.f32 %v553_v11, %v8350_v16 }
  0x9c   : > { %7348 = vmatmul.mubr.f32.gmra.mxu1 %v8376_v62  ;;  %v8416_v0 = vsel %vm536_vm0, %v481_v49, 0  ;;  %7287 = vmatmul.mubr.f32.vlgmr.msra.gmra.mxu0 %v714_v23  ;;  %v12472_v54 = vand.u32 4294901760, %v8400_v56  ;;  %v8438_v23 = vsub.f32 %v556_v17, %v8360_v47 }
  0x9d   : > { %v8410_v55 = vpop.permute.xlu1 %400  ;;  %7350 = vmatprep.mubr.f32.mxu1 %v8387_v18  ;;  %v568_v63 = vsel %vm536_vm0, %v480_v61, 0  ;;  %7289 = vmatprep.mubr.f32.mxu0 %v724_v48  ;;  %v8427_v59 = vand.u32 4294901760, %v8416_v0  ;;  %v733_v11 = vsub.f32 %v8392_v19, %v12469_v24  ;;  %v12475_v51 = vand.u32 4294901760, %v8424_v21 }
  0x9e   : > { %12841 = vst [vmem:[#allocation17_spill] sm:$0xff] %v8410_v55  ;;  %v8412_v58 = vpop.permute.xlu0 %398  ;;  %v8420_v22 = vand.u32 4294901760, %v568_v63  ;;  %v483_v9 = vmax.f32 %v8188_v25, %v8410_v55  ;;  %7387 = vmatpush3.msra.mxu0 %v8098_v5  ;;  %v743_v48 = vsub.f32 %v8400_v56, %v12472_v54 }
  0x9f   : > { %12842 = vst [vmem:[#allocation18_spill] sm:$0xff] %v8412_v58  ;;  %v482_v25 = vmax.f32 %v8191_v26, %v8412_v58  ;;  %7388 = vmatprep.subr.mxu0 %v8101_v6  ;;  %v734_v5 = vand.u32 4294901760, %v733_v11  ;;  %v12478_v26 = vand.u32 4294901760, %v8438_v23  ;;  %v753_v11 = vsub.f32 %v8424_v21, %v12475_v51 }
  0xa0   : > { %7351 = vmatmul.mubr.f32.gmra.mxu1 %v8403_v2  ;;  %12843 = vst [vmem:[#allocation19_spill] sm:$0xff] %v8420_v22  ;;  %v8452_v17 = vsel %vm536_vm0, %v483_v9, 0  ;;  %7389 = vmatpush3.msra.mxu0 %v8101_v6  ;;  %v744_v24 = vand.u32 4294901760, %v743_v48  ;;  %v8465_v9 = vsub.f32 %v8358_v20, %v8376_v62 }
  0xa1   : > { %v8432_v49 = vpop.permute.xlu1 %404  ;;  %7353 = vmatprep.mubr.f32.mxu1 %v8420_v22  ;;  %v574_v55 = vsel %vm536_vm0, %v482_v25, 0  ;;  %7490 = vmatprep.subr.mxu0 %v8114_v7  ;;  %v8468_v6 = vand.u32 4294901760, %v8452_v17  ;;  %v763_v20 = vsub.f32 %v8438_v23, %v12478_v26  ;;  %v754_v45 = vand.u32 4294901760, %v753_v11 }
  0xa2   : > { %12844 = vst [vmem:[#allocation20_spill] sm:$0xff] %v8432_v49  ;;  %v8434_v61 = vpop.permute.xlu0 %402  ;;  %7290 = vmatmul.mubr.f32.gmra.mxu0 %v734_v5  ;;  %v8458_v54 = vand.u32 4294901760, %v574_v55  ;;  %v485_v48 = vmax.f32 %v8198_v27, %v8432_v49  ;;  %v8478_v5 = vsub.f32 %v562_v14, %v8387_v18  ;;  %v12481_v52 = vand.u32 4294901760, %v8465_v9 }
  0xa3   : > { %12845 = vst [vmem:[#allocation21_spill] sm:$0xff] %v8434_v61  ;;  %7292 = vmatprep.mubr.f32.mxu0 %v744_v24  ;;  %12848 = vst [vmem:[#allocation24_spill] sm:$0xff] %v8468_v6  ;;  %v484_v24 = vmax.f32 %v8201_v28, %v8434_v61  ;;  %v764_v27 = vand.u32 4294901760, %v763_v20  ;;  %v8496_v26 = vsub.f32 %v8383_v13, %v8403_v2 }
  0xa4   : > { %7354 = vmatmul.mubr.f32.gmra.mxu1 %v8427_v59  ;;  %12846 = vst [vmem:[#allocation22_spill] sm:$0xff] %v8458_v54  ;;  %v8487_v51 = vsel %vm536_vm0, %v485_v48, 0  ;;  %v12487_v11 = vand.u32 4294901760, %v8478_v5 }
  0xa5   : > { %v8461_v58 = vpop.permute.xlu1 %408  ;;  %7356 = vmatprep.mubr.f32.mxu1 %v8458_v54  ;;  %v580_v49 = vsel %vm536_vm0, %v484_v24, 0  ;;  %v8499_v28 = vand.u32 4294901760, %v8487_v51  ;;  %v773_v24 = vsub.f32 %v8465_v9, %v12481_v52  ;;  %v12488_v46 = vand.u32 4294901760, %v8496_v26 }
  0xa6   : > { %12847 = vst [vmem:[#allocation23_spill] sm:$0xff] %v8461_v58  ;;  %v8475_v25 = vpop.permute.xlu0 %406  ;;  %7293 = vmatmul.mubr.f32.gmra.mxu0 %v754_v45  ;;  %v8491_v14 = vand.u32 4294901760, %v580_v49  ;;  %v487_v48 = vmax.f32 %v8208_v29, %v8461_v58  ;;  %v8507_v45 = vsub.f32 %v568_v63, %v8420_v22 }
  0xa7   : > { %12849 = vst [vmem:[#allocation25_spill] sm:$0xff] %v8475_v25  ;;  %7295 = vmatprep.mubr.f32.mxu0 %v764_v27  ;;  %12851 = vst [vmem:[#allocation27_spill] sm:$0xff] %v8499_v28  ;;  %v783_v27 = vsub.f32 %v8478_v5, %v12487_v11  ;;  %v486_v29 = vmax.f32 %v8211_v30, %v8475_v25  ;;  %v774_v58 = vand.u32 4294901760, %v773_v24 }
  0xa8   : > { %7357 = vmatmul.mubr.f32.gmra.mxu1 %v8468_v6  ;;  %12850 = vst [vmem:[#allocation26_spill] sm:$0xff] %v8491_v14  ;;  %v8522_v63 = vsel %vm536_vm0, %v487_v48, 0  ;;  %v12491_v2 = vand.u32 4294901760, %v8507_v45  ;;  %v8531_v11 = vsub.f32 %v8416_v0, %v8427_v59  ;;  %v793_v48 = vsub.f32 %v8496_v26, %v12488_v46 }
  0xa9   : > { %v8504_v20 = vpop.permute.xlu1 %412  ;;  %7359 = vmatprep.mubr.f32.mxu1 %v8491_v14  ;;  %v784_v61 = vand.u32 4294901760, %v783_v27  ;;  %v586_v52 = vsel %vm536_vm0, %v486_v29, 0  ;;  %v8534_v30 = vand.u32 4294901760, %v8522_v63  ;;  %v8544_v27 = vsub.f32 %v574_v55, %v8458_v54 }
  0xaa   : > { %12852 = vst [vmem:[#allocation28_spill] sm:$0xff] %v8504_v20  ;;  %v8512_v13 = vpop.permute.xlu0 %410  ;;  %7296 = vmatmul.mubr.f32.gmra.mxu0 %v774_v58  ;;  %v8526_v22 = vand.u32 4294901760, %v586_v52  ;;  %v489_v24 = vmax.f32 %v8218_v31, %v8504_v20  ;;  %v803_v0 = vsub.f32 %v8507_v45, %v12491_v2  ;;  %v794_v46 = vand.u32 4294901760, %v793_v48 }
  0xab   : > { %12853 = vst [vmem:[#allocation29_spill] sm:$0xff] %v8512_v13  ;;  %7298 = vmatprep.mubr.f32.mxu0 %v784_v61  ;;  %12855 = vst [vmem:[#allocation31_spill] sm:$0xff] %v8534_v30  ;;  %v488_v61 = vmax.f32 %v8221_v32, %v8512_v13  ;;  %v12495_v2 = vand.u32 4294901760, %v8531_v11  ;;  %v8564_v32 = vsub.f32 %v8452_v17, %v8468_v6 }
  0xac   : > { %7360 = vmatmul.mubr.f32.gmra.mxu1 %v8499_v28  ;;  %12854 = vst [vmem:[#allocation30_spill] sm:$0xff] %v8526_v22  ;;  %v8555_v25 = vsel %vm536_vm0, %v489_v24, 0  ;;  %v804_v31 = vand.u32 4294901760, %v803_v0  ;;  %v12501_v24 = vand.u32 4294901760, %v8544_v27 }
  0xad   : > { %v8541_v58 = vpop.permute.xlu1 %416  ;;  %7362 = vmatprep.mubr.f32.mxu1 %v8526_v22  ;;  %v592_v55 = vsel %vm536_vm0, %v488_v61, 0  ;;  %v8567_v48 = vand.u32 4294901760, %v8555_v25  ;;  %v8573_v61 = vsub.f32 %v580_v49, %v8491_v14  ;;  %v12503_v14 = vand.u32 4294901760, %v8564_v32 }
  0xae   : > { %12856 = vst [vmem:[#allocation32_spill] sm:$0xff] %v8541_v58  ;;  %v8551_v29 = vpop.permute.xlu0 %414  ;;  %7299 = vmatmul.mubr.f32.gmra.mxu0 %v794_v46  ;;  %v8559_v20 = vand.u32 4294901760, %v592_v55  ;;  %v491_v0 = vmax.f32 %v8228_v33, %v8541_v58  ;;  %v813_v46 = vsub.f32 %v8531_v11, %v12495_v2  ;;  %v823_v17 = vsub.f32 %v8544_v27, %v12501_v24 }
  0xaf   : > { %12857 = vst [vmem:[#allocation33_spill] sm:$0xff] %v8551_v29  ;;  %7301 = vmatprep.mubr.f32.mxu0 %v804_v31  ;;  %12859 = vst [vmem:[#allocation35_spill] sm:$0xff] %v8567_v48  ;;  %v490_v31 = vmax.f32 %v8231_v34, %v8551_v29  ;;  %v12506_v24 = vand.u32 4294901760, %v8573_v61  ;;  %v8599_v34 = vsub.f32 %v8487_v51, %v8499_v28 }
  0xb0   : > { %7363 = vmatmul.mubr.f32.gmra.mxu1 %v8534_v30  ;;  %12858 = vst [vmem:[#allocation34_spill] sm:$0xff] %v8559_v20  ;;  %v814_v33 = vand.u32 4294901760, %v813_v46  ;;  %v8590_v49 = vsel %vm536_vm0, %v491_v0, 0  ;;  %v824_v2 = vand.u32 4294901760, %v823_v17  ;;  %v833_v0 = vsub.f32 %v8564_v32, %v12503_v14 }
  0xb1   : > { %v8578_v13 = vpop.permute.xlu1 %420  ;;  %7365 = vmatprep.mubr.f32.mxu1 %v8559_v20  ;;  %v598_v58 = vsel %vm536_vm0, %v490_v31, 0  ;;  %v8602_v46 = vand.u32 4294901760, %v8590_v49  ;;  %v8610_v31 = vsub.f32 %v586_v52, %v8526_v22 }
  0xb2   : > { %12860 = vst [vmem:[#allocation36_spill] sm:$0xff] %v8578_v13  ;;  %v8586_v6 = vpop.permute.xlu0 %418  ;;  %7302 = vmatmul.mubr.f32.gmra.mxu0 %v814_v33  ;;  %v8594_v54 = vand.u32 4294901760, %v598_v58  ;;  %v493_v17 = vmax.f32 %v8238_v35, %v8578_v13  ;;  %v843_v33 = vsub.f32 %v8573_v61, %v12506_v24  ;;  %v834_v29 = vand.u32 4294901760, %v833_v0 }
  0xb3   : > { %12861 = vst [vmem:[#allocation37_spill] sm:$0xff] %v8586_v6  ;;  %7304 = vmatprep.mubr.f32.mxu0 %v824_v2  ;;  %12863 = vst [vmem:[#allocation39_spill] sm:$0xff] %v8602_v46  ;;  %v492_v51 = vmax.f32 %v8241_v36, %v8586_v6  ;;  %v12512_v36 = vand.u32 4294901760, %v8599_v34  ;;  %v8632_v6 = vsub.f32 %v8522_v63, %v8534_v30 }
  0xb4   : > { %7366 = vmatmul.mubr.f32.gmra.mxu1 %v8567_v48  ;;  %12862 = vst [vmem:[#allocation38_spill] sm:$0xff] %v8594_v54  ;;  %v8621_v14 = vsel %vm536_vm0, %v493_v17, 0  ;;  %v844_v35 = vand.u32 4294901760, %v843_v33  ;;  %v12517_v17 = vand.u32 4294901760, %v8610_v31 }
  0xb5   : > { %v8617_v2 = vpop.permute.xlu1 %424  ;;  %7368 = vmatprep.mubr.f32.mxu1 %v8594_v54  ;;  %v604_v52 = vsel %vm536_vm0, %v492_v51, 0  ;;  %v8635_v0 = vand.u32 4294901760, %v8621_v14  ;;  %v8641_v51 = vsub.f32 %v592_v55, %v8559_v20  ;;  %v12521_v30 = vand.u32 4294901760, %v8632_v6 }
  0xb6   : > { %12864 = vst [vmem:[#allocation40_spill] sm:$0xff] %v8617_v2  ;;  %v8623_v28 = vpop.permute.xlu0 %422  ;;  %7305 = vmatmul.mubr.f32.gmra.mxu0 %v834_v29  ;;  %v8627_v24 = vand.u32 4294901760, %v604_v52  ;;  %v495_v33 = vmax.f32 %v8248_v37, %v8617_v2  ;;  %v853_v29 = vsub.f32 %v8599_v34, %v12512_v36  ;;  %v863_v63 = vsub.f32 %v8610_v31, %v12517_v17 }
  0xb7   : > { %12865 = vst [vmem:[#allocation41_spill] sm:$0xff] %v8623_v28  ;;  %7307 = vmatprep.mubr.f32.mxu0 %v844_v35  ;;  %v494_v35 = vmax.f32 %v8251_v38, %v8623_v28  ;;  %v12523_v17 = vand.u32 4294901760, %v8641_v51  ;;  %v8665_v38 = vsub.f32 %v8555_v25, %v8567_v48 }
  0xb8   : > { %7369 = vmatmul.mubr.f32.gmra.mxu1 %v8602_v46  ;;  %12866 = vst [vmem:[#allocation42_spill] sm:$0xff] %v8627_v24  ;;  %v854_v37 = vand.u32 4294901760, %v853_v29  ;;  %v613_v55 = vsel %vm536_vm0, %v495_v33, 0  ;;  %v864_v20 = vand.u32 4294901760, %v863_v63  ;;  %v873_v33 = vsub.f32 %v8632_v6, %v12521_v30 }
  0xb9   : > { %7371 = vmatprep.mubr.f32.mxu1 %v8627_v24  ;;  %v8652_v13 = vpop.permute.xlu1 %428  ;;  %v610_v36 = vsel %vm536_vm0, %v494_v35, 0  ;;  %v8667_v29 = vand.u32 4294901760, %v613_v55  ;;  %v8675_v35 = vsub.f32 %v598_v58, %v8594_v54 }
  0xba   : > { %12867 = vst [vmem:[#allocation43_spill] sm:$0xff] %v8652_v13  ;;  %v8656_v2 = vpop.permute.xlu0 %426  ;;  %7308 = vmatmul.mubr.f32.gmra.mxu0 %v854_v37  ;;  %v8660_v22 = vand.u32 4294901760, %v610_v36  ;;  %v497_v63 = vmax.f32 %v8258_v39, %v8652_v13  ;;  %v883_v37 = vsub.f32 %v8641_v51, %v12523_v17  ;;  %v12528_v17 = vand.u32 4294901760, %v8665_v38 }
  0xbb   : > { %12868 = vst [vmem:[#allocation44_spill] sm:$0xff] %v8656_v2  ;;  %7310 = vmatprep.mubr.f32.mxu0 %v864_v20  ;;  %v496_v25 = vmax.f32 %v8261_v40, %v8656_v2  ;;  %v874_v20 = vand.u32 4294901760, %v873_v33  ;;  %v8695_v40 = vsub.f32 %v8590_v49, %v8602_v46 }
  0xbc   : > { %7372 = vmatmul.mubr.f32.gmra.mxu1 %v8635_v0  ;;  %v619_v28 = vsel %vm536_vm0, %v497_v63, 0  ;;  %v884_v39 = vand.u32 4294901760, %v883_v37  ;;  %v12533_v63 = vand.u32 4294901760, %v8675_v35 }
  0xbd   : > { %7374 = vmatprep.mubr.f32.mxu1 %v8660_v22  ;;  %v8684_v48 = vpop.permute.xlu1 %432  ;;  %v616_v58 = vsel %vm536_vm0, %v496_v25, 0  ;;  %v8697_v33 = vand.u32 4294901760, %v619_v28  ;;  %v8703_v25 = vsub.f32 %v604_v52, %v8627_v24 }
  0xbe   : > { %12869 = vst [vmem:[#allocation45_spill] sm:$0xff] %v8684_v48  ;;  %v8688_v30 = vpop.permute.xlu0 %430  ;;  %7311 = vmatmul.mubr.f32.gmra.mxu0 %v874_v20  ;;  %v8690_v13 = vand.u32 4294901760, %v616_v58  ;;  %v499_v37 = vmax.f32 %v8268_v41, %v8684_v48  ;;  %v893_v20 = vsub.f32 %v8665_v38, %v12528_v17  ;;  %v903_v49 = vsub.f32 %v8675_v35, %v12533_v63 }
  0xbf   : > { %12870 = vst [vmem:[#allocation46_spill] sm:$0xff] %v8688_v30  ;;  %7313 = vmatprep.mubr.f32.mxu0 %v884_v39  ;;  %12872 = vst [vmem:[#allocation48_spill] sm:$0xff] %v8697_v33  ;;  %v498_v39 = vmax.f32 %v8271_v42, %v8688_v30  ;;  %v12534_v17 = vand.u32 4294901760, %v8695_v40  ;;  %v12537_v63 = vand.u32 4294901760, %v8703_v25  ;;  %v8727_v42 = vsub.f32 %v8621_v14, %v8635_v0 }
  0xc0   : > { %7375 = vmatmul.mubr.f32.gmra.mxu1 %v8667_v29  ;;  %12871 = vst [vmem:[#allocation47_spill] sm:$0xff] %v8690_v13  ;;  %v894_v2 = vand.u32 4294901760, %v893_v20  ;;  %v625_v41 = vsel %vm536_vm0, %v499_v37, 0  ;;  %v904_v48 = vand.u32 4294901760, %v903_v49 }
  0xc1   : > { %7377 = vmatprep.mubr.f32.mxu1 %v8690_v13  ;;  %v8716_v52 = vpop.permute.xlu1 %436  ;;  %v622_v24 = vsel %vm536_vm0, %v498_v39, 0  ;;  %v8729_v37 = vand.u32 4294901760, %v625_v41  ;;  %v913_v20 = vsub.f32 %v8695_v40, %v12534_v17  ;;  %v8740_v39 = vsub.f32 %v610_v36, %v8660_v22 }
  0xc2   : > { %12873 = vst [vmem:[#allocation49_spill] sm:$0xff] %v8716_v52  ;;  %v8720_v46 = vpop.permute.xlu0 %434  ;;  %7314 = vmatmul.mubr.f32.gmra.mxu0 %v894_v2  ;;  %v8722_v54 = vand.u32 4294901760, %v622_v24  ;;  %v501_v49 = vmax.f32 %v8278_v43, %v8716_v52  ;;  %v8737_v2 = vsub.f32 %v613_v55, %v8667_v29  ;;  %v923_v14 = vsub.f32 %v8703_v25, %v12537_v63 }
  0xc3   : > { %12874 = vst [vmem:[#allocation50_spill] sm:$0xff] %v8720_v46  ;;  %7316 = vmatprep.mubr.f32.mxu0 %v904_v48  ;;  %12876 = vst [vmem:[#allocation52_spill] sm:$0xff] %v8729_v37  ;;  %v500_v48 = vmax.f32 %v8281_v44, %v8720_v46  ;;  %v8749_v17 = vsub.f32 %v616_v58, %v8690_v13  ;;  %v914_v30 = vand.u32 4294901760, %v913_v20  ;;  %v12539_v58 = vand.u32 4294901760, %v8727_v42 }
  0xc4   : > { %7378 = vmatmul.mubr.f32.gmra.mxu1 %v8697_v33  ;;  %12875 = vst [vmem:[#allocation51_spill] sm:$0xff] %v8722_v54  ;;  %v631_v43 = vsel %vm536_vm0, %v501_v49, 0  ;;  %v924_v55 = vand.u32 4294901760, %v923_v14  ;;  %v8755_v52 = vsub.f32 %v619_v28, %v8697_v33  ;;  %v8758_v63 = vsub.f32 %v622_v24, %v8722_v54 }
  0xc5   : > { %7380 = vmatprep.mubr.f32.mxu1 %v8722_v54  ;;  %v628_v36 = vsel %vm536_vm0, %v500_v48, 0  ;;  %v8763_v20 = vand.u32 4294901760, %v631_v43  ;;  %v12544_v49 = vand.u32 4294901760, %v8740_v39  ;;  %v12547_v14 = vand.u32 4294901760, %v8737_v2 }
  0xc6   : > { %7317 = vmatmul.mubr.f32.gmra.mxu0 %v914_v30  ;;  %v8760_v44 = vand.u32 4294901760, %v628_v36  ;;  %v933_v28 = vsub.f32 %v8727_v42, %v12539_v58  ;;  %v12548_v48 = vand.u32 4294901760, %v8749_v17  ;;  %v8773_v30 = vsub.f32 %v625_v41, %v8729_v37 }
  0xc7   : > { %7319 = vmatprep.mubr.f32.mxu0 %v924_v55  ;;  %v943_v55 = vsub.f32 %v8740_v39, %v12544_v49  ;;  %v953_v46 = vsub.f32 %v8737_v2, %v12547_v14  ;;  %v2586_v49 = vld [vmem:[%s12451_s2 + $0x8] sm:$0xff] }
  0xc8   : > { %7381 = vmatmul.mubr.f32.gmra.mxu1 %v8729_v37  ;;  %12877 = vst [vmem:[#allocation53_spill] sm:$0xff] %v8760_v44  ;;  %v8776_v24 = vsub.f32 %v628_v36, %v8760_v44  ;;  %v934_v58 = vand.u32 4294901760, %v933_v28  ;;  %v963_v54 = vsub.f32 %v8749_v17, %v12548_v48  ;;  %v12555_v36 = vand.u32 4294901760, %v8758_v63 }
  0xc9   : > { %7383 = vmatprep.mubr.f32.mxu1 %v8760_v44  ;;  %v12878_v44 = vand.u32 4294901760, %v8333_v10  ;;  %v944_v37 = vand.u32 4294901760, %v943_v55  ;;  %v12879_v48 = vand.u32 4294901760, %v8348_v15  ;;  %v8801_v33 = vand.u32 4294901760, %v2586_v49 }
  0xca   : > { %7320 = vmatmul.mubr.f32.gmra.mxu0 %v934_v58  ;;  %v964_v14 = vand.u32 4294901760, %v963_v54  ;;  %v983_v28 = vsub.f32 %v8758_v63, %v12555_v36  ;;  %v12553_v41 = vand.u32 4294901760, %v8776_v24  ;;  %v954_v13 = vand.u32 4294901760, %v953_v46 }
  0xcb   : > { %7322 = vmatprep.mubr.f32.mxu0 %v944_v37  ;;  %v12880_v55 = vand.u32 4294901760, %v8755_v52  ;;  %v12554_v54 = vand.u32 4294901760, %v8773_v30  ;;  %v12881_v58 = vand.u32 4294901760, %v8366_v53  ;;  %v12885_v36 = vand.u32 4294901760, %v8438_v23 }
  0xcc   : > { %7384 = vmatmul.mubr.f32.gmra.mxu1 %v8763_v20  ;;  %v984_v46 = vand.u32 4294901760, %v983_v28 }
  0xcd   : > { %7442 = vmatprep.mubr.f32.mxu1 %v12878_v44  ;;  %v8804_v44 = vsub.f32 %v631_v43, %v8763_v20  ;;  %v973_v37 = vsub.f32 %v8755_v52, %v12880_v55  ;;  %v1003_v43 = vsub.f32 %v8776_v24, %v12553_v41  ;;  %v12882_v55 = vand.u32 4294901760, %v8392_v19 }
  0xce   : > { %7323 = vmatmul.mubr.f32.gmra.mxu0 %v954_v13 }
  0xcf   : > { %7325 = vmatprep.mubr.f32.mxu0 %v964_v14  ;;  %v1012_v13 = vand.u32 4294901760, %v8804_v44  ;;  %v1004_v28 = vand.u32 4294901760, %v1003_v43 }
  0xd0   : > { %7443 = vmatmul.mubr.f32.vlgmr.msra.gmra.mxu1 %v12879_v48  ;;  %v8815_v48 = vsub.f32 %v2586_v49, %v8801_v33  ;;  %v993_v49 = vsub.f32 %v8773_v30, %v12554_v54 }
  0xd1   : > { %7445 = vmatprep.mubr.f32.mxu1 %v12881_v58  ;;  %7543 = vmatpush3.msra.mxu1 %v8091_v3  ;;  %v974_v3 = vand.u32 4294901760, %v973_v37  ;;  %v1013_v54 = vsub.f32 %v8804_v44, %v1012_v13 }
  0xd2   : > { %7544 = vmatprep.subr.mxu1 %v8093_v4  ;;  %v8824_v58 = vand.u32 4294901760, %v8815_v48  ;;  %v994_v37 = vand.u32 4294901760, %v993_v49  ;;  %v12888_v49 = vand.u32 4294901760, %v8496_v26 }
  0xd3   : > { %7545 = vmatpush3.msra.mxu1 %v8093_v4  ;;  %v12883_v4 = vand.u32 4294901760, %v8400_v56  ;;  %7326 = vmatmul.mubr.f32.gmra.mxu0 %v974_v3  ;;  %v1014_v43 = vand.u32 4294901760, %v1013_v54  ;;  %v12887_v3 = vand.u32 4294901760, %v8478_v5  ;;  %v12891_v54 = vand.u32 4294901760, %v8544_v27 }
  0xd4   : > { %7446 = vmatmul.mubr.f32.gmra.mxu1 %v12882_v55  ;;  %v3102_v14 = vsub.f32 %v8815_v48, %v8824_v58  ;;  %7328 = vmatprep.mubr.f32.mxu0 %v984_v46  ;;  %v12884_v55 = vand.u32 4294901760, %v8424_v21  ;;  %v12886_v46 = vand.u32 4294901760, %v8465_v9 }
  0xd5   : > { %7448 = vmatprep.mubr.f32.mxu1 %v12883_v4  ;;  %v12889_v4 = vand.u32 4294901760, %v8507_v45 }
  0xd6   : > { %v8836_v41 = vand.u32 4294901760, %v3102_v14  ;;  %v12906_v14 = vand.u32 4294901760, %v8755_v52 }
  0xd7   : > { %7329 = vmatmul.mubr.f32.gmra.mxu0 %v994_v37 }
  0xd8   : > { %7449 = vmatmul.mubr.f32.gmra.mxu1 %v12884_v55  ;;  %7646 = vmatprep.subr.mxu1 %v8836_v41 }
  0xd9   : > { %7451 = vmatprep.mubr.f32.mxu1 %v12885_v36  ;;  %7331 = vmatprep.mubr.f32.mxu0 %v1004_v28  ;;  %v12890_v36 = vand.u32 4294901760, %v8531_v11  ;;  %v12908_v28 = vand.u32 4294901760, %v8773_v30 }
  0xdb   : > { %7332 = vmatmul.mubr.f32.gmra.mxu0 %v1014_v43  ;;  %v12928_v43 = vld [vmem:[#allocation4_spill] sm:$0xff] }
  0xdc   : > { %7452 = vmatmul.mubr.f32.gmra.mxu1 %v12886_v46  ;;  %7390 = vmatprep.mubr.f32.mxu0 %v8333_v10  ;;  %v12892_v10 = vand.u32 4294901760, %v8564_v32  ;;  %v7982_v46 = vld [vmem:[%s8111_s16 + $0x10] sm:$0xff] }
  0xdd   : > { %7454 = vmatprep.mubr.f32.mxu1 %v12887_v3  ;;  %v504_v3 = vadd.f32 %v7982_v46, %v12928_v43 }
  0xdf   : > { %7391 = vmatmul.mubr.f32.vlgmr.msra.gmra.mxu0 %v8348_v15  ;;  %v12893_v15 = vand.u32 4294901760, %v8573_v61 }
  0xe0   : > { %7455 = vmatmul.mubr.f32.gmra.mxu1 %v12888_v49  ;;  %7393 = vmatprep.mubr.f32.mxu0 %v8366_v53  ;;  %v12896_v53 = vand.u32 4294901760, %v8632_v6 }
  0xe1   : > { %7457 = vmatprep.mubr.f32.mxu1 %v12889_v4  ;;  %7491 = vmatpush3.msra.mxu0 %v8114_v7  ;;  %v12894_v7 = vand.u32 4294901760, %v8599_v34  ;;  %v12929_v4 = vld [vmem:[#allocation52_spill] sm:$0xff] }
  0xe2   : > { %7492 = vmatprep.subr.mxu0 %v8117_v8 }
  0xe3   : > { %7394 = vmatmul.mubr.f32.gmra.mxu0 %v8392_v19  ;;  %v12895_v19 = vand.u32 4294901760, %v8610_v31 }
  0xe4   : > { %7458 = vmatmul.mubr.f32.gmra.mxu1 %v12890_v36  ;;  %7396 = vmatprep.mubr.f32.mxu0 %v8400_v56  ;;  %v12899_v56 = vand.u32 4294901760, %v8675_v35  ;;  %v12930_v36 = vld [vmem:[#allocation53_spill] sm:$0xff] }
  0xe5   : > { %7460 = vmatprep.mubr.f32.mxu1 %v12891_v54  ;;  %7493 = vmatpush3.msra.mxu0 %v8117_v8  ;;  %v12897_v8 = vand.u32 4294901760, %v8641_v51 }
  0xe6   : > { %7594 = vmatprep.subr.mxu0 %v8801_v33 }
  0xe7   : > { %7397 = vmatmul.mubr.f32.gmra.mxu0 %v8424_v21  ;;  %v12898_v21 = vand.u32 4294901760, %v8665_v38 }
  0xe8   : > { %7461 = vmatmul.mubr.f32.gmra.mxu1 %v12892_v10  ;;  %7399 = vmatprep.mubr.f32.mxu0 %v8438_v23  ;;  %v12900_v23 = vand.u32 4294901760, %v8695_v40 }
  0xe9   : > { %7463 = vmatprep.mubr.f32.mxu1 %v12893_v15  ;;  %v7983_v15 = vld [vmem:[%s8111_s16 + $0x18] sm:$0xff] }
  0xeb   : > { %7400 = vmatmul.mubr.f32.gmra.mxu0 %v8465_v9  ;;  %v12901_v9 = vand.u32 4294901760, %v8703_v25 }
  0xec   : > { %7464 = vmatmul.mubr.f32.gmra.mxu1 %v12894_v7  ;;  %7402 = vmatprep.mubr.f32.mxu0 %v8478_v5  ;;  %v12902_v5 = vand.u32 4294901760, %v8727_v42  ;;  %v12932_v7 = vld [vmem:[#allocation6_spill] sm:$0xff] }
  0xed   : > { %7466 = vmatprep.mubr.f32.mxu1 %v12895_v19  ;;  %v505_v19 = vadd.f32 %v7983_v15, %v12932_v7 }
  0xef   : > { %7403 = vmatmul.mubr.f32.gmra.mxu0 %v8496_v26  ;;  %v2585_v26 = vld [vmem:[%s12451_s2] sm:$0xff] }
  0xf0   : > { %7467 = vmatmul.mubr.f32.gmra.mxu1 %v12896_v53  ;;  %7405 = vmatprep.mubr.f32.mxu0 %v8507_v45  ;;  %v8902_v45 = vand.u32 4294901760, %v2585_v26 }
  0xf1   : > { %7469 = vmatprep.mubr.f32.mxu1 %v12897_v8 }
  0xf3   : > { %7406 = vmatmul.mubr.f32.gmra.mxu0 %v8531_v11  ;;  %v12903_v11 = vand.u32 4294901760, %v8740_v39 }
  0xf4   : > { %7470 = vmatmul.mubr.f32.gmra.mxu1 %v12898_v21  ;;  %7408 = vmatprep.mubr.f32.mxu0 %v8544_v27  ;;  %v12904_v27 = vand.u32 4294901760, %v8737_v2  ;;  %v2594_v21 = vsel %vm536_vm0, %v504_v3, 0 }
  0xf5   : > { %7472 = vmatprep.mubr.f32.mxu1 %v12899_v56  ;;  %v7984_v56 = vld [vmem:[%s8111_s16 + $0x20] sm:$0xff] }
  0xf7   : > { %7409 = vmatmul.mubr.f32.gmra.mxu0 %v8564_v32  ;;  %v12905_v32 = vand.u32 4294901760, %v8749_v17 }
  0xf8   : > { %7473 = vmatmul.mubr.f32.gmra.mxu1 %v12900_v23  ;;  %7411 = vmatprep.mubr.f32.mxu0 %v8573_v61  ;;  %v8911_v61 = vsub.f32 %v2585_v26, %v8902_v45  ;;  %v12933_v23 = vld [vmem:[#allocation9_spill] sm:$0xff] }
  0xf9   : > { %7475 = vmatprep.mubr.f32.mxu1 %v12901_v9  ;;  %v506_v9 = vadd.f32 %v7984_v56, %v12933_v23 }
  0xfb   : > { %7412 = vmatmul.mubr.f32.gmra.mxu0 %v8599_v34  ;;  %v12907_v34 = vand.u32 4294901760, %v8758_v63 }
  0xfc   : > { %7476 = vmatmul.mubr.f32.gmra.mxu1 %v12902_v5  ;;  %7414 = vmatprep.mubr.f32.mxu0 %v8610_v31  ;;  %v8920_v31 = vand.u32 4294901760, %v8911_v61 }
  0xfd   : > { %7478 = vmatprep.mubr.f32.mxu1 %v12903_v11  ;;  %v9034_v11 = vand.u32 4294901760, %v2594_v21 }
  0xff   : > { %7415 = vmatmul.mubr.f32.gmra.mxu0 %v8632_v6  ;;  %v12909_v6 = vand.u32 4294901760, %v8776_v24 }
 0x100   : > { %7479 = vmatmul.mubr.f32.gmra.mxu1 %v12904_v27  ;;  %7417 = vmatprep.mubr.f32.mxu0 %v8641_v51  ;;  %v3109_v51 = vsub.f32 %v8911_v61, %v8920_v31  ;;  %v2597_v27 = vsel %vm536_vm0, %v505_v19, 0  ;;  %v7990_v19 = vld [vmem:[%s8111_s16 + $0x50] sm:$0xff] }
 0x101   : > { %7481 = vmatprep.mubr.f32.mxu1 %v12905_v32  ;;  %v7985_v32 = vld [vmem:[%s8111_s16 + $0x28] sm:$0xff] }
 0x103   : > { %7418 = vmatmul.mubr.f32.gmra.mxu0 %v8665_v38  ;;  %v3110_v38 = vand.u32 4294901760, %v3109_v51  ;;  %v7986_v51 = vld [vmem:[%s8111_s16 + $0x30] sm:$0xff] }
 0x104   : > { %7482 = vmatmul.mubr.f32.gmra.mxu1 %v12906_v14  ;;  %7420 = vmatprep.mubr.f32.mxu0 %v8675_v35  ;;  %v12911_v35 = vld [vmem:[#allocation19_spill] sm:$0xff]  ;;  %v12936_v14 = vld [vmem:[#allocation8_spill] sm:$0xff] }
 0x105   : > { %7484 = vmatprep.mubr.f32.mxu1 %v12907_v34  ;;  %v507_v34 = vadd.f32 %v7985_v32, %v12936_v14 }
 0x107   : > { %7421 = vmatmul.mubr.f32.gmra.mxu0 %v8695_v40  ;;  %v12912_v40 = vld [vmem:[#allocation22_spill] sm:$0xff] }
 0x108   : > { %7485 = vmatmul.mubr.f32.gmra.mxu1 %v12908_v28  ;;  %7423 = vmatprep.mubr.f32.mxu0 %v8703_v25  ;;  %v12919_v25 = vld [vmem:[#allocation35_spill] sm:$0xff]  ;;  %12935 = vst [vmem:[#allocation22_spill] sm:$0xff] %v9034_v11 }
 0x109   : > { %7487 = vmatprep.mubr.f32.mxu1 %v12909_v6  ;;  %v2600_v6 = vsel %vm536_vm0, %v506_v9, 0 }
 0x10b   : > { %7424 = vmatmul.mubr.f32.gmra.mxu0 %v8727_v42  ;;  %v7980_v42 = vld [vmem:[%s8111_s16] sm:$0xff] }
 0x10c   : > { %7488 = vmatmul.mubr.f32.gmra.mxu1 %v1012_v13  ;;  %7426 = vmatprep.mubr.f32.mxu0 %v8740_v39  ;;  %v12927_v13 = vld [vmem:[#allocation7_spill] sm:$0xff] }
 0x10d   : > { %7546 = vmatprep.mubr.f32.mxu1 %v8296_v50 }
 0x10f   : > { %7427 = vmatmul.mubr.f32.gmra.mxu0 %v8737_v2  ;;  %v12924_v2 = vld [vmem:[#allocation5_spill] sm:$0xff] }
 0x110   : > { %7547 = vmatmul.mubr.f32.vlgmr.msra.gmra.mxu1 %v8309_v57  ;;  %7429 = vmatprep.mubr.f32.mxu0 %v8749_v17  ;;  %v12910_v17 = vld [vmem:[#allocation16_spill] sm:$0xff]  ;;  %v502_v39 = vadd.f32 %v7980_v42, %v12924_v2  ;;  %v12942_v42 = vld [vmem:[#allocation13_spill] sm:$0xff] }
 0x111   : > { %7549 = vmatprep.mubr.f32.mxu1 %v8315_v60  ;;  %7647 = vmatpush3.msra.mxu1 %v8836_v41 }
 0x112   : > { %7648 = vmatprep.subr.mxu1 %v3110_v38  ;;  %v2588_v49 = vsel %vm536_vm0, %v502_v39, 0 }
 0x113   : > { %7649 = vmatpush3.msra.mxu1 %v3110_v38  ;;  %7430 = vmatmul.mubr.f32.gmra.mxu0 %v8755_v52  ;;  %v9016_v10 = vand.u32 4294901760, %v2588_v49  ;;  %v12937_v38 = vld [vmem:[#allocation11_spill] sm:$0xff] }
 0x114   : > { %7550 = vmatmul.mubr.f32.gmra.mxu1 %v8326_v1  ;;  %7750 = vmatprep.subr.mxu1 %v8801_v33 }
 0x115   : > { %7552 = vmatprep.mubr.f32.mxu1 %v8337_v12  ;;  %7432 = vmatprep.mubr.f32.mxu0 %v8758_v63  ;;  %v12914_v63 = vld [vmem:[#allocation26_spill] sm:$0xff]  ;;  %12931 = vst [vmem:[#allocation16_spill] sm:$0xff] %v9016_v10 }
 0x117   : > { %7433 = vmatmul.mubr.f32.gmra.mxu0 %v8773_v30  ;;  %v12925_v30 = vld [vmem:[#allocation48_spill] sm:$0xff] }
 0x118   : > { %7553 = vmatmul.mubr.f32.gmra.mxu1 %v8350_v16  ;;  %7435 = vmatprep.mubr.f32.mxu0 %v8776_v24  ;;  %v12926_v24 = vld [vmem:[#allocation51_spill] sm:$0xff] }
 0x119   : > { %7555 = vmatprep.mubr.f32.mxu1 %v8360_v47 }
 0x11b   : > { %7436 = vmatmul.mubr.f32.gmra.mxu0 %v8804_v44  ;;  %v7981_v44 = vld [vmem:[%s8111_s16 + $0x8] sm:$0xff] }
 0x11c   : > { %7556 = vmatmul.mubr.f32.gmra.mxu1 %v8376_v62  ;;  %7494 = vmatprep.mubr.f32.mxu0 %v8296_v50  ;;  %v12913_v50 = vld [vmem:[#allocation24_spill] sm:$0xff]  ;;  %v503_v55 = vadd.f32 %v7981_v44, %v12927_v13  ;;  %v9084_v44 = vsub.f32 %v2594_v21, %v9034_v11 }
 0x11d   : > { %7558 = vmatprep.mubr.f32.mxu1 %v8387_v18 }
 0x11e   : > { %v2591_v53 = vsel %vm536_vm0, %v503_v55, 0  ;;  %v7989_v55 = vld [vmem:[%s8111_s16 + $0x48] sm:$0xff] }
 0x11f   : > { %7495 = vmatmul.mubr.f32.vlgmr.msra.gmra.mxu0 %v8309_v57  ;;  %v12915_v57 = vld [vmem:[#allocation27_spill] sm:$0xff]  ;;  %v9032_v5 = vand.u32 4294901760, %v2591_v53 }
 0x120   : > { %7559 = vmatmul.mubr.f32.gmra.mxu1 %v12910_v17  ;;  %7497 = vmatprep.mubr.f32.mxu0 %v8315_v60  ;;  %v12916_v60 = vld [vmem:[#allocation30_spill] sm:$0xff] }
 0x121   : > { %7561 = vmatprep.mubr.f32.mxu1 %v12911_v35  ;;  %7595 = vmatpush3.msra.mxu0 %v8801_v33  ;;  %12934 = vst [vmem:[#allocation19_spill] sm:$0xff] %v9032_v5 }
 0x122   : > { %7596 = vmatprep.subr.mxu0 %v8902_v45 }
 0x123   : > { %7498 = vmatmul.mubr.f32.gmra.mxu0 %v8326_v1  ;;  %v12917_v1 = vld [vmem:[#allocation31_spill] sm:$0xff] }
 0x124   : > { %7562 = vmatmul.mubr.f32.gmra.mxu1 %v8427_v59  ;;  %7500 = vmatprep.mubr.f32.mxu0 %v8337_v12  ;;  %v12918_v12 = vld [vmem:[#allocation34_spill] sm:$0xff] }
 0x125   : > { %7564 = vmatprep.mubr.f32.mxu1 %v12912_v40  ;;  %7597 = vmatpush3.msra.mxu0 %v8902_v45 }
 0x126   : > { %7698 = vmatprep.subr.mxu0 %v8815_v48 }
 0x127   : > { %7501 = vmatmul.mubr.f32.gmra.mxu0 %v8350_v16  ;;  %v12920_v16 = vld [vmem:[#allocation38_spill] sm:$0xff] }
 0x128   : > { %7565 = vmatmul.mubr.f32.gmra.mxu1 %v12913_v50  ;;  %7503 = vmatprep.mubr.f32.mxu0 %v8360_v47  ;;  %v12921_v47 = vld [vmem:[#allocation39_spill] sm:$0xff] }
 0x129   : > { %7567 = vmatprep.mubr.f32.mxu1 %v12914_v63 }
 0x12b   : > { %7504 = vmatmul.mubr.f32.gmra.mxu0 %v8376_v62 }
 0x12c   : > { %7568 = vmatmul.mubr.f32.gmra.mxu1 %v12915_v57  ;;  %7506 = vmatprep.mubr.f32.mxu0 %v8387_v18  ;;  %v12922_v18 = vld [vmem:[#allocation42_spill] sm:$0xff] }
 0x12d   : > { %7570 = vmatprep.mubr.f32.mxu1 %v12916_v60 }
 0x12f   : > { %7507 = vmatmul.mubr.f32.gmra.mxu0 %v12910_v17  ;;  %v508_v17 = vadd.f32 %v7986_v51, %v12937_v38  ;;  %v12950_v38 = vld [vmem:[#allocation14_spill] sm:$0xff] }
 0x130   : > { %7571 = vmatmul.mubr.f32.gmra.mxu1 %v12917_v1  ;;  %7509 = vmatprep.mubr.f32.mxu0 %v12911_v35 }
 0x131   : > { %7573 = vmatprep.mubr.f32.mxu1 %v12918_v12 }
 0x133   : > { %7510 = vmatmul.mubr.f32.gmra.mxu0 %v8427_v59  ;;  %v12923_v59 = vld [vmem:[#allocation47_spill] sm:$0xff] }
 0x134   : > { %7574 = vmatmul.mubr.f32.gmra.mxu1 %v12919_v25  ;;  %7512 = vmatprep.mubr.f32.mxu0 %v12912_v40  ;;  %v9054_v40 = vand.u32 4294901760, %v2597_v27 }
 0x135   : > { %7576 = vmatprep.mubr.f32.mxu1 %v12920_v16 }
 0x136   : > { %12938 = vst [vmem:[#allocation24_spill] sm:$0xff] %v9054_v40  ;;  %v9104_v23 = vsub.f32 %v2597_v27, %v9054_v40  ;;  %v12557_v27 = vand.u32 4294901760, %v9084_v44 }
 0x137   : > { %7513 = vmatmul.mubr.f32.gmra.mxu0 %v12913_v50  ;;  %v9057_v50 = vsub.f32 %v2591_v53, %v9032_v5  ;;  %v12947_v53 = vld [vmem:[#allocation15_spill] sm:$0xff] }
 0x138   : > { %7577 = vmatmul.mubr.f32.gmra.mxu1 %v12921_v47  ;;  %7515 = vmatprep.mubr.f32.mxu0 %v12914_v63  ;;  %v512_v21 = vadd.f32 %v7990_v19, %v12947_v53 }
 0x139   : > { %7579 = vmatprep.mubr.f32.mxu1 %v12922_v18  ;;  %v12558_v3 = vand.u32 4294901760, %v9057_v50 }
 0x13b   : > { %7516 = vmatmul.mubr.f32.gmra.mxu0 %v12915_v57  ;;  %v9061_v57 = vand.u32 4294901760, %v2600_v6 }
 0x13c   : > { %7580 = vmatmul.mubr.f32.gmra.mxu1 %v8635_v0  ;;  %7518 = vmatprep.mubr.f32.mxu0 %v12916_v60  ;;  %v7987_v60 = vld [vmem:[%s8111_s16 + $0x38] sm:$0xff] }
 0x13d   : > { %7582 = vmatprep.mubr.f32.mxu1 %v8660_v22  ;;  %12939 = vst [vmem:[#allocation26_spill] sm:$0xff] %v9061_v57  ;;  %v9107_v9 = vsub.f32 %v2600_v6, %v9061_v57  ;;  %v2763_v6 = vsub.f32 %v9057_v50, %v12558_v3 }
 0x13f   : > { %7519 = vmatmul.mubr.f32.gmra.mxu0 %v12917_v1  ;;  %v12940_v1 = vld [vmem:[#allocation10_spill] sm:$0xff] }
 0x140   : > { %7583 = vmatmul.mubr.f32.gmra.mxu1 %v8667_v29  ;;  %7521 = vmatprep.mubr.f32.mxu0 %v12918_v12  ;;  %v509_v12 = vadd.f32 %v7987_v60, %v12940_v1 }
 0x141   : > { %7585 = vmatprep.mubr.f32.mxu1 %v12923_v59 }
 0x143   : > { %7522 = vmatmul.mubr.f32.gmra.mxu0 %v12919_v25 }
 0x144   : > { %7586 = vmatmul.mubr.f32.gmra.mxu1 %v12925_v30  ;;  %7524 = vmatprep.mubr.f32.mxu0 %v12920_v16 }
 0x145   : > { %7588 = vmatprep.mubr.f32.mxu1 %v12926_v24 }
 0x147   : > { %7525 = vmatmul.mubr.f32.gmra.mxu0 %v12921_v47  ;;  %v2606_v47 = vsel %vm536_vm0, %v508_v17, 0 }
 0x148   : > { %7589 = vmatmul.mubr.f32.gmra.mxu1 %v12929_v4  ;;  %7527 = vmatprep.mubr.f32.mxu0 %v12922_v18  ;;  %v7988_v18 = vld [vmem:[%s8111_s16 + $0x40] sm:$0xff] }
 0x149   : > { %7591 = vmatprep.mubr.f32.mxu1 %v12930_v36  ;;  %v510_v2 = vadd.f32 %v7988_v18, %v12942_v42  ;;  %v7992_v18 = vld [vmem:[%s8111_s16 + $0x60] sm:$0xff]  ;;  %v12951_v42 = vld [vmem:[#allocation18_spill] sm:$0xff] }
 0x14b   : > { %7528 = vmatmul.mubr.f32.gmra.mxu0 %v8635_v0  ;;  %v9052_v0 = vsub.f32 %v2588_v49, %v9016_v10  ;;  %v2609_v49 = vsel %vm536_vm0, %v509_v12, 0  ;;  %v2612_v7 = vsel %vm536_vm0, %v510_v2, 0  ;;  %v2618_v12 = vsel %vm536_vm0, %v512_v21, 0 }
 0x14c   : > { %7592 = vmatmul.mubr.f32.gmra.mxu1 %v8763_v20  ;;  %7530 = vmatprep.mubr.f32.mxu0 %v8660_v22  ;;  %v2603_v22 = vsel %vm536_vm0, %v507_v34, 0  ;;  %v9113_v32 = vand.u32 4294901760, %v2609_v49  ;;  %v9123_v51 = vand.u32 4294901760, %v2612_v7  ;;  %v514_v2 = vadd.f32 %v7992_v18, %v12951_v42 }
 0x14d   : > { %7650 = vmatprep.mubr.f32.mxu1 %v9016_v10  ;;  %v9086_v13 = vand.u32 4294901760, %v2603_v22  ;;  %v12560_v43 = vand.u32 4294901760, %v9052_v0  ;;  %v12991_v10 = vld [vmem:[#allocation41_spill] sm:$0xff] }
 0x14e   : > { %12948 = vst [vmem:[#allocation35_spill] sm:$0xff] %v9113_v32  ;;  %12949 = vst [vmem:[#allocation38_spill] sm:$0xff] %v9123_v51  ;;  %v9167_v18 = vsub.f32 %v2612_v7, %v9123_v51  ;;  %v9170_v42 = vsel %vm536_vm0, %v514_v2, 0 }
 0x14f   : > { %7531 = vmatmul.mubr.f32.gmra.mxu0 %v8667_v29  ;;  %12944 = vst [vmem:[#allocation31_spill] sm:$0xff] %v9086_v13  ;;  %v9134_v1 = vsub.f32 %v2603_v22, %v9086_v13  ;;  %v12556_v22 = vand.u32 4294901760, %v9104_v23 }
 0x150   : > { %v7340_v62 = vpop.f32.mrf.mxu1  ;;  %7651 = vmatmul.mubr.f32.vlgmr.msra.gmra.mxu1 %v9032_v5  ;;  %7533 = vmatprep.mubr.f32.mxu0 %v12923_v59  ;;  %v12945_v59 = vld [vmem:[#allocation12_spill] sm:$0xff] }
 0x151   : > { %7653 = vmatprep.mubr.f32.mxu1 %v9034_v11  ;;  %7751 = vmatpush3.msra.mxu1 %v8801_v33  ;;  %v511_v46 = vadd.f32 %v7989_v55, %v12945_v59  ;;  %v12953_v55 = vld [vmem:[#allocation17_spill] sm:$0xff]  ;;  %v2783_v2 = vsub.f32 %v9104_v23, %v12556_v22  ;;  %v9203_v22 = vand.u32 4294901760, %v9170_v42 }
 0x152   : > { %v8994_v52 = vpop.f32.mrf.mxu1  ;;  %7752 = vmatprep.subr.mxu1 %v8902_v45  ;;  %v12983_v11 = vld [vmem:[#allocation37_spill] sm:$0xff] }
 0x153   : > { %7753 = vmatpush3.msra.mxu1 %v8902_v45  ;;  %7534 = vmatmul.mubr.f32.gmra.mxu0 %v12925_v30  ;;  %v2615_v14 = vsel %vm536_vm0, %v511_v46, 0  ;;  %12958 = vst [vmem:[#allocation5_spill] sm:$0xff] %v9203_v22 }
 0x154   : > { %v9001_v41 = vpop.f32.mrf.mxu1  ;;  %7654 = vmatmul.mubr.f32.gmra.mxu1 %v9054_v40  ;;  %7854 = vmatprep.subr.mxu1 %v8801_v33 }
 0x155   : > { %7656 = vmatprep.mubr.f32.mxu1 %v9061_v57  ;;  %7536 = vmatprep.mubr.f32.mxu0 %v12926_v24  ;;  %v2753_v24 = vsub.f32 %v9052_v0, %v12560_v43  ;;  %v12960_v43 = vld [vmem:[#allocation25_spill] sm:$0xff] }
 0x156   : > { %v9006_v37 = vpop.f32.mrf.mxu1 }
 0x157   : > { %7537 = vmatmul.mubr.f32.gmra.mxu0 %v12929_v4  ;;  %v9144_v4 = vand.u32 4294901760, %v2615_v14  ;;  %v2754_v53 = vand.u32 4294901760, %v2753_v24 }
 0x158   : > { %v9014_v54 = vpop.f32.mrf.mxu1  ;;  %7657 = vmatmul.mubr.f32.gmra.mxu1 %v9086_v13  ;;  %7539 = vmatprep.mubr.f32.mxu0 %v12930_v36  ;;  %v2773_v36 = vsub.f32 %v9084_v44, %v12557_v27  ;;  %v12976_v13 = vld [vmem:[#allocation33_spill] sm:$0xff] }
 0x159   : > { %12952 = vst [vmem:[#allocation39_spill] sm:$0xff] %v9144_v4 }
 0x15a   : > { %v9022_v8 = vpop.f32.mrf.mxu1 }
 0x15b   : > { %7540 = vmatmul.mubr.f32.gmra.mxu0 %v8763_v20 }
 0x15c   : > { %v9030_v26 = vpop.f32.mrf.mxu1  ;;  %v7288_v63 = vpop.f32.mrf.mxu0  ;;  %7598 = vmatprep.mubr.f32.mxu0 %v2754_v53 }
 0x15d   : > { %v9066_v25 = vadd.f32 %v7340_v62, %v7288_v63 }
 0x15e   : > { %v9040_v28 = vpop.f32.mrf.mxu1  ;;  %v706_v39 = vpop.f32.mrf.mxu0 }
 0x15f   : > { %12941 = vst [vmem:[#allocation27_spill] sm:$0xff] %v9066_v25  ;;  %v9078_v29 = vadd.f32 %v8994_v52, %v706_v39  ;;  %v9093_v52 = vand.u32 4294901760, %v2606_v47 }
 0x160   : > { %v9048_v35 = vpop.f32.mrf.mxu1 }
 0x161   : > { %12943 = vst [vmem:[#allocation30_spill] sm:$0xff] %v9078_v29  ;;  %12946 = vst [vmem:[#allocation34_spill] sm:$0xff] %v9093_v52  ;;  %7659 = vmatprep.mubr.f32.mxu1 %v9093_v52  ;;  %v9142_v39 = vsub.f32 %v2606_v47, %v9093_v52  ;;  %v12559_v47 = vand.u32 4294901760, %v9107_v9  ;;  %v12968_v29 = vld [vmem:[#allocation29_spill] sm:$0xff] }
 0x162   : > { %v9068_v16 = vpop.f32.mrf.mxu1  ;;  %v7291_v56 = vpop.f32.mrf.mxu0  ;;  %7660 = vmatmul.mubr.f32.gmra.mxu1 %v9113_v32 }
 0x163   : > { %v9111_v30 = vadd.f32 %v9001_v41, %v7291_v56  ;;  %v7991_v41 = vld [vmem:[%s8111_s16 + $0x58] sm:$0xff]  ;;  %7662 = vmatprep.mubr.f32.mxu1 %v9123_v51  ;;  %v2764_v56 = vand.u32 4294901760, %v2763_v6 }
 0x164   : > { %v9080_v62 = vpop.f32.mrf.mxu1  ;;  %v726_v34 = vpop.f32.mrf.mxu0  ;;  %v513_v17 = vadd.f32 %v7991_v41, %v12950_v38  ;;  %v9163_v38 = vand.u32 4294901760, %v2618_v12 }
 0x165   : > { %v9129_v63 = vadd.f32 %v9006_v37, %v726_v34  ;;  %v7993_v37 = vld [vmem:[%s8111_s16 + $0x68] sm:$0xff]  ;;  %v9160_v34 = vsub.f32 %v2609_v49, %v9113_v32  ;;  %7599 = vmatmul.mubr.f32.vlgmr.msra.gmra.mxu0 %v2764_v56  ;;  %v12962_v56 = vand.u32 4294901760, %v9134_v1 }
 0x166   : > { %v9096_v15 = vpop.f32.mrf.mxu1  ;;  %v515_v59 = vadd.f32 %v7993_v37, %v12953_v55  ;;  %v7294_v46 = vpop.f32.mrf.mxu0  ;;  %v2621_v41 = vsel %vm536_vm0, %v513_v17, 0  ;;  %12954 = vst [vmem:[#allocation42_spill] sm:$0xff] %v9163_v38  ;;  %v12955_v37 = vld [vmem:[#allocation21_spill] sm:$0xff]  ;;  %7663 = vmatmul.mubr.f32.gmra.mxu1 %v9144_v4  ;;  %v7995_v17 = vld [vmem:[%s8111_s16 + $0x78] sm:$0xff]  ;;  %7699 = vmatpush3.msra.mxu0 %v8815_v48  ;;  %v12975_v32 = vld [vmem:[#allocation32_spill] sm:$0xff] }
 0x167   : > { %v9157_v21 = vadd.f32 %v9014_v54, %v7294_v46  ;;  %v7994_v54 = vld [vmem:[%s8111_s16 + $0x70] sm:$0xff]  ;;  %v12956_v46 = vld [vmem:[#allocation20_spill] sm:$0xff]  ;;  %7665 = vmatprep.mubr.f32.mxu1 %v9163_v38  ;;  %v9188_v53 = vand.u32 4294901760, %v2621_v41  ;;  %7700 = vmatprep.subr.mxu0 %v8911_v61 }
 0x168   : > { %v9131_v60 = vpop.f32.mrf.mxu1  ;;  %v746_v24 = vpop.f32.mrf.mxu0  ;;  %v516_v55 = vadd.f32 %v7994_v54, %v12955_v37  ;;  %v2627_v20 = vsel %vm536_vm0, %v515_v59, 0  ;;  %v517_v7 = vadd.f32 %v7995_v17, %v12956_v46  ;;  %v9197_v17 = vsub.f32 %v2615_v14, %v9144_v4  ;;  %v7997_v48 = vld [vmem:[%s8111_s16 + $0x88] sm:$0xff]  ;;  %7701 = vmatpush3.msra.mxu0 %v8911_v61  ;;  %v7999_v61 = vld [vmem:[%s8111_s16 + $0x98] sm:$0xff] }
 0x169   : > { %v9176_v49 = vadd.f32 %v9022_v8, %v746_v24  ;;  %12957 = vst [vmem:[#allocation47_spill] sm:$0xff] %v9188_v53  ;;  %v2774_v8 = vand.u32 4294901760, %v2773_v36  ;;  %v2793_v24 = vsub.f32 %v9107_v9, %v12559_v47  ;;  %v9200_v46 = vsub.f32 %v2618_v12, %v9163_v38  ;;  %v7996_v47 = vld [vmem:[%s8111_s16 + $0x80] sm:$0xff]  ;;  %7802 = vmatprep.subr.mxu0 %v8824_v58 }
 0x16a   : > { %v9150_v19 = vpop.f32.mrf.mxu1  ;;  %v7297_v27 = vpop.f32.mrf.mxu0  ;;  %v9205_v36 = vand.u32 4294901760, %v2627_v20  ;;  %v2630_v3 = vsel %vm536_vm0, %v516_v55, 0  ;;  %v518_v59 = vadd.f32 %v7996_v47, %v12960_v43  ;;  %7666 = vmatmul.mubr.f32.gmra.mxu1 %v9188_v53  ;;  %v2633_v14 = vsel %vm536_vm0, %v517_v7, 0 }
 0x16b   : > { %7601 = vmatprep.mubr.f32.mxu0 %v2774_v8  ;;  %v9211_v54 = vadd.f32 %v9030_v26, %v7297_v27  ;;  %v2784_v12 = vand.u32 4294901760, %v2783_v2  ;;  %v2803_v38 = vsub.f32 %v9134_v1, %v12962_v56  ;;  %7668 = vmatprep.mubr.f32.mxu1 %v9203_v22  ;;  %v2794_v26 = vand.u32 4294901760, %v2793_v24  ;;  %v12966_v24 = vld [vmem:[#allocation23_spill] sm:$0xff] }
 0x16c   : > { %v9178_v6 = vpop.f32.mrf.mxu1  ;;  %12959 = vst [vmem:[#allocation48_spill] sm:$0xff] %v9205_v36  ;;  %v766_v55 = vpop.f32.mrf.mxu0  ;;  %v12963_v43 = vand.u32 4294901760, %v9142_v39  ;;  %v9232_v8 = vsub.f32 %v2621_v41, %v9188_v53  ;;  %v9234_v56 = vand.u32 4294901760, %v2630_v3  ;;  %v519_v4 = vadd.f32 %v7997_v48, %v12966_v24 }
 0x16d   : > { %12961 = vst [vmem:[#allocation51_spill] sm:$0xff] %v9211_v54  ;;  %v9226_v7 = vadd.f32 %v9040_v28, %v766_v55  ;;  %7602 = vmatmul.mubr.f32.gmra.mxu0 %v2784_v12  ;;  %v9241_v47 = vand.u32 4294901760, %v2633_v14  ;;  %v2636_v28 = vsel %vm536_vm0, %v518_v59, 0  ;;  %v7998_v55 = vld [vmem:[%s8111_s16 + $0x90] sm:$0xff]  ;;  %v2804_v53 = vand.u32 4294901760, %v2803_v38  ;;  %v12973_v59 = vld [vmem:[#allocation28_spill] sm:$0xff] }
 0x16e   : > { %v9194_v37 = vpop.f32.mrf.mxu1  ;;  %v2813_v27 = vsub.f32 %v9142_v39, %v12963_v43  ;;  %12965 = vst [vmem:[#allocation4_spill] sm:$0xff] %v9234_v56  ;;  %v9239_v43 = vsub.f32 %v2627_v20, %v9205_v36  ;;  %v520_v25 = vadd.f32 %v7998_v55, %v12968_v29  ;;  %7604 = vmatprep.mubr.f32.mxu0 %v2794_v26  ;;  %v7300_v51 = vpop.f32.mrf.mxu0  ;;  %v12969_v12 = vand.u32 4294901760, %v9160_v34 }
 0x16f   : > { %12964 = vst [vmem:[#allocation7_spill] sm:$0xff] %v9226_v7  ;;  %12967 = vst [vmem:[#allocation52_spill] sm:$0xff] %v9241_v47  ;;  %7669 = vmatmul.mubr.f32.gmra.mxu1 %v9205_v36  ;;  %v9253_v48 = vadd.f32 %v9048_v35, %v7300_v51  ;;  %v9260_v29 = vsub.f32 %v9170_v42, %v9203_v22  ;;  %v12971_v38 = vand.u32 4294901760, %v9167_v18  ;;  %v2639_v55 = vsel %vm536_vm0, %v519_v4, 0  ;;  %v8000_v22 = vld [vmem:[%s8111_s16 + $0xa8] sm:$0xff]  ;;  %v8001_v4 = vld [vmem:[%s8111_s16 + $0xa0] sm:$0xff] }
 0x170   : > { %v9228_v2 = vpop.f32.mrf.mxu1  ;;  %v2823_v20 = vsub.f32 %v9160_v34, %v12969_v12  ;;  %7671 = vmatprep.mubr.f32.mxu1 %v9234_v56  ;;  %v2814_v26 = vand.u32 4294901760, %v2813_v27  ;;  %v786_v51 = vpop.f32.mrf.mxu0  ;;  %v9268_v12 = vand.u32 4294901760, %v2636_v28  ;;  %v521_v36 = vadd.f32 %v7999_v61, %v12973_v59  ;;  %v8009_v7 = vld [vmem:[%s8111_s16 + $0xe0] sm:$0xff] }
 0x171   : > { %12970 = vst [vmem:[#allocation53_spill] sm:$0xff] %v9253_v48  ;;  %v2833_v24 = vsub.f32 %v9167_v18, %v12971_v38  ;;  %7605 = vmatmul.mubr.f32.gmra.mxu0 %v2804_v53  ;;  %v9273_v42 = vadd.f32 %v9068_v16, %v786_v51  ;;  %v9278_v38 = vsub.f32 %v2633_v14, %v9241_v47  ;;  %v2642_v35 = vsel %vm536_vm0, %v520_v25, 0  ;;  %v8003_v51 = vld [vmem:[%s8111_s16 + $0xb0] sm:$0xff] }
 0x172   : > { %v9247_v41 = vpop.f32.mrf.mxu1  ;;  %12972 = vst [vmem:[#allocation6_spill] sm:$0xff] %v9268_v12  ;;  %v523_v52 = vadd.f32 %v8000_v22, %v12975_v32  ;;  %v522_v57 = vadd.f32 %v8001_v4, %v12976_v13  ;;  %7607 = vmatprep.mubr.f32.mxu0 %v2814_v26  ;;  %v9287_v53 = vsub.f32 %v2630_v3, %v9234_v56  ;;  %v2824_v16 = vand.u32 4294901760, %v2823_v20  ;;  %v7303_v20 = vpop.f32.mrf.mxu0  ;;  %v12982_v56 = vld [vmem:[#allocation36_spill] sm:$0xff] }
 0x173   : > { %12974 = vst [vmem:[#allocation9_spill] sm:$0xff] %v9273_v42  ;;  %7672 = vmatmul.mubr.f32.gmra.mxu1 %v9241_v47  ;;  %v12977_v59 = vand.u32 4294901760, %v9197_v17  ;;  %v9296_v13 = vand.u32 4294901760, %v2639_v55  ;;  %v2834_v22 = vand.u32 4294901760, %v2833_v24  ;;  %v12979_v26 = vand.u32 4294901760, %v9200_v46  ;;  %v13001_v42 = vld [vmem:[#allocation43_spill] sm:$0xff] }
 0x174   : > { %v9275_v27 = vpop.f32.mrf.mxu1  ;;  %7674 = vmatprep.mubr.f32.mxu1 %v9268_v12  ;;  %v9303_v61 = vsub.f32 %v2636_v28, %v9268_v12  ;;  %v2645_v4 = vsel %vm536_vm0, %v521_v36, 0  ;;  %v9309_v25 = vadd.f32 %v9080_v62, %v7303_v20  ;;  %v9312_v24 = vsel %vm536_vm0, %v523_v52, 0  ;;  %v806_v12 = vpop.f32.mrf.mxu0 }
 0x175   : > { %v2843_v14 = vsub.f32 %v9197_v17, %v12977_v59  ;;  %12978 = vst [vmem:[#allocation8_spill] sm:$0xff] %v9296_v13  ;;  %v2853_v3 = vsub.f32 %v9200_v46, %v12979_v26  ;;  %v9306_v59 = vand.u32 4294901760, %v2642_v35  ;;  %7608 = vmatmul.mubr.f32.gmra.mxu0 %v2824_v16  ;;  %v2648_v47 = vsel %vm536_vm0, %v522_v57, 0  ;;  %v8002_v26 = vld [vmem:[%s8111_s16 + $0xb8] sm:$0xff] }
 0x176   : > { %v9294_v32 = vpop.f32.mrf.mxu1  ;;  %12981 = vst [vmem:[#allocation10_spill] sm:$0xff] %v9309_v25  ;;  %v525_v40 = vadd.f32 %v8002_v26, %v12982_v56  ;;  %v524_v28 = vadd.f32 %v8003_v51, %v12983_v11  ;;  %7610 = vmatprep.mubr.f32.mxu0 %v2834_v22  ;;  %v12984_v16 = vand.u32 4294901760, %v9232_v8  ;;  %v9324_v52 = vadd.f32 %v9096_v15, %v806_v12 }
 0x177   : > { %12980 = vst [vmem:[#allocation11_spill] sm:$0xff] %v9306_v59  ;;  %7675 = vmatmul.mubr.f32.gmra.mxu1 %v9296_v13  ;;  %v2844_v36 = vand.u32 4294901760, %v2843_v14  ;;  %v9330_v11 = vand.u32 4294901760, %v2645_v4  ;;  %v2854_v22 = vand.u32 4294901760, %v2853_v3  ;;  %v12987_v20 = vand.u32 4294901760, %v9260_v29 }
 0x178   : > { %v2863_v62 = vsub.f32 %v9232_v8, %v12984_v16  ;;  %12985 = vst [vmem:[#allocation13_spill] sm:$0xff] %v9324_v52  ;;  %7677 = vmatprep.mubr.f32.mxu1 %v9306_v59  ;;  %v9328_v56 = vpop.f32.mrf.mxu1  ;;  %v9337_v26 = vsub.f32 %v2639_v55, %v9296_v13  ;;  %v9340_v15 = vsub.f32 %v2642_v35, %v9306_v59  ;;  %v9342_v12 = vand.u32 4294901760, %v2648_v47  ;;  %v7306_v16 = vpop.f32.mrf.mxu0 }
 0x179   : > { %12986 = vst [vmem:[#allocation12_spill] sm:$0xff] %v9330_v11  ;;  %v2873_v14 = vsub.f32 %v9260_v29, %v12987_v20  ;;  %7611 = vmatmul.mubr.f32.gmra.mxu0 %v2844_v36  ;;  %v9347_v3 = vand.u32 4294901760, %v9312_v24  ;;  %v2654_v5 = vsel %vm536_vm0, %v524_v28, 0  ;;  %v8004_v20 = vld [vmem:[%s8111_s16 + $0xc0] sm:$0xff]  ;;  %v9353_v55 = vadd.f32 %v9131_v60, %v7306_v16  ;;  %v8005_v28 = vld [vmem:[%s8111_s16 + $0xc8] sm:$0xff] }
 0x17a   : > { %12988 = vst [vmem:[#allocation15_spill] sm:$0xff] %v9340_v15  ;;  %12989 = vst [vmem:[#allocation14_spill] sm:$0xff] %v9342_v12  ;;  %v9344_v57 = vpop.f32.mrf.mxu1  ;;  %v526_v51 = vadd.f32 %v8004_v20, %v12991_v10  ;;  %7613 = vmatprep.mubr.f32.mxu0 %v2854_v22  ;;  %v2657_v35 = vsel %vm536_vm0, %v525_v40, 0  ;;  %v2864_v36 = vand.u32 4294901760, %v2863_v62  ;;  %v12993_v59 = vand.u32 4294901760, %v9239_v43  ;;  %v826_v52 = vpop.f32.mrf.mxu0  ;;  %v13000_v40 = vld [vmem:[#allocation44_spill] sm:$0xff] }
 0x17b   : > { %12990 = vst [vmem:[#allocation18_spill] sm:$0xff] %v9347_v3  ;;  %12992 = vst [vmem:[#allocation17_spill] sm:$0xff] %v9353_v55  ;;  %7678 = vmatmul.mubr.f32.gmra.mxu1 %v9330_v11  ;;  %v2874_v10 = vand.u32 4294901760, %v2873_v14  ;;  %v12994_v22 = vand.u32 4294901760, %v9287_v53  ;;  %v9366_v16 = vadd.f32 %v9150_v19, %v826_v52  ;;  %v9374_v20 = vand.u32 4294901760, %v2654_v5  ;;  %v12997_v55 = vld [vmem:[#allocation40_spill] sm:$0xff] }
 0x17c   : > { %v2883_v13 = vsub.f32 %v9239_v43, %v12993_v59  ;;  %7680 = vmatprep.mubr.f32.mxu1 %v9342_v12  ;;  %v9369_v62 = vpop.f32.mrf.mxu1  ;;  %v9372_v59 = vsub.f32 %v2645_v4, %v9330_v11  ;;  %v527_v14 = vadd.f32 %v8005_v28, %v12997_v55  ;;  %v9379_v25 = vsub.f32 %v2648_v47, %v9342_v12  ;;  %v8006_v52 = vld [vmem:[%s8111_s16 + $0xd0] sm:$0xff]  ;;  %v8007_v11 = vld [vmem:[%s8111_s16 + $0xd8] sm:$0xff] }
 0x17d   : > { %v2893_v60 = vsub.f32 %v9287_v53, %v12994_v22  ;;  %12995 = vst [vmem:[#allocation21_spill] sm:$0xff] %v9366_v16  ;;  %12996 = vst [vmem:[#allocation20_spill] sm:$0xff] %v9374_v20  ;;  %7614 = vmatmul.mubr.f32.gmra.mxu0 %v2864_v36  ;;  %v9381_v22 = vand.u32 4294901760, %v2657_v35  ;;  %v2660_v19 = vsel %vm536_vm0, %v526_v51, 0  ;;  %v528_v16 = vadd.f32 %v8006_v52, %v13000_v40  ;;  %v7309_v36 = vpop.f32.mrf.mxu0 }
 0x17e   : > { %12998 = vst [vmem:[#allocation25_spill] sm:$0xff] %v9379_v25  ;;  %7616 = vmatprep.mubr.f32.mxu0 %v2874_v10  ;;  %v9387_v4 = vpop.f32.mrf.mxu1  ;;  %v529_v48 = vadd.f32 %v8007_v11, %v13001_v42  ;;  %v2884_v55 = vand.u32 4294901760, %v2883_v13  ;;  %v13002_v47 = vand.u32 4294901760, %v9278_v38  ;;  %v9397_v40 = vadd.f32 %v9178_v6, %v7309_v36  ;;  %v8008_v36 = vld [vmem:[%s8111_s16 + $0xe8] sm:$0xff]  ;;  %v13007_v13 = vld [vmem:[#allocation46_spill] sm:$0xff] }
 0x17f   : > { %12999 = vst [vmem:[#allocation23_spill] sm:$0xff] %v9381_v22  ;;  %7681 = vmatmul.mubr.f32.gmra.mxu1 %v9347_v3  ;;  %v2894_v10 = vand.u32 4294901760, %v2893_v60  ;;  %v13004_v52 = vand.u32 4294901760, %v9303_v61  ;;  %v9405_v11 = vsub.f32 %v9312_v24, %v9347_v3  ;;  %v2663_v51 = vsel %vm536_vm0, %v527_v14, 0  ;;  %v846_v6 = vpop.f32.mrf.mxu0 }
 0x180   : > { %v2903_v28 = vsub.f32 %v9278_v38, %v13002_v47  ;;  %7683 = vmatprep.mubr.f32.mxu1 %v9374_v20  ;;  %13003 = vst [vmem:[#allocation29_spill] sm:$0xff] %v9397_v40  ;;  %v9408_v47 = vsub.f32 %v2654_v5, %v9374_v20  ;;  %v9411_v12 = vand.u32 4294901760, %v2660_v19  ;;  %v2666_v60 = vsel %vm536_vm0, %v528_v16, 0  ;;  %v13006_v40 = vld [vmem:[#allocation45_spill] sm:$0xff]  ;;  %v9422_v5 = vpop.f32.mrf.mxu1 }
 0x181   : > { %v2913_v42 = vsub.f32 %v9303_v61, %v13004_v52  ;;  %7617 = vmatmul.mubr.f32.gmra.mxu0 %v2884_v55  ;;  %v531_v52 = vadd.f32 %v8008_v36, %v13006_v40  ;;  %v530_v54 = vadd.f32 %v8009_v7, %v13007_v13  ;;  %v9419_v24 = vadd.f32 %v9194_v37, %v846_v6 }
 0x182   : > { %13005 = vst [vmem:[#allocation28_spill] sm:$0xff] %v9411_v12  ;;  %7619 = vmatprep.mubr.f32.mxu0 %v2894_v10  ;;  %v2669_v14 = vsel %vm536_vm0, %v529_v48, 0  ;;  %v2904_v55 = vand.u32 4294901760, %v2903_v28  ;;  %v13009_v20 = vand.u32 4294901760, %v9337_v26  ;;  %v9430_v7 = vand.u32 4294901760, %v2663_v51  ;;  %v7312_v10 = vpop.f32.mrf.mxu0  ;;  %v9436_v28 = vpop.f32.mrf.mxu1 }
 0x183   : > { %13008 = vst [vmem:[#allocation32_spill] sm:$0xff] %v9419_v24  ;;  %7684 = vmatmul.mubr.f32.gmra.mxu1 %v9381_v22  ;;  %v2914_v37 = vand.u32 4294901760, %v2913_v42  ;;  %v13011_v13 = vand.u32 4294901760, %v9340_v15  ;;  %v9439_v36 = vsub.f32 %v2657_v35, %v9381_v22  ;;  %v9444_v40 = vand.u32 4294901760, %v2666_v60  ;;  %v8010_v24 = vld [vmem:[%s8111_s16 + $0xf0] sm:$0xff] }
 0x184   : > { %v2923_v16 = vsub.f32 %v9337_v26, %v13009_v20  ;;  %7686 = vmatprep.mubr.f32.mxu1 %v9411_v12  ;;  %13010 = vst [vmem:[#allocation33_spill] sm:$0xff] %v9430_v7  ;;  %v9442_v20 = vsub.f32 %v2660_v19, %v9411_v12  ;;  %v9447_v42 = vadd.f32 %v9228_v2, %v7312_v10  ;;  %v9449_v3 = vand.u32 4294901760, %v2669_v14  ;;  %v13015_v35 = vld [vmem:[#allocation50_spill] sm:$0xff]  ;;  %v866_v19 = vpop.f32.mrf.mxu0 }
 0x185   : > { %v2933_v6 = vsub.f32 %v9340_v15, %v13011_v13  ;;  %13012 = vst [vmem:[#allocation36_spill] sm:$0xff] %v9444_v40  ;;  %7620 = vmatmul.mubr.f32.gmra.mxu0 %v2904_v55  ;;  %v9452_v13 = vsel %vm536_vm0, %v531_v52, 0  ;;  %v2672_v48 = vsel %vm536_vm0, %v530_v54, 0  ;;  %v532_v22 = vadd.f32 %v8010_v24, %v13015_v35  ;;  %v9466_v54 = vpop.f32.mrf.mxu1  ;;  %v13018_v24 = vld [vmem:[#allocation49_spill] sm:$0xff] }
 0x186   : > { %13013 = vst [vmem:[#allocation37_spill] sm:$0xff] %v9447_v42  ;;  %13014 = vst [vmem:[#allocation41_spill] sm:$0xff] %v9449_v3  ;;  %7622 = vmatprep.mubr.f32.mxu0 %v2914_v37  ;;  %v2924_v12 = vand.u32 4294901760, %v2923_v16  ;;  %v9459_v55 = vadd.f32 %v9247_v41, %v866_v19  ;;  %v13017_v2 = vand.u32 4294901760, %v9372_v59  ;;  %v8011_v42 = vld [vmem:[%s8111_s16 + $0xf8] sm:$0xff]  ;;  %v13019_v15 = vand.u32 4294901760, %v9379_v25 }
 0x187   : > { %7687 = vmatmul.mubr.f32.gmra.mxu1 %v9430_v7  ;;  %v533_v37 = vadd.f32 %v8011_v42, %v13018_v24  ;;  %v2934_v35 = vand.u32 4294901760, %v2933_v6  ;;  %v9474_v19 = vand.u32 4294901760, %v2672_v48  ;;  %v9479_v52 = vsub.f32 %v2663_v51, %v9430_v7 }
 0x188   : > { %13016 = vst [vmem:[#allocation40_spill] sm:$0xff] %v9459_v55  ;;  %v2943_v10 = vsub.f32 %v9372_v59, %v13017_v2  ;;  %7689 = vmatprep.mubr.f32.mxu1 %v9444_v40  ;;  %v2953_v16 = vsub.f32 %v9379_v25, %v13019_v15  ;;  %v9476_v2 = vpop.f32.mrf.mxu1  ;;  %v9482_v55 = vsub.f32 %v2666_v60, %v9444_v40  ;;  %v9485_v42 = vand.u32 4294901760, %v9452_v13  ;;  %v7315_v15 = vpop.f32.mrf.mxu0 }
 0x189   : > { %13020 = vst [vmem:[#allocation44_spill] sm:$0xff] %v9474_v19  ;;  %7623 = vmatmul.mubr.f32.gmra.mxu0 %v2924_v12  ;;  %v2678_v6 = vsel %vm536_vm0, %v532_v22, 0  ;;  %v9490_v24 = vadd.f32 %v9275_v27, %v7315_v15  ;;  %v13022_v41 = vand.u32 4294901760, %v9405_v11  ;;  %v2681_v40 = vsel %vm536_vm0, %v533_v37, 0 }
 0x18a   : > { %13021 = vst [vmem:[#allocation43_spill] sm:$0xff] %v9485_v42  ;;  %7625 = vmatprep.mubr.f32.mxu0 %v2934_v35  ;;  %v2944_v12 = vand.u32 4294901760, %v2943_v10  ;;  %v2954_v7 = vand.u32 4294901760, %v2953_v16  ;;  %v886_v22 = vpop.f32.mrf.mxu0  ;;  %v13023_v35 = vand.u32 4294901760, %v9408_v47  ;;  %v9502_v15 = vand.u32 4294901760, %v2678_v6 }
 0x18b   : > { %7690 = vmatmul.mubr.f32.gmra.mxu1 %v9449_v3  ;;  %v2963_v51 = vsub.f32 %v9405_v11, %v13022_v41  ;;  %v9505_v10 = vadd.f32 %v9294_v32, %v886_v22  ;;  %v9507_v41 = vpop.f32.mrf.mxu1  ;;  %v9510_v60 = vsub.f32 %v2669_v14, %v9449_v3  ;;  %v9513_v37 = vsub.f32 %v2672_v48, %v9474_v19 }
 0x18c   : > { %7692 = vmatprep.mubr.f32.mxu1 %v9474_v19  ;;  %v2973_v25 = vsub.f32 %v9408_v47, %v13023_v35  ;;  %13024 = vst [vmem:[#allocation45_spill] sm:$0xff] %v9502_v15  ;;  %v9516_v16 = vand.u32 4294901760, %v2681_v40  ;;  %v7318_v35 = vpop.f32.mrf.mxu0  ;;  %v13028_v19 = vand.u32 4294901760, %v9442_v20 }
 0x18d   : > { %7626 = vmatmul.mubr.f32.gmra.mxu0 %v2944_v12  ;;  %13025 = vst [vmem:[#allocation46_spill] sm:$0xff] %v9505_v10  ;;  %v2964_v27 = vand.u32 4294901760, %v2963_v51  ;;  %v13027_v12 = vand.u32 4294901760, %v9439_v36  ;;  %v9523_v14 = vpop.f32.mrf.mxu1  ;;  %v9526_v48 = vadd.f32 %v9328_v56, %v7318_v35  ;;  %v12625_v51 = vand.u32 4294901760, %v9482_v55 }
 0x18e   : > { %7628 = vmatprep.mubr.f32.mxu0 %v2954_v7  ;;  %13026 = vst [vmem:[#allocation50_spill] sm:$0xff] %v9516_v16  ;;  %v2974_v7 = vand.u32 4294901760, %v2973_v25  ;;  %v2993_v3 = vsub.f32 %v9442_v20, %v13028_v19  ;;  %v906_v10 = vpop.f32.mrf.mxu0  ;;  %v9540_v56 = vsub.f32 %v9452_v13, %v9485_v42  ;;  %v13030_v35 = vand.u32 4294901760, %v9479_v52 }
 0x18f   : > { %7693 = vmatmul.mubr.f32.gmra.mxu1 %v9485_v42  ;;  %v2983_v32 = vsub.f32 %v9439_v36, %v13027_v12  ;;  %v9533_v12 = vadd.f32 %v9344_v57, %v906_v10  ;;  %v9535_v22 = vpop.f32.mrf.mxu1  ;;  %v9549_v57 = vsub.f32 %v2678_v6, %v9502_v15  ;;  %v13033_v6 = vand.u32 4294901760, %v9057_v50 }
 0x190   : > { %7695 = vmatprep.mubr.f32.mxu1 %v9502_v15  ;;  %v3003_v19 = vsub.f32 %v9479_v52, %v13030_v35  ;;  %v2994_v10 = vand.u32 4294901760, %v2993_v3  ;;  %v7321_v42 = vpop.f32.mrf.mxu0  ;;  %v9565_v3 = vsub.f32 %v2681_v40, %v9516_v16  ;;  %v13034_v13 = vand.u32 4294901760, %v9510_v60 }
 0x191   : > { %7629 = vmatmul.mubr.f32.gmra.mxu0 %v2964_v27  ;;  %13029 = vst [vmem:[#allocation49_spill] sm:$0xff] %v9533_v12  ;;  %v2984_v25 = vand.u32 4294901760, %v2983_v32  ;;  %v3013_v12 = vsub.f32 %v9482_v55, %v12625_v51  ;;  %v9555_v32 = vpop.f32.mrf.mxu1  ;;  %v9558_v35 = vadd.f32 %v9369_v62, %v7321_v42  ;;  %v13035_v62 = vand.u32 4294901760, %v9084_v44 }
 0x192   : > { %7631 = vmatprep.mubr.f32.mxu0 %v2974_v7  ;;  %v13031_v7 = vand.u32 4294901760, %v9052_v0  ;;  %v3004_v51 = vand.u32 4294901760, %v3003_v19  ;;  %v3023_v15 = vsub.f32 %v9510_v60, %v13034_v13  ;;  %v13036_v40 = vand.u32 4294901760, %v9513_v37 }
 0x193   : > { %7696 = vmatmul.mubr.f32.gmra.mxu1 %v9516_v16  ;;  %v9560_v27 = vpop.f32.mrf.mxu1  ;;  %v12631_v19 = vand.u32 4294901760, %v9565_v3 }
 0x194   : > { %7754 = vmatprep.mubr.f32.mxu1 %v13031_v7  ;;  %13032 = vst [vmem:[#allocation54_spill] sm:$0xff] %v9560_v27  ;;  %v926_v7 = vpop.f32.mrf.mxu0 }
 0x195   : > { %7632 = vmatmul.mubr.f32.gmra.mxu0 %v2984_v25  ;;  %v12630_v25 = vand.u32 4294901760, %v9540_v56  ;;  %v9575_v42 = vadd.f32 %v9387_v4, %v926_v7  ;;  %v9581_v16 = vpop.f32.mrf.mxu1 }
 0x196   : > { %7634 = vmatprep.mubr.f32.mxu0 %v2994_v10  ;;  %v3014_v10 = vand.u32 4294901760, %v3013_v12  ;;  %13037 = vst [vmem:[#allocation55_spill] sm:$0xff] %v9581_v16  ;;  %v7324_v13 = vpop.f32.mrf.mxu0  ;;  %v13038_v12 = vand.u32 4294901760, %v9104_v23 }
 0x197   : > { %7755 = vmatmul.mubr.f32.vlgmr.msra.gmra.mxu1 %v13033_v6  ;;  %v3033_v6 = vsub.f32 %v9513_v37, %v13036_v40  ;;  %v9588_v4 = vpop.f32.mrf.mxu1  ;;  %v3043_v40 = vsub.f32 %v9540_v56, %v12630_v25 }
 0x198   : > { %7757 = vmatprep.mubr.f32.mxu1 %v13035_v62  ;;  %7855 = vmatpush3.msra.mxu1 %v8801_v33  ;;  %v9586_v33 = vadd.f32 %v9422_v5, %v7324_v13  ;;  %v946_v7 = vpop.f32.mrf.mxu0  ;;  %v3024_v62 = vand.u32 4294901760, %v3023_v15 }
 0x199   : > { %7856 = vmatprep.subr.mxu1 %v8902_v45  ;;  %7635 = vmatmul.mubr.f32.gmra.mxu0 %v3004_v51  ;;  %v13039_v51 = vand.u32 4294901760, %v9107_v9  ;;  %v3034_v5 = vand.u32 4294901760, %v3033_v6  ;;  %v3063_v6 = vsub.f32 %v9565_v3, %v12631_v19 }
 0x19a   : > { %7857 = vmatpush3.msra.mxu1 %v8902_v45  ;;  %7637 = vmatprep.mubr.f32.mxu0 %v3014_v10  ;;  %v9599_v45 = vadd.f32 %v9436_v28, %v946_v7  ;;  %v13041_v10 = vand.u32 4294901760, %v9549_v57  ;;  %v7327_v15 = vpop.f32.mrf.mxu0  ;;  %v3044_v7 = vand.u32 4294901760, %v3043_v40  ;;  %v13045_v40 = vand.u32 4294901760, %v9160_v34 }
 0x19b   : > { %7758 = vmatmul.mubr.f32.gmra.mxu1 %v13038_v12  ;;  %v9604_v12 = vpop.f32.mrf.mxu1  ;;  %v9607_v16 = vadd.f32 %v9466_v54, %v7327_v15  ;;  %v3064_v19 = vand.u32 4294901760, %v3063_v6 }
 0x19c   : > { %7760 = vmatprep.mubr.f32.mxu1 %v13039_v51  ;;  %13040 = vst [vmem:[#allocation56_spill] sm:$0xff] %v9599_v45  ;;  %v3053_v13 = vsub.f32 %v9549_v57, %v13041_v10  ;;  %v13043_v51 = vand.u32 4294901760, %v9134_v1  ;;  %v966_v28 = vpop.f32.mrf.mxu0  ;;  %v13044_v10 = vand.u32 4294901760, %v9142_v39  ;;  %v13046_v45 = vand.u32 4294901760, %v9167_v18 }
 0x19d   : > { %7638 = vmatmul.mubr.f32.gmra.mxu0 %v3024_v62  ;;  %13042 = vst [vmem:[#allocation57_spill] sm:$0xff] %v9607_v16  ;;  %v9609_v25 = vpop.f32.mrf.mxu1  ;;  %v9619_v62 = vadd.f32 %v9476_v2, %v966_v28 }
 0x19e   : > { %7640 = vmatprep.mubr.f32.mxu0 %v3034_v5  ;;  %v3054_v54 = vand.u32 4294901760, %v3053_v13  ;;  %v7330_v5 = vpop.f32.mrf.mxu0 }
 0x19f   : > { %7761 = vmatmul.mubr.f32.gmra.mxu1 %v13043_v51  ;;  %v1683_v15 = vpop.f32.mrf.mxu1  ;;  %v9622_v27 = vadd.f32 %v9507_v41, %v7330_v5  ;;  %v13050_v5 = vand.u32 4294901760, %v9260_v29 }
 0x1a0   : > { %7763 = vmatprep.mubr.f32.mxu1 %v13044_v10  ;;  %v986_v16 = vpop.f32.mrf.mxu0  ;;  %v13047_v10 = vand.u32 4294901760, %v9197_v17 }
 0x1a1   : > { %7641 = vmatmul.mubr.f32.gmra.mxu0 %v3044_v7  ;;  %v7453_v51 = vpop.f32.mrf.mxu1  ;;  %v9629_v2 = vadd.f32 %v9523_v14, %v986_v16 }
 0x1a2   : > { %7643 = vmatprep.mubr.f32.mxu0 %v3054_v54  ;;  %v7333_v28 = vpop.f32.mrf.mxu0 }
 0x1a3   : > { %7764 = vmatmul.mubr.f32.gmra.mxu1 %v13045_v40  ;;  %v9631_v13 = vpop.f32.mrf.mxu1  ;;  %v9634_v41 = vadd.f32 %v9535_v22, %v7333_v28  ;;  %v13049_v22 = vand.u32 4294901760, %v9232_v8  ;;  %v13051_v28 = vand.u32 4294901760, %v9239_v43 }
 0x1a4   : > { %7766 = vmatprep.mubr.f32.mxu1 %v13046_v45  ;;  %v1006_v6 = vpop.f32.mrf.mxu0  ;;  %v13048_v45 = vand.u32 4294901760, %v9200_v46 }
 0x1a5   : > { %7644 = vmatmul.mubr.f32.gmra.mxu0 %v3064_v19  ;;  %v9637_v7 = vpop.f32.mrf.mxu1  ;;  %v9644_v16 = vadd.f32 %v9555_v32, %v1006_v6  ;;  %v13052_v6 = vand.u32 4294901760, %v9287_v53 }
 0x1a6   : > { %7702 = vmatprep.mubr.f32.mxu0 %v9052_v0  ;;  %v9648_v19 = vpop.f32.mrf.mxu0 }
 0x1a7   : > { %7767 = vmatmul.mubr.f32.gmra.mxu1 %v13047_v10  ;;  %v9646_v14 = vpop.f32.mrf.mxu1 }
 0x1a8   : > { %7769 = vmatprep.mubr.f32.mxu1 %v13048_v45  ;;  %v9656_v54 = vpop.f32.mrf.mxu0 }
 0x1a9   : > { %7703 = vmatmul.mubr.f32.vlgmr.msra.gmra.mxu0 %v9057_v50  ;;  %v9652_v0 = vpop.f32.mrf.mxu1 }
 0x1aa   : > { %7705 = vmatprep.mubr.f32.mxu0 %v9084_v44  ;;  %7803 = vmatpush3.msra.mxu0 %v8824_v58  ;;  %v7395_v40 = vpop.f32.mrf.mxu0 }
 0x1ab   : > { %7770 = vmatmul.mubr.f32.gmra.mxu1 %v13049_v22  ;;  %v9661_v32 = vpop.f32.mrf.mxu1  ;;  %7804 = vmatprep.subr.mxu0 %v8920_v31  ;;  %v1381_v50 = vadd.f32 %v7395_v40, %v9111_v30  ;;  %v13054_v40 = vand.u32 4294901760, %v9303_v61 }
 0x1ac   : > { %7772 = vmatprep.mubr.f32.mxu1 %v13050_v5  ;;  %v1373_v10 = vpop.f32.mrf.mxu0  ;;  %7805 = vmatpush3.msra.mxu0 %v8920_v31  ;;  %v13053_v5 = vand.u32 4294901760, %v9278_v38 }
 0x1ad   : > { %7706 = vmatmul.mubr.f32.gmra.mxu0 %v9104_v23  ;;  %v9667_v44 = vpop.f32.mrf.mxu1  ;;  %v1374_v58 = vadd.f32 %v1373_v10, %v9129_v63  ;;  %v9678_v23 = vadd.f32 %v9588_v4, %v1381_v50  ;;  %v13056_v10 = vand.u32 4294901760, %v9337_v26 }
 0x1ae   : > { %7708 = vmatprep.mubr.f32.mxu0 %v9107_v9  ;;  %v7398_v30 = vpop.f32.mrf.mxu0 }
 0x1af   : > { %7773 = vmatmul.mubr.f32.gmra.mxu1 %v13051_v28  ;;  %v9675_v45 = vpop.f32.mrf.mxu1  ;;  %v1395_v9 = vadd.f32 %v7398_v30, %v9157_v21  ;;  %v9688_v31 = vadd.f32 %v9604_v12, %v1374_v58  ;;  %v13055_v21 = vld [vmem:[#allocation51_spill] sm:$0xff] }
 0x1b0   : > { %7775 = vmatprep.mubr.f32.mxu1 %v13052_v6  ;;  %v1387_v63 = vpop.f32.mrf.mxu0  ;;  %v13057_v58 = vld [vmem:[#allocation15_spill] sm:$0xff] }
 0x1b1   : > { %7709 = vmatmul.mubr.f32.gmra.mxu0 %v9134_v1  ;;  %v9683_v22 = vpop.f32.mrf.mxu1  ;;  %v1388_v4 = vadd.f32 %v1387_v63, %v9176_v49  ;;  %v9696_v1 = vadd.f32 %v9609_v25, %v1395_v9  ;;  %v13058_v30 = vand.u32 4294901760, %v13057_v58  ;;  %v13059_v25 = vld [vmem:[#allocation7_spill] sm:$0xff] }
 0x1b2   : > { %7711 = vmatprep.mubr.f32.mxu0 %v9142_v39  ;;  %v7401_v39 = vpop.f32.mrf.mxu0 }
 0x1b3   : > { %7776 = vmatmul.mubr.f32.gmra.mxu1 %v13053_v5  ;;  %v9693_v50 = vpop.f32.mrf.mxu1  ;;  %v1409_v28 = vadd.f32 %v7401_v39, %v13055_v21  ;;  %v9705_v6 = vadd.f32 %v1683_v15, %v1388_v4  ;;  %v13061_v15 = vand.u32 4294901760, %v9372_v59 }
 0x1b4   : > { %7778 = vmatprep.mubr.f32.mxu1 %v13054_v40  ;;  %v1401_v49 = vpop.f32.mrf.mxu0 }
 0x1b5   : > { %7712 = vmatmul.mubr.f32.gmra.mxu0 %v9160_v34  ;;  %v9701_v12 = vpop.f32.mrf.mxu1  ;;  %v1402_v9 = vadd.f32 %v1401_v49, %v13059_v25  ;;  %v9712_v34 = vadd.f32 %v7453_v51, %v1409_v28  ;;  %v13064_v51 = vld [vmem:[#allocation9_spill] sm:$0xff]  ;;  %v13065_v25 = vld [vmem:[#allocation10_spill] sm:$0xff] }
 0x1b6   : > { %7714 = vmatprep.mubr.f32.mxu0 %v9167_v18  ;;  %v7404_v63 = vpop.f32.mrf.mxu0  ;;  %v13060_v18 = vld [vmem:[#allocation53_spill] sm:$0xff] }
 0x1b7   : > { %7779 = vmatmul.mubr.f32.gmra.mxu1 %v13056_v10  ;;  %v9710_v5 = vpop.f32.mrf.mxu1  ;;  %v1423_v40 = vadd.f32 %v7404_v63, %v13060_v18  ;;  %v9722_v4 = vadd.f32 %v9631_v13, %v1402_v9  ;;  %v13062_v10 = vld [vmem:[#allocation25_spill] sm:$0xff]  ;;  %v13066_v9 = vand.u32 4294901760, %v9405_v11 }
 0x1b8   : > { %7781 = vmatprep.mubr.f32.mxu1 %v13058_v30  ;;  %v1415_v21 = vpop.f32.mrf.mxu0  ;;  %v13063_v49 = vand.u32 4294901760, %v13062_v10 }
 0x1b9   : > { %7715 = vmatmul.mubr.f32.gmra.mxu0 %v9197_v17  ;;  %v9717_v39 = vpop.f32.mrf.mxu1  ;;  %v1416_v28 = vadd.f32 %v1415_v21, %v13064_v51  ;;  %v9730_v17 = vadd.f32 %v9637_v7, %v1423_v40  ;;  %v13067_v21 = vand.u32 4294901760, %v9408_v47  ;;  %v13068_v7 = vld [vmem:[#allocation13_spill] sm:$0xff] }
 0x1ba   : > { %7717 = vmatprep.mubr.f32.mxu0 %v9200_v46  ;;  %v7407_v46 = vpop.f32.mrf.mxu0  ;;  %v13069_v51 = vld [vmem:[#allocation17_spill] sm:$0xff] }
 0x1bb   : > { %7782 = vmatmul.mubr.f32.gmra.mxu1 %v13061_v15  ;;  %v9727_v30 = vpop.f32.mrf.mxu1  ;;  %v1437_v63 = vadd.f32 %v7407_v46, %v13065_v25  ;;  %v9740_v18 = vadd.f32 %v9646_v14, %v1416_v28  ;;  %v13070_v28 = vand.u32 4294901760, %v9439_v36 }
 0x1bc   : > { %7784 = vmatprep.mubr.f32.mxu1 %v13063_v49  ;;  %v1429_v15 = vpop.f32.mrf.mxu0 }
 0x1bd   : > { %7718 = vmatmul.mubr.f32.gmra.mxu0 %v9232_v8  ;;  %v9735_v13 = vpop.f32.mrf.mxu1  ;;  %v1430_v40 = vadd.f32 %v1429_v15, %v13068_v7  ;;  %v9748_v8 = vadd.f32 %v9652_v0, %v1437_v63  ;;  %v13071_v15 = vand.u32 4294901760, %v9442_v20  ;;  %v13072_v0 = vld [vmem:[#allocation21_spill] sm:$0xff] }
 0x1be   : > { %7720 = vmatprep.mubr.f32.mxu0 %v9260_v29  ;;  %v7410_v29 = vpop.f32.mrf.mxu0  ;;  %v13073_v7 = vld [vmem:[#allocation29_spill] sm:$0xff] }
 0x1bf   : > { %7785 = vmatmul.mubr.f32.gmra.mxu1 %v13066_v9  ;;  %v9745_v49 = vpop.f32.mrf.mxu1  ;;  %v1451_v46 = vadd.f32 %v7410_v29, %v13069_v51  ;;  %v9758_v25 = vadd.f32 %v9661_v32, %v1430_v40  ;;  %v13074_v40 = vand.u32 4294901760, %v9479_v52 }
 0x1c0   : > { %7787 = vmatprep.mubr.f32.mxu1 %v13067_v21  ;;  %v1443_v9 = vpop.f32.mrf.mxu0 }
 0x1c1   : > { %7721 = vmatmul.mubr.f32.gmra.mxu0 %v9239_v43  ;;  %v9753_v14 = vpop.f32.mrf.mxu1  ;;  %v1444_v63 = vadd.f32 %v1443_v9, %v13072_v0  ;;  %v9766_v43 = vadd.f32 %v9667_v44, %v1451_v46  ;;  %v13075_v9 = vand.u32 4294901760, %v9482_v55  ;;  %v13076_v44 = vld [vmem:[#allocation32_spill] sm:$0xff] }
 0x1c2   : > { %7723 = vmatprep.mubr.f32.mxu0 %v9287_v53  ;;  %v7413_v53 = vpop.f32.mrf.mxu0 }
 0x1c3   : > { %7788 = vmatmul.mubr.f32.gmra.mxu1 %v13070_v28  ;;  %v9763_v21 = vpop.f32.mrf.mxu1  ;;  %v1465_v29 = vadd.f32 %v7413_v53, %v13073_v7  ;;  %v9776_v51 = vadd.f32 %v9675_v45, %v1444_v63  ;;  %v13077_v45 = vand.u32 4294901760, %v9510_v60  ;;  %v13078_v7 = vand.u32 4294901760, %v9513_v37 }
 0x1c4   : > { %7790 = vmatprep.mubr.f32.mxu1 %v13071_v15  ;;  %v1457_v28 = vpop.f32.mrf.mxu0 }
 0x1c5   : > { %7724 = vmatmul.mubr.f32.gmra.mxu0 %v9278_v38  ;;  %v9771_v32 = vpop.f32.mrf.mxu1  ;;  %v1458_v46 = vadd.f32 %v1457_v28, %v13076_v44  ;;  %v9784_v38 = vadd.f32 %v9683_v22, %v1465_v29  ;;  %v13080_v28 = vand.u32 4294901760, %v9549_v57 }
 0x1c6   : > { %7726 = vmatprep.mubr.f32.mxu0 %v9303_v61  ;;  %v9786_v61 = vpop.f32.mrf.mxu0 }
 0x1c7   : > { %7791 = vmatmul.mubr.f32.gmra.mxu1 %v13074_v40  ;;  %v9781_v15 = vpop.f32.mrf.mxu1  ;;  %v9795_v63 = vadd.f32 %v9693_v50, %v1458_v46  ;;  %v13079_v40 = vand.u32 4294901760, %v9540_v56 }
 0x1c8   : > { %7793 = vmatprep.mubr.f32.mxu1 %v13075_v9  ;;  %v9797_v53 = vpop.f32.mrf.mxu0  ;;  %v13081_v9 = vld [vmem:[#allocation46_spill] sm:$0xff] }
 0x1c9   : > { %7727 = vmatmul.mubr.f32.gmra.mxu0 %v9337_v26  ;;  %v9790_v0 = vpop.f32.mrf.mxu1 }
 0x1ca   : > { %7729 = vmatprep.mubr.f32.mxu0 %v13057_v58  ;;  %v7419_v29 = vpop.f32.mrf.mxu0 }
 0x1cb   : > { %7794 = vmatmul.mubr.f32.gmra.mxu1 %v13077_v45  ;;  %v9801_v22 = vpop.f32.mrf.mxu1  ;;  %v1493_v26 = vadd.f32 %v7419_v29, %v9490_v24 }
 0x1cc   : > { %7796 = vmatprep.mubr.f32.mxu1 %v13078_v7  ;;  %v1485_v50 = vpop.f32.mrf.mxu0  ;;  %v13082_v7 = vand.u32 4294901760, %v9565_v3 }
 0x1cd   : > { %7730 = vmatmul.mubr.f32.gmra.mxu0 %v9372_v59  ;;  %v9806_v58 = vpop.f32.mrf.mxu1  ;;  %v1486_v44 = vadd.f32 %v1485_v50, %v13081_v9  ;;  %v9816_v45 = vadd.f32 %v9717_v39, %v1493_v26  ;;  %v13083_v50 = vld [vmem:[#allocation16_spill] sm:$0xff]  ;;  %v13084_v39 = vld [vmem:[#allocation49_spill] sm:$0xff] }
 0x1ce   : > { %7732 = vmatprep.mubr.f32.mxu0 %v13062_v10  ;;  %v7422_v59 = vpop.f32.mrf.mxu0 }
 0x1cf   : > { %7797 = vmatmul.mubr.f32.gmra.mxu1 %v13079_v40  ;;  %v9813_v46 = vpop.f32.mrf.mxu1  ;;  %v1507_v24 = vadd.f32 %v7422_v59, %v9526_v48  ;;  %v9826_v29 = vadd.f32 %v9727_v30, %v1486_v44  ;;  %v13085_v30 = vld [vmem:[#allocation19_spill] sm:$0xff] }
 0x1d0   : > { %7799 = vmatprep.mubr.f32.mxu1 %v13080_v28  ;;  %v1499_v40 = vpop.f32.mrf.mxu0 }
 0x1d1   : > { %7733 = vmatmul.mubr.f32.gmra.mxu0 %v9405_v11  ;;  %v9821_v10 = vpop.f32.mrf.mxu1  ;;  %v1500_v26 = vadd.f32 %v1499_v40, %v13084_v39  ;;  %v9833_v11 = vadd.f32 %v9735_v13, %v1507_v24 }
 0x1d2   : > { %7735 = vmatprep.mubr.f32.mxu0 %v9408_v47  ;;  %v7425_v48 = vpop.f32.mrf.mxu0 }
 0x1d3   : > { %7800 = vmatmul.mubr.f32.gmra.mxu1 %v13082_v7  ;;  %v9830_v28 = vpop.f32.mrf.mxu1  ;;  %v1521_v47 = vadd.f32 %v7425_v48, %v9558_v35  ;;  %v9842_v44 = vadd.f32 %v9745_v49, %v1500_v26  ;;  %v13086_v7 = vld [vmem:[#allocation22_spill] sm:$0xff]  ;;  %v13087_v49 = vld [vmem:[#allocation24_spill] sm:$0xff] }
 0x1d4   : > { %7858 = vmatprep.mubr.f32.mxu1 %v13083_v50  ;;  %v1513_v59 = vpop.f32.mrf.mxu0  ;;  %v13088_v26 = vld [vmem:[#allocation26_spill] sm:$0xff]  ;;  %v13089_v48 = vld [vmem:[#allocation56_spill] sm:$0xff] }
 0x1d5   : > { %7736 = vmatmul.mubr.f32.gmra.mxu0 %v9439_v36  ;;  %v9838_v9 = vpop.f32.mrf.mxu1  ;;  %v1514_v13 = vadd.f32 %v1513_v59, %v9575_v42  ;;  %v9849_v36 = vadd.f32 %v9753_v14, %v1521_v47 }
 0x1d6   : > { %7738 = vmatprep.mubr.f32.mxu0 %v9442_v20  ;;  %v7428_v35 = vpop.f32.mrf.mxu0 }
 0x1d7   : > { %7859 = vmatmul.mubr.f32.vlgmr.msra.gmra.mxu1 %v13085_v30  ;;  %v9846_v24 = vpop.f32.mrf.mxu1  ;;  %v1535_v20 = vadd.f32 %v7428_v35, %v9586_v33  ;;  %v9858_v39 = vadd.f32 %v9763_v21, %v1514_v13  ;;  %v13091_v21 = vld [vmem:[#allocation31_spill] sm:$0xff] }
 0x1d8   : > { %7861 = vmatprep.mubr.f32.mxu1 %v13086_v7  ;;  %v1527_v42 = vpop.f32.mrf.mxu0 }
 0x1d9   : > { %7739 = vmatmul.mubr.f32.gmra.mxu0 %v9479_v52  ;;  %v9854_v40 = vpop.f32.mrf.mxu1  ;;  %v1528_v14 = vadd.f32 %v1527_v42, %v13089_v48  ;;  %v9865_v52 = vadd.f32 %v9771_v32, %v1535_v20  ;;  %v13093_v48 = vld [vmem:[#allocation34_spill] sm:$0xff] }
 0x1da   : > { %7741 = vmatprep.mubr.f32.mxu0 %v9482_v55  ;;  %v7431_v33 = vpop.f32.mrf.mxu0  ;;  %v13090_v55 = vld [vmem:[#allocation57_spill] sm:$0xff] }
 0x1db   : > { %7862 = vmatmul.mubr.f32.gmra.mxu1 %v13087_v49  ;;  %v9862_v47 = vpop.f32.mrf.mxu1  ;;  %v1549_v59 = vadd.f32 %v7431_v33, %v13090_v55  ;;  %v9874_v13 = vadd.f32 %v9781_v15, %v1528_v14  ;;  %v13094_v15 = vld [vmem:[#allocation35_spill] sm:$0xff] }
 0x1dc   : > { %7864 = vmatprep.mubr.f32.mxu1 %v13088_v26  ;;  %v1541_v42 = vpop.f32.mrf.mxu0 }
 0x1dd   : > { %7742 = vmatmul.mubr.f32.gmra.mxu0 %v9510_v60  ;;  %v9870_v35 = vpop.f32.mrf.mxu1  ;;  %13092 = vst [vmem:[#allocation51_spill] sm:$0xff] %v9874_v13  ;;  %v1542_v32 = vadd.f32 %v1541_v42, %v9619_v62  ;;  %v9881_v60 = vadd.f32 %v9790_v0, %v1549_v59  ;;  %v13096_v42 = vld [vmem:[#allocation38_spill] sm:$0xff]  ;;  %v13097_v13 = vld [vmem:[#allocation27_spill] sm:$0xff] }
 0x1de   : > { %7744 = vmatprep.mubr.f32.mxu0 %v9513_v37  ;;  %v7434_v33 = vpop.f32.mrf.mxu0  ;;  %v1367_v0 = vadd.f32 %v9648_v19, %v13097_v13  ;;  %v13100_v19 = vld [vmem:[#allocation39_spill] sm:$0xff] }
 0x1df   : > { %7865 = vmatmul.mubr.f32.gmra.mxu1 %v13091_v21  ;;  %v9878_v20 = vpop.f32.mrf.mxu1  ;;  %v1563_v37 = vadd.f32 %v7434_v33, %v9622_v27  ;;  %v9890_v14 = vadd.f32 %v9801_v22, %v1542_v32  ;;  %v13099_v33 = vld [vmem:[#allocation30_spill] sm:$0xff] }
 0x1e0   : > { %7867 = vmatprep.mubr.f32.mxu1 %v13093_v48  ;;  %v1555_v62 = vpop.f32.mrf.mxu0  ;;  %v1360_v22 = vadd.f32 %v9656_v54, %v13099_v33  ;;  %v13106_v33 = vld [vmem:[#allocation47_spill] sm:$0xff] }
 0x1e1   : > { %7745 = vmatmul.mubr.f32.gmra.mxu0 %v9540_v56  ;;  %v9886_v55 = vpop.f32.mrf.mxu1  ;;  %13095 = vst [vmem:[#allocation15_spill] sm:$0xff] %v9890_v14  ;;  %v1556_v59 = vadd.f32 %v1555_v62, %v9629_v2  ;;  %v9899_v27 = vadd.f32 %v9806_v58, %v1563_v37  ;;  %v13102_v58 = vld [vmem:[#allocation42_spill] sm:$0xff] }
 0x1e2   : > { %7747 = vmatprep.mubr.f32.mxu0 %v9549_v57  ;;  %v7437_v57 = vpop.f32.mrf.mxu0 }
 0x1e3   : > { %7868 = vmatmul.mubr.f32.gmra.mxu1 %v13094_v15  ;;  %v9896_v56 = vpop.f32.mrf.mxu1  ;;  %13098 = vst [vmem:[#allocation7_spill] sm:$0xff] %v9899_v27  ;;  %v1577_v32 = vadd.f32 %v7437_v57, %v9634_v41  ;;  %v9910_v2 = vadd.f32 %v9813_v46, %v1556_v59  ;;  %v13105_v46 = vld [vmem:[#allocation55_spill] sm:$0xff] }
 0x1e4   : > { %7870 = vmatprep.mubr.f32.mxu1 %v13096_v42  ;;  %v1569_v13 = vpop.f32.mrf.mxu0  ;;  %v1652_v59 = vadd.f32 %v13105_v46, %v1360_v22  ;;  %v13110_v22 = vld [vmem:[#allocation48_spill] sm:$0xff] }
 0x1e5   : > { %7748 = vmatmul.mubr.f32.gmra.mxu0 %v9565_v3  ;;  %v9906_v14 = vpop.f32.mrf.mxu1  ;;  %13101 = vst [vmem:[#allocation53_spill] sm:$0xff] %v9910_v2  ;;  %v1570_v37 = vadd.f32 %v1569_v13, %v9644_v16  ;;  %v13103_v3 = vld [vmem:[#allocation54_spill] sm:$0xff]  ;;  %v9918_v41 = vadd.f32 %v9821_v10, %v1577_v32  ;;  %v13108_v13 = vld [vmem:[#allocation5_spill] sm:$0xff]  ;;  %v13113_v46 = vld [vmem:[#allocation52_spill] sm:$0xff] }
 0x1e6   : > { %7806 = vmatprep.mubr.f32.mxu0 %v13083_v50  ;;  %v1660_v62 = vadd.f32 %v13103_v3, %v1367_v0  ;;  %v7496_v54 = vpop.f32.mrf.mxu0 }
 0x1e7   : > { %7871 = vmatmul.mubr.f32.gmra.mxu1 %v13100_v19  ;;  %v9915_v27 = vpop.f32.mrf.mxu1  ;;  %13104 = vst [vmem:[#allocation25_spill] sm:$0xff] %v9918_v41  ;;  %v9927_v16 = vadd.f32 %v9830_v28, %v1570_v37 }
 0x1e8   : > { %7873 = vmatprep.mubr.f32.mxu1 %v13102_v58  ;;  %v1983_v50 = vadd.f32 %v7496_v54, %v1660_v62  ;;  %v1976_v0 = vpop.f32.mrf.mxu0  ;;  %v13112_v62 = vld [vmem:[#allocation4_spill] sm:$0xff] }
 0x1e9   : > { %7807 = vmatmul.mubr.f32.vlgmr.msra.gmra.mxu0 %v13085_v30  ;;  %v9923_v57 = vpop.f32.mrf.mxu1  ;;  %13107 = vst [vmem:[#allocation9_spill] sm:$0xff] %v9927_v16  ;;  %v1977_v32 = vadd.f32 %v1976_v0, %v1652_v59  ;;  %v13115_v59 = vld [vmem:[#allocation6_spill] sm:$0xff] }
 0x1ea   : > { %7809 = vmatprep.mubr.f32.mxu0 %v13086_v7  ;;  %v9931_v10 = vadd.f32 %v9838_v9, %v1983_v50  ;;  %v7499_v3 = vpop.f32.mrf.mxu0 }
 0x1eb   : > { %7874 = vmatmul.mubr.f32.gmra.mxu1 %v13106_v33  ;;  %v9933_v30 = vpop.f32.mrf.mxu1  ;;  %v9943_v9 = vadd.f32 %v9846_v24, %v1977_v32  ;;  %v1995_v37 = vadd.f32 %v7499_v3, %v9678_v23  ;;  %v13116_v3 = vld [vmem:[#allocation8_spill] sm:$0xff] }
 0x1ec   : > { %7876 = vmatprep.mubr.f32.mxu1 %v13108_v13  ;;  %13109 = vst [vmem:[#allocation10_spill] sm:$0xff] %v9931_v10  ;;  %2459 = vrot.lane.b32.xlu1 %v9931_v10, %s8021_s22  ;;  %v1988_v7 = vpop.f32.mrf.mxu0  ;;  %v13119_v10 = vld [vmem:[#allocation12_spill] sm:$0xff] }
 0x1ed   : > { %7810 = vmatmul.mubr.f32.gmra.mxu0 %v13087_v49  ;;  %v9939_v28 = vpop.f32.mrf.mxu1  ;;  %13111 = vst [vmem:[#allocation13_spill] sm:$0xff] %v9943_v9  ;;  %v9957_v24 = vadd.f32 %v9854_v40, %v1995_v37  ;;  %v1989_v23 = vadd.f32 %v1988_v7, %v9688_v31  ;;  %v13118_v7 = vld [vmem:[#allocation11_spill] sm:$0xff] }
 0x1ee   : > { %7812 = vmatprep.mubr.f32.mxu0 %v13088_v26  ;;  %v7502_v49 = vpop.f32.mrf.mxu0 }
 0x1ef   : > { %7877 = vmatmul.mubr.f32.gmra.mxu1 %v13110_v22  ;;  %v9947_v54 = vpop.f32.mrf.mxu1  ;;  %13114 = vst [vmem:[#allocation17_spill] sm:$0xff] %v9957_v24  ;;  %v9971_v40 = vadd.f32 %v9862_v47, %v1989_v23  ;;  %v2007_v31 = vadd.f32 %v7502_v49, %v9696_v1  ;;  %v13121_v49 = vld [vmem:[#allocation14_spill] sm:$0xff] }
 0x1f0   : > { %7879 = vmatprep.mubr.f32.mxu1 %v13112_v62  ;;  %2457 = vrot.lane.b32.xlu1 %v9943_v9, %s8021_s22  ;;  %v2000_v50 = vpop.f32.mrf.mxu0 }
 0x1f1   : > { %7813 = vmatmul.mubr.f32.gmra.mxu0 %v13091_v21  ;;  %v9953_v26 = vpop.f32.mrf.mxu1  ;;  %13117 = vst [vmem:[#allocation21_spill] sm:$0xff] %v9971_v40  ;;  %v9985_v47 = vadd.f32 %v9870_v35, %v2007_v31  ;;  %v2001_v1 = vadd.f32 %v2000_v50, %v9705_v6  ;;  %v13122_v35 = vld [vmem:[#allocation18_spill] sm:$0xff]  ;;  %v13124_v31 = vld [vmem:[#allocation20_spill] sm:$0xff] }
 0x1f2   : > { %7815 = vmatprep.mubr.f32.mxu0 %v13093_v48  ;;  %v7505_v21 = vpop.f32.mrf.mxu0 }
 0x1f3   : > { %7880 = vmatmul.mubr.f32.gmra.mxu1 %v13113_v46  ;;  %v9961_v0 = vpop.f32.mrf.mxu1  ;;  %13120 = vst [vmem:[#allocation29_spill] sm:$0xff] %v9985_v47  ;;  %v10003_v6 = vadd.f32 %v9878_v20, %v2001_v1  ;;  %v2019_v50 = vadd.f32 %v7505_v21, %v9712_v34  ;;  %v13125_v20 = vld [vmem:[#allocation23_spill] sm:$0xff]  ;;  %v13126_v34 = vld [vmem:[#allocation37_spill] sm:$0xff] }
 0x1f4   : > { %7882 = vmatprep.mubr.f32.mxu1 %v13115_v59  ;;  %2463 = vrot.lane.b32.xlu1 %v9957_v24, %s8021_s22  ;;  %v2012_v32 = vpop.f32.mrf.mxu0  ;;  %v1479_v21 = vadd.f32 %v9786_v61, %v13126_v34 }
 0x1f5   : > { %7816 = vmatmul.mubr.f32.gmra.mxu0 %v13094_v15  ;;  %v9967_v48 = vpop.f32.mrf.mxu1  ;;  %13123 = vst [vmem:[#allocation32_spill] sm:$0xff] %v10003_v6  ;;  %v10023_v1 = vadd.f32 %v9886_v55, %v2019_v50  ;;  %v2013_v16 = vadd.f32 %v2012_v32, %v9722_v4  ;;  %v13130_v4 = vld [vmem:[#allocation33_spill] sm:$0xff] }
 0x1f6   : > { %7818 = vmatprep.mubr.f32.mxu0 %v13096_v42  ;;  %v7508_v15 = vpop.f32.mrf.mxu0  ;;  %v1788_v50 = vadd.f32 %v9701_v12, %v1479_v21  ;;  %v13132_v21 = vld [vmem:[#allocation41_spill] sm:$0xff] }
 0x1f7   : > { %7883 = vmatmul.mubr.f32.gmra.mxu1 %v13116_v3  ;;  %v9975_v37 = vpop.f32.mrf.mxu1  ;;  %13127 = vst [vmem:[#allocation46_spill] sm:$0xff] %v10023_v1  ;;  %v10043_v32 = vadd.f32 %v9896_v56, %v2013_v16 }
 0x1f8   : > { %7885 = vmatprep.mubr.f32.mxu1 %v13118_v7  ;;  %2461 = vrot.lane.b32.xlu1 %v9971_v40, %s8021_s22  ;;  %v2024_v9 = vpop.f32.mrf.mxu0 }
 0x1f9   : > { %7819 = vmatmul.mubr.f32.gmra.mxu0 %v13100_v19  ;;  %v9981_v42 = vpop.f32.mrf.mxu1 }
 0x1fa   : > { %7821 = vmatprep.mubr.f32.mxu0 %v13102_v58  ;;  %v9991_v19 = vpop.f32.mrf.mxu0 }
 0x1fb   : > { %7886 = vmatmul.mubr.f32.gmra.mxu1 %v13119_v10  ;;  %v9989_v23 = vpop.f32.mrf.mxu1 }
 0x1fc   : > { %7888 = vmatprep.mubr.f32.mxu1 %v13121_v49  ;;  %2467 = vrot.lane.b32.xlu1 %v9985_v47, %s8021_s22  ;;  %v9999_v40 = vpop.f32.mrf.mxu0 }
 0x1fd   : > { %7822 = vmatmul.mubr.f32.gmra.mxu0 %v13106_v33  ;;  %v9997_v58 = vpop.f32.mrf.mxu1 }
 0x1fe   : > { %7824 = vmatprep.mubr.f32.mxu0 %v13108_v13  ;;  %v10009_v33 = vpop.f32.mrf.mxu0 }
 0x1ff   : > { %7889 = vmatmul.mubr.f32.gmra.mxu1 %v13122_v35  ;;  %v10007_v24 = vpop.f32.mrf.mxu1 }
 0x200   : > { %7891 = vmatprep.mubr.f32.mxu1 %v13124_v31  ;;  %2465 = vrot.lane.b32.xlu1 %v10003_v6, %s8021_s22  ;;  %v10017_v47 = vpop.f32.mrf.mxu0  ;;  %v13129_v6 = vld [vmem:[#allocation40_spill] sm:$0xff] }
 0x201   : > { %7825 = vmatmul.mubr.f32.gmra.mxu0 %v13110_v22  ;;  %v10015_v13 = vpop.f32.mrf.mxu1  ;;  %v13128_v22 = vld [vmem:[#allocation28_spill] sm:$0xff]  ;;  %v1472_v2 = vadd.f32 %v9797_v53, %v13129_v6  ;;  %v2031_v53 = vadd.f32 %v7508_v15, %v9730_v17 }
 0x202   : > { %7827 = vmatprep.mubr.f32.mxu0 %v13112_v62  ;;  %v10029_v41 = vpop.f32.mrf.mxu0  ;;  %v13134_v15 = vld [vmem:[#allocation44_spill] sm:$0xff] }
 0x203   : > { %7892 = vmatmul.mubr.f32.gmra.mxu1 %v13125_v20  ;;  %v10027_v62 = vpop.f32.mrf.mxu1  ;;  %v1780_v56 = vadd.f32 %v9710_v5, %v1472_v2 }
 0x204   : > { %7894 = vmatprep.mubr.f32.mxu1 %v13128_v22  ;;  %2471 = vrot.lane.b32.xlu1 %v10023_v1, %s8021_s22  ;;  %v10039_v55 = vpop.f32.mrf.mxu0 }
 0x205   : > { %7828 = vmatmul.mubr.f32.gmra.mxu0 %v13113_v46  ;;  %v10037_v61 = vpop.f32.mrf.mxu1  ;;  %v13131_v46 = vld [vmem:[#allocation36_spill] sm:$0xff] }
 0x206   : > { %7830 = vmatprep.mubr.f32.mxu0 %v13115_v59  ;;  %v7520_v59 = vpop.f32.mrf.mxu0 }
 0x207   : > { %7895 = vmatmul.mubr.f32.gmra.mxu1 %v13130_v4  ;;  %v10047_v34 = vpop.f32.mrf.mxu1  ;;  %v2079_v6 = vadd.f32 %v7520_v59, %v1788_v50  ;;  %v2025_v50 = vadd.f32 %v2024_v9, %v9740_v18  ;;  %v13137_v9 = vld [vmem:[#allocation45_spill] sm:$0xff] }
 0x208   : > { %7897 = vmatprep.mubr.f32.mxu1 %v13131_v46  ;;  %2469 = vrot.lane.b32.xlu1 %v10043_v32, %s8021_s22  ;;  %v2072_v12 = vpop.f32.mrf.mxu0 }
 0x209   : > { %7831 = vmatmul.mubr.f32.gmra.mxu0 %v13116_v3  ;;  %v10055_v16 = vpop.f32.mrf.mxu1  ;;  %v10059_v1 = vadd.f32 %v9967_v48, %v2079_v6  ;;  %v2073_v17 = vadd.f32 %v2072_v12, %v1780_v56  ;;  %v13135_v48 = vld [vmem:[#allocation43_spill] sm:$0xff]  ;;  %v13138_v56 = vld [vmem:[#allocation50_spill] sm:$0xff] }
 0x20a   : > { %7833 = vmatprep.mubr.f32.mxu0 %v13118_v7  ;;  %v10065_v7 = vadd.f32 %v9906_v14, %v2031_v53  ;;  %v7523_v59 = vpop.f32.mrf.mxu0  ;;  %v2043_v53 = vadd.f32 %v9991_v19, %v9748_v8 }
 0x20b   : > { %7898 = vmatmul.mubr.f32.gmra.mxu1 %v13132_v21  ;;  %13133 = vst [vmem:[#allocation16_spill] sm:$0xff] %v10059_v1  ;;  %v10062_v3 = vpop.f32.mrf.mxu1  ;;  %2491 = vrot.lane.b32.xlu0 %v10059_v1, %s8021_s22  ;;  %v10078_v14 = vadd.f32 %v9975_v37, %v2073_v17  ;;  %v2091_v18 = vadd.f32 %v7523_v59, %v9816_v45 }
 0x20c   : > { %7900 = vmatprep.mubr.f32.mxu1 %v13134_v15  ;;  %2475 = vrot.lane.b32.xlu1 %v10065_v7, %s8021_s22  ;;  %v2084_v2 = vpop.f32.mrf.mxu0 }
 0x20d   : > { %7834 = vmatmul.mubr.f32.gmra.mxu0 %v13119_v10  ;;  %v10072_v5 = vpop.f32.mrf.mxu1  ;;  %13136 = vst [vmem:[#allocation49_spill] sm:$0xff] %v10078_v14  ;;  %v2085_v8 = vadd.f32 %v2084_v2, %v9826_v29 }
 0x20e   : > { %7836 = vmatprep.mubr.f32.mxu0 %v13121_v49  ;;  %v10085_v49 = vadd.f32 %v9915_v27, %v2025_v50  ;;  %v7526_v6 = vpop.f32.mrf.mxu0  ;;  %v10099_v27 = vadd.f32 %v9981_v42, %v2091_v18 }
 0x20f   : > { %7901 = vmatmul.mubr.f32.gmra.mxu1 %v13135_v48  ;;  %v10082_v10 = vpop.f32.mrf.mxu1  ;;  %2489 = vrot.lane.b32.xlu0 %v10078_v14, %s8021_s22  ;;  %v10116_v17 = vadd.f32 %v9989_v23, %v2085_v8 }
 0x210   : > { %7903 = vmatprep.mubr.f32.mxu1 %v13137_v9  ;;  %2473 = vrot.lane.b32.xlu1 %v10085_v49, %s8021_s22  ;;  %v2096_v45 = vpop.f32.mrf.mxu0  ;;  %13139 = vst [vmem:[#allocation19_spill] sm:$0xff] %v10099_v27 }
 0x211   : > { %7837 = vmatmul.mubr.f32.gmra.mxu0 %v13122_v35  ;;  %v10093_v37 = vpop.f32.mrf.mxu1  ;;  %v10105_v35 = vadd.f32 %v9923_v57, %v2043_v53  ;;  %13140 = vst [vmem:[#allocation22_spill] sm:$0xff] %v10116_v17  ;;  %v2103_v57 = vadd.f32 %v7526_v6, %v9833_v11 }
 0x212   : > { %7839 = vmatprep.mubr.f32.mxu0 %v13124_v31  ;;  %v2037_v31 = vadd.f32 %v9999_v40, %v9758_v25  ;;  %v7529_v12 = vpop.f32.mrf.mxu0  ;;  %v2055_v40 = vadd.f32 %v10009_v33, %v9766_v43  ;;  %v2049_v33 = vadd.f32 %v10017_v47, %v9776_v51  ;;  %v2067_v47 = vadd.f32 %v10029_v41, %v9784_v38 }
 0x213   : > { %7904 = vmatmul.mubr.f32.gmra.mxu1 %v13138_v56  ;;  %v10102_v19 = vpop.f32.mrf.mxu1  ;;  %2495 = vrot.lane.b32.xlu0 %v10099_v27, %s8021_s22  ;;  %v2061_v41 = vadd.f32 %v10039_v55, %v9795_v63 }
 0x214   : > { %2479 = vrot.lane.b32.xlu1 %v10105_v35, %s8021_s22  ;;  %v2108_v29 = vpop.f32.mrf.mxu0  ;;  %v10122_v25 = vadd.f32 %v9933_v30, %v2037_v31  ;;  %v2097_v30 = vadd.f32 %v2096_v45, %v9842_v44  ;;  %v10137_v43 = vadd.f32 %v9939_v28, %v2055_v40  ;;  %v2115_v28 = vadd.f32 %v7529_v12, %v9849_v36 }
 0x215   : > { %7840 = vmatmul.mubr.f32.gmra.mxu0 %v13125_v20  ;;  %v7652_v42 = vpop.f32.mrf.mxu1  ;;  %v10152_v51 = vadd.f32 %v9947_v54, %v2049_v33  ;;  %v2109_v54 = vadd.f32 %v2108_v29, %v9858_v39  ;;  %v10167_v38 = vadd.f32 %v9953_v26, %v2067_v47  ;;  %v10183_v63 = vadd.f32 %v9961_v0, %v2061_v41  ;;  %v13148_v47 = vld [vmem:[#allocation15_spill] sm:$0xff] }
 0x216   : > { %7842 = vmatprep.mubr.f32.mxu0 %v13128_v22  ;;  %v7532_v20 = vpop.f32.mrf.mxu0  ;;  %v10133_v22 = vadd.f32 %v9997_v58, %v2103_v57  ;;  %v10148_v58 = vadd.f32 %v10007_v24, %v2097_v30  ;;  %v10163_v24 = vadd.f32 %v10015_v13, %v2115_v28 }
 0x217   : > { %v10119_v50 = vpop.f32.mrf.mxu1  ;;  %2493 = vrot.lane.b32.xlu0 %v10116_v17, %s8021_s22  ;;  %v10179_v39 = vadd.f32 %v10027_v62, %v2109_v54  ;;  %v2127_v26 = vadd.f32 %v7532_v20, %v9865_v52  ;;  %v13145_v52 = vld [vmem:[#allocation51_spill] sm:$0xff] }
 0x218   : > { %2477 = vrot.lane.b32.xlu1 %v10122_v25, %s8021_s22  ;;  %v2120_v11 = vpop.f32.mrf.mxu0  ;;  %13141 = vst [vmem:[#allocation24_spill] sm:$0xff] %v10148_v58  ;;  %13142 = vst [vmem:[#allocation26_spill] sm:$0xff] %v10163_v24 }
 0x219   : > { %7843 = vmatmul.mubr.f32.gmra.mxu0 %v13130_v4  ;;  %v7655_v23 = vpop.f32.mrf.mxu1  ;;  %13143 = vst [vmem:[#allocation56_spill] sm:$0xff] %v10179_v39  ;;  %v10194_v62 = vadd.f32 %v10037_v61, %v2127_v26  ;;  %v2121_v8 = vadd.f32 %v2120_v11, %v13145_v52 }
 0x21a   : > { %7845 = vmatprep.mubr.f32.mxu0 %v13131_v46  ;;  %v7535_v4 = vpop.f32.mrf.mxu0 }
 0x21b   : > { %v3159_v59 = vpop.f32.mrf.mxu1  ;;  %2499 = vrot.lane.b32.xlu0 %v10133_v22, %s8021_s22  ;;  %13144 = vst [vmem:[#allocation57_spill] sm:$0xff] %v10194_v62  ;;  %v10202_v57 = vadd.f32 %v10047_v34, %v2121_v8  ;;  %v2139_v40 = vadd.f32 %v7535_v4, %v9881_v60 }
 0x21c   : > { %2483 = vrot.lane.b32.xlu1 %v10137_v43, %s8021_s22  ;;  %v2132_v44 = vpop.f32.mrf.mxu0 }
 0x21d   : > { %7846 = vmatmul.mubr.f32.gmra.mxu0 %v13132_v21  ;;  %v7658_v46 = vpop.f32.mrf.mxu1  ;;  %13146 = vst [vmem:[#allocation31_spill] sm:$0xff] %v10202_v57  ;;  %v10212_v28 = vadd.f32 %v10055_v16, %v2139_v40  ;;  %v2133_v54 = vadd.f32 %v2132_v44, %v13148_v47  ;;  %v13152_v40 = vld [vmem:[#allocation53_spill] sm:$0xff] }
 0x21e   : > { %7848 = vmatprep.mubr.f32.mxu0 %v13134_v15  ;;  %v7538_v21 = vpop.f32.mrf.mxu0 }
 0x21f   : > { %v3171_v2 = vpop.f32.mrf.mxu1  ;;  %2497 = vrot.lane.b32.xlu0 %v10148_v58, %s8021_s22  ;;  %13147 = vst [vmem:[#allocation34_spill] sm:$0xff] %v10212_v28  ;;  %v10222_v26 = vadd.f32 %v10062_v3, %v2133_v54 }
 0x220   : > { %2481 = vrot.lane.b32.xlu1 %v10152_v51, %s8021_s22  ;;  %v2144_v36 = vpop.f32.mrf.mxu0 }
 0x221   : > { %7849 = vmatmul.mubr.f32.gmra.mxu0 %v13135_v48  ;;  %13149 = vst [vmem:[#allocation35_spill] sm:$0xff] %v10222_v26 }
 0x222   : > { %7851 = vmatprep.mubr.f32.mxu0 %v13137_v9  ;;  %v7661_v15 = vpop.f32.mrf.mxu1  ;;  %v7541_v48 = vpop.f32.mrf.mxu0 }
 0x223   : > { %2503 = vrot.lane.b32.xlu0 %v10163_v24, %s8021_s22 }
 0x224   : > { %v3183_v18 = vpop.f32.mrf.mxu1  ;;  %2487 = vrot.lane.b32.xlu1 %v10167_v38, %s8021_s22  ;;  %v10176_v13 = vpop.f32.mrf.mxu0 }
 0x225   : > { %7852 = vmatmul.mubr.f32.gmra.mxu0 %v13138_v56 }
 0x226   : > { %v7664_v9 = vpop.f32.mrf.mxu1  ;;  %v7600_v55 = vpop.f32.mrf.mxu0 }
 0x227   : > { %v10185_v6 = vadd.f32 %v7652_v42, %v7600_v55  ;;  %2501 = vrot.lane.b32.xlu0 %v10179_v39, %s8021_s22  ;;  %v13150_v55 = vld [vmem:[#allocation7_spill] sm:$0xff] }
 0x228   : > { %v3195_v53 = vpop.f32.mrf.mxu1  ;;  %2485 = vrot.lane.b32.xlu1 %v10183_v63, %s8021_s22  ;;  %v10191_v56 = vpop.f32.mrf.mxu0  ;;  %v2151_v52 = vadd.f32 %v7538_v21, %v13150_v55 }
 0x22a   : > { %v7667_v45 = vpop.f32.mrf.mxu1 }
 0x22b   : > { %2507 = vrot.lane.b32.xlu0 %v10194_v62, %s8021_s22 }
 0x22c   : > { %v3207_v31 = vpop.f32.mrf.mxu1 }
 0x22d   : > { %v7603_v0 = vpop.f32.mrf.mxu0 }
 0x22e   : > { %v10197_v12 = vadd.f32 %v7655_v23, %v7603_v0 }
 0x22f   : > { %v7670_v42 = vpop.f32.mrf.mxu1  ;;  %v2776_v29 = vpop.f32.mrf.mxu0  ;;  %2505 = vrot.lane.b32.xlu0 %v10202_v57, %s8021_s22 }
 0x230   : > { %v10205_v20 = vadd.f32 %v3159_v59, %v2776_v29  ;;  %v10232_v29 = vadd.f32 %v10072_v5, %v2151_v52 }
 0x231   : > { %v3219_v61 = vpop.f32.mrf.mxu1  ;;  %v7606_v30 = vpop.f32.mrf.mxu0 }
 0x232   : > { %v10207_v33 = vadd.f32 %v7658_v46, %v7606_v30  ;;  %13151 = vst [vmem:[#allocation38_spill] sm:$0xff] %v10232_v29  ;;  %v2145_v30 = vadd.f32 %v2144_v36, %v13152_v40 }
 0x233   : > { %v7673_v23 = vpop.f32.mrf.mxu1  ;;  %v2796_v11 = vpop.f32.mrf.mxu0  ;;  %2511 = vrot.lane.b32.xlu0 %v10212_v28, %s8021_s22 }
 0x234   : > { %v10215_v34 = vadd.f32 %v3171_v2, %v2796_v11  ;;  %v10242_v54 = vadd.f32 %v10082_v10, %v2145_v30 }
 0x235   : > { %v3231_v41 = vpop.f32.mrf.mxu1  ;;  %v7609_v60 = vpop.f32.mrf.mxu0 }
 0x236   : > { %v10217_v59 = vadd.f32 %v7661_v15, %v7609_v60  ;;  %13153 = vst [vmem:[#allocation27_spill] sm:$0xff] %v10242_v54  ;;  %v13154_v60 = vld [vmem:[#allocation25_spill] sm:$0xff] }
 0x237   : > { %v7676_v4 = vpop.f32.mrf.mxu1  ;;  %v2816_v46 = vpop.f32.mrf.mxu0  ;;  %2509 = vrot.lane.b32.xlu0 %v10222_v26, %s8021_s22 }
 0x238   : > { %v10225_v16 = vadd.f32 %v3183_v18, %v2816_v46  ;;  %v2163_v46 = vadd.f32 %v7541_v48, %v13154_v60 }
 0x239   : > { %v3243_v8 = vpop.f32.mrf.mxu1  ;;  %v7612_v44 = vpop.f32.mrf.mxu0 }
 0x23a   : > { %v10227_v2 = vadd.f32 %v7664_v9, %v7612_v44  ;;  %v10252_v44 = vadd.f32 %v10093_v37, %v2163_v46 }
 0x23b   : > { %v7679_v15 = vpop.f32.mrf.mxu1  ;;  %v2836_v0 = vpop.f32.mrf.mxu0  ;;  %2515 = vrot.lane.b32.xlu0 %v10232_v29, %s8021_s22 }
 0x23c   : > { %v10235_v3 = vadd.f32 %v3195_v53, %v2836_v0  ;;  %13155 = vst [vmem:[#allocation30_spill] sm:$0xff] %v10252_v44  ;;  %v13156_v0 = vld [vmem:[#allocation9_spill] sm:$0xff] }
 0x23d   : > { %v3255_v11 = vpop.f32.mrf.mxu1  ;;  %v7615_v21 = vpop.f32.mrf.mxu0  ;;  %v2157_v10 = vadd.f32 %v10176_v13, %v13156_v0 }
 0x23e   : > { %v10237_v18 = vadd.f32 %v7667_v45, %v7615_v21 }
 0x23f   : > { %v7682_v9 = vpop.f32.mrf.mxu1  ;;  %v2856_v47 = vpop.f32.mrf.mxu0  ;;  %2513 = vrot.lane.b32.xlu0 %v10242_v54, %s8021_s22 }
 0x240   : > { %v10245_v5 = vadd.f32 %v3207_v31, %v2856_v47  ;;  %v10263_v47 = vadd.f32 %v10102_v19, %v2157_v10 }
 0x241   : > { %v3267_v55 = vpop.f32.mrf.mxu1  ;;  %v7618_v36 = vpop.f32.mrf.mxu0 }
 0x242   : > { %v10247_v53 = vadd.f32 %v7670_v42, %v7618_v36  ;;  %13157 = vst [vmem:[#allocation39_spill] sm:$0xff] %v10263_v47 }
 0x243   : > { %v7685_v45 = vpop.f32.mrf.mxu1  ;;  %v2876_v52 = vpop.f32.mrf.mxu0  ;;  %2519 = vrot.lane.b32.xlu0 %v10252_v44, %s8021_s22 }
 0x244   : > { %v10256_v40 = vadd.f32 %v3219_v61, %v2876_v52 }
 0x245   : > { %v3279_v48 = vpop.f32.mrf.mxu1  ;;  %v7621_v31 = vpop.f32.mrf.mxu0 }
 0x246   : > { %v10258_v30 = vadd.f32 %v7673_v23, %v7621_v31 }
 0x247   : > { %v7688_v42 = vpop.f32.mrf.mxu1  ;;  %v2896_v21 = vpop.f32.mrf.mxu0  ;;  %2517 = vrot.lane.b32.xlu0 %v10263_v47, %s8021_s22  ;;  %s12316_s22 = scalar_lea.vmem %s12457_s8, %s6626_s13 }
 0x248   : > { %v10265_v60 = vadd.f32 %v3231_v41, %v2896_v21 }
 0x249   : > { %v3291_v37 = vpop.f32.mrf.mxu1  ;;  %v7624_v46 = vpop.f32.mrf.mxu0 }
 0x24a   : > { %v10267_v36 = vadd.f32 %v7676_v4, %v7624_v46 }
 0x24b   : > { %v7691_v13 = vpop.f32.mrf.mxu1  ;;  %v2916_v61 = vpop.f32.mrf.mxu0 }
 0x24c   : > { %v10271_v23 = vadd.f32 %v3243_v8, %v2916_v61 }
 0x24d   : > { %v3303_v52 = vpop.f32.mrf.mxu1  ;;  %v7627_v0 = vpop.f32.mrf.mxu0 }
 0x24e   : > { %v10273_v31 = vadd.f32 %v7679_v15, %v7627_v0 }
 0x24f   : > { %v7694_v14 = vpop.f32.mrf.mxu1  ;;  %v2936_v19 = vpop.f32.mrf.mxu0 }
 0x250   : > { %v10275_v10 = vadd.f32 %v3255_v11, %v2936_v19 }
 0x251   : > { %v3315_v41 = vpop.f32.mrf.mxu1  ;;  %v7630_v21 = vpop.f32.mrf.mxu0 }
 0x252   : > { %v10277_v1 = vadd.f32 %v7682_v9, %v7630_v21 }
 0x253   : > { %v7697_v4 = vpop.f32.mrf.mxu1  ;;  %v2956_v46 = vpop.f32.mrf.mxu0 }
 0x254   : > { %v10279_v17 = vadd.f32 %v3267_v55, %v2956_v46 }
 0x255   : > { %v3327_v27 = vpop.f32.mrf.mxu1  ;;  %v7633_v47 = vpop.f32.mrf.mxu0 }
 0x256   : > { %v10281_v8 = vadd.f32 %v7685_v45, %v7633_v47 }
 0x257   : > { %v7756_v61 = vpop.f32.mrf.mxu1  ;;  %v2976_v54 = vpop.f32.mrf.mxu0 }
 0x258   : > { %v10283_v15 = vadd.f32 %v3279_v48, %v2976_v54 }
 0x259   : > { %v3701_v0 = vpop.f32.mrf.mxu1  ;;  %v7636_v29 = vpop.f32.mrf.mxu0 }
 0x25a   : > { %v10285_v11 = vadd.f32 %v7688_v42, %v7636_v29 }
 0x25b   : > { %v7759_v19 = vpop.f32.mrf.mxu1  ;;  %v2996_v26 = vpop.f32.mrf.mxu0 }
 0x25c   : > { %v10287_v9 = vadd.f32 %v3291_v37, %v2996_v26 }
 0x25d   : > { %v3717_v21 = vpop.f32.mrf.mxu1  ;;  %v7639_v44 = vpop.f32.mrf.mxu0 }
 0x25e   : > { %v10289_v55 = vadd.f32 %v7691_v13, %v7639_v44  ;;  %v10293_v47 = vpop.permute.xlu1 %2459 }
 0x25f   : > { %v7762_v46 = vpop.f32.mrf.mxu1  ;;  %v3016_v28 = vpop.f32.mrf.mxu0  ;;  %13158 = vst [vmem:[#allocation42_spill] sm:$0xff] %v10293_v47 }
 0x260   : > { %v10291_v45 = vadd.f32 %v3303_v52, %v3016_v28 }
 0x261   : > { %v3733_v54 = vpop.f32.mrf.mxu1  ;;  %v7642_v48 = vpop.f32.mrf.mxu0 }
 0x262   : > { %v10295_v57 = vadd.f32 %v7694_v14, %v7642_v48  ;;  %v10299_v26 = vpop.permute.xlu1 %2457  ;;  %v3148_v14 = vadd.f32 %v10119_v50, %v10191_v56 }
 0x263   : > { %v7765_v29 = vpop.f32.mrf.mxu1  ;;  %v3036_v42 = vpop.f32.mrf.mxu0  ;;  %13160 = vst [vmem:[#allocation55_spill] sm:$0xff] %v10299_v26 }
 0x264   : > { %v10297_v62 = vadd.f32 %v3315_v41, %v3036_v42 }
 0x265   : > { %v3749_v37 = vpop.f32.mrf.mxu1  ;;  %v7645_v39 = vpop.f32.mrf.mxu0 }
 0x266   : > { %13159 = vst [vmem:[#allocation54_spill] sm:$0xff] %v10297_v62  ;;  %v10301_v44 = vadd.f32 %v7697_v4, %v7645_v39  ;;  %v10305_v52 = vpop.permute.xlu1 %2463 }
 0x267   : > { %v7768_v13 = vpop.f32.mrf.mxu1  ;;  %v3056_v24 = vpop.f32.mrf.mxu0  ;;  %13162 = vst [vmem:[#allocation5_spill] sm:$0xff] %v10305_v52 }
 0x268   : > { %13161 = vst [vmem:[#allocation47_spill] sm:$0xff] %v10301_v44  ;;  %v10303_v28 = vadd.f32 %v3327_v27, %v3056_v24 }
 0x269   : > { %v3765_v47 = vpop.f32.mrf.mxu1  ;;  %v7704_v58 = vpop.f32.mrf.mxu0 }
 0x26a   : > { %v3417_v41 = vadd.f32 %v7704_v58, %v10185_v6  ;;  %v10312_v62 = vpop.permute.xlu1 %2461 }
 0x26b   : > { %v10310_v48 = vpop.f32.mrf.mxu1  ;;  %v3409_v42 = vpop.f32.mrf.mxu0  ;;  %13163 = vst [vmem:[#allocation48_spill] sm:$0xff] %v10312_v62 }
 0x26c   : > { %v3410_v26 = vadd.f32 %v3409_v42, %v3148_v14  ;;  %v10316_v4 = vadd.f32 %v7756_v61, %v3417_v41  ;;  %v13164_v42 = vld [vmem:[#allocation29_spill] sm:$0xff] }
 0x26d   : > { %v10314_v39 = vpop.f32.mrf.mxu1  ;;  %v7707_v27 = vpop.f32.mrf.mxu0 }
 0x26e   : > { %v3431_v24 = vadd.f32 %v7707_v27, %v10197_v12  ;;  %v10321_v44 = vadd.f32 %v3701_v0, %v3410_v26  ;;  %v2468_v6 = vpop.permute.xlu1 %2467 }
 0x26f   : > { %v10319_v52 = vpop.f32.mrf.mxu1  ;;  %v3423_v50 = vpop.f32.mrf.mxu0  ;;  %v10329_v62 = vmax.f32 %v13164_v42, %v2468_v6  ;;  %v13167_v6 = vld [vmem:[#allocation32_spill] sm:$0xff] }
 0x270   : > { %v3424_v58 = vadd.f32 %v3423_v50, %v10205_v20  ;;  %v10326_v14 = vadd.f32 %v7759_v19, %v3431_v24 }
 0x271   : > { %v10324_v56 = vpop.f32.mrf.mxu1  ;;  %13165 = vst [vmem:[#allocation4_spill] sm:$0xff] %v10329_v62  ;;  %v7710_v61 = vpop.f32.mrf.mxu0  ;;  %v4652_v20 = vsel %vm4636_vm1, %v10329_v62, 0.0 }
 0x272   : > { %v3445_v41 = vadd.f32 %v7710_v61, %v10207_v33  ;;  %v10334_v27 = vadd.f32 %v3717_v21, %v3424_v58  ;;  %4653 = vadd.xlane.f32.xlu1 %v4652_v20  ;;  %v2466_v19 = vpop.permute.xlu1 %2465 }
 0x273   : > { %v10332_v12 = vpop.f32.mrf.mxu1  ;;  %v3437_v0 = vpop.f32.mrf.mxu0  ;;  %v10344_v42 = vmax.f32 %v13167_v6, %v2466_v19  ;;  %v13169_v19 = vld [vmem:[#allocation46_spill] sm:$0xff] }
 0x274   : > { %13166 = vst [vmem:[#allocation52_spill] sm:$0xff] %v10334_v27  ;;  %v3438_v26 = vadd.f32 %v3437_v0, %v10215_v34  ;;  %v10341_v50 = vadd.f32 %v7762_v46, %v3445_v41 }
 0x275   : > { %v10339_v24 = vpop.f32.mrf.mxu1  ;;  %13168 = vst [vmem:[#allocation6_spill] sm:$0xff] %v10344_v42  ;;  %v7713_v33 = vpop.f32.mrf.mxu0  ;;  %v4649_v34 = vsel %vm4636_vm1, %v10344_v42, 0.0 }
 0x276   : > { %v3459_v61 = vadd.f32 %v7713_v33, %v10217_v59  ;;  %v10349_v58 = vadd.f32 %v3733_v54, %v3438_v26  ;;  %4650 = vadd.xlane.f32.xlu1 %v4649_v34  ;;  %v2472_v20 = vpop.permute.xlu1 %2471 }
 0x277   : > { %v10347_v21 = vpop.f32.mrf.mxu1  ;;  %v3451_v27 = vpop.f32.mrf.mxu0  ;;  %v10359_v6 = vmax.f32 %v13169_v19, %v2472_v20 }
 0x278   : > { %v3452_v0 = vadd.f32 %v3451_v27, %v10225_v16  ;;  %v10356_v41 = vadd.f32 %v7765_v29, %v3459_v61 }
 0x279   : > { %v10354_v46 = vpop.f32.mrf.mxu1  ;;  %13170 = vst [vmem:[#allocation8_spill] sm:$0xff] %v10359_v6  ;;  %v7716_v59 = vpop.f32.mrf.mxu0  ;;  %v4658_v16 = vsel %vm4636_vm1, %v10359_v6, 0.0 }
 0x27a   : > { %v3473_v33 = vadd.f32 %v7716_v59, %v10227_v2  ;;  %v10364_v26 = vadd.f32 %v3749_v37, %v3452_v0  ;;  %4659 = vadd.xlane.f32.xlu1 %v4658_v16  ;;  %v2470_v34 = vpop.permute.xlu1 %2469 }
 0x27b   : > { %v10362_v54 = vpop.f32.mrf.mxu1  ;;  %v3465_v62 = vpop.f32.mrf.mxu0  ;;  %v10374_v20 = vmax.f32 %v10043_v32, %v2470_v34 }
 0x27c   : > { %v3466_v27 = vadd.f32 %v3465_v62, %v10235_v3  ;;  %v10371_v61 = vadd.f32 %v7768_v13, %v3473_v33 }
 0x27d   : > { %v10369_v29 = vpop.f32.mrf.mxu1  ;;  %13171 = vst [vmem:[#allocation11_spill] sm:$0xff] %v10374_v20  ;;  %v7719_v2 = vpop.f32.mrf.mxu0  ;;  %v4655_v62 = vsel %vm4636_vm1, %v10374_v20, 0.0 }
 0x27e   : > { %v3487_v19 = vadd.f32 %v7719_v2, %v10237_v18  ;;  %v10379_v0 = vadd.f32 %v3765_v47, %v3466_v27  ;;  %v10384_v16 = vpop.permute.xlu0 %2491  ;;  %4656 = vadd.xlane.f32.xlu1 %v4655_v62  ;;  %v2476_v33 = vpop.permute.xlu1 %2475 }
 0x27f   : > { %v10377_v37 = vpop.f32.mrf.mxu1  ;;  %v3479_v59 = vpop.f32.mrf.mxu0  ;;  %13172 = vst [vmem:[#allocation12_spill] sm:$0xff] %v10384_v16  ;;  %v10392_v34 = vmax.f32 %v10065_v7, %v2476_v33 }
 0x280   : > { %v3480_v3 = vadd.f32 %v3479_v59, %v10245_v5  ;;  %v10389_v32 = vadd.f32 %v10310_v48, %v3487_v19 }
 0x281   : > { %v10386_v13 = vpop.f32.mrf.mxu1  ;;  %v7722_v18 = vpop.f32.mrf.mxu0  ;;  %v4664_v48 = vsel %vm4636_vm1, %v10392_v34, 0.0 }
 0x282   : > { %v3501_v47 = vadd.f32 %v7722_v18, %v10247_v53  ;;  %v10398_v2 = vadd.f32 %v10314_v39, %v3480_v3  ;;  %v10401_v62 = vpop.permute.xlu0 %2489  ;;  %4665 = vadd.xlane.f32.xlu1 %v4664_v48  ;;  %v2474_v53 = vpop.permute.xlu1 %2473 }
 0x283   : > { %v10395_v27 = vpop.f32.mrf.mxu1  ;;  %v3493_v5 = vpop.f32.mrf.mxu0  ;;  %13173 = vst [vmem:[#allocation14_spill] sm:$0xff] %v10401_v62  ;;  %v10411_v18 = vmax.f32 %v10085_v49, %v2474_v53 }
 0x284   : > { %v3494_v59 = vadd.f32 %v3493_v5, %v10256_v40  ;;  %v10408_v7 = vadd.f32 %v10319_v52, %v3501_v47 }
 0x285   : > { %v10405_v19 = vpop.f32.mrf.mxu1  ;;  %v7725_v33 = vpop.f32.mrf.mxu0  ;;  %v4661_v52 = vsel %vm4636_vm1, %v10411_v18, 0.0 }
 0x286   : > { %v3515_v39 = vadd.f32 %v7725_v33, %v10258_v30  ;;  %v10417_v40 = vadd.f32 %v10324_v56, %v3494_v59  ;;  %v10420_v6 = vpop.permute.xlu0 %2495  ;;  %4662 = vadd.xlane.f32.xlu1 %v4661_v52  ;;  %v2480_v30 = vpop.permute.xlu1 %2479 }
 0x287   : > { %v10414_v3 = vpop.f32.mrf.mxu1  ;;  %v3507_v5 = vpop.f32.mrf.mxu0  ;;  %13174 = vst [vmem:[#allocation18_spill] sm:$0xff] %v10420_v6  ;;  %v10430_v53 = vmax.f32 %v10105_v35, %v2480_v30 }
 0x288   : > { %v3508_v20 = vadd.f32 %v3507_v5, %v10265_v60  ;;  %v10427_v49 = vadd.f32 %v10332_v12, %v3515_v39 }
 0x289   : > { %v10424_v47 = vpop.f32.mrf.mxu1  ;;  %v7728_v48 = vpop.f32.mrf.mxu0  ;;  %v4670_v12 = vsel %vm4636_vm1, %v10430_v53, 0.0 }
 0x28a   : > { %v3529_v56 = vadd.f32 %v7728_v48, %v10267_v36  ;;  %v10436_v60 = vadd.f32 %v10339_v24, %v3508_v20  ;;  %v10439_v42 = vpop.permute.xlu0 %2493  ;;  %4671 = vadd.xlane.f32.xlu1 %v4670_v12  ;;  %v2478_v36 = vpop.permute.xlu1 %2477 }
 0x28b   : > { %v10433_v59 = vpop.f32.mrf.mxu1  ;;  %v3521_v33 = vpop.f32.mrf.mxu0  ;;  %13175 = vst [vmem:[#allocation20_spill] sm:$0xff] %v10439_v42  ;;  %v10449_v30 = vmax.f32 %v10122_v25, %v2478_v36 }
 0x28c   : > { %v3522_v5 = vadd.f32 %v3521_v33, %v10271_v23  ;;  %v10446_v35 = vadd.f32 %v10347_v21, %v3529_v56 }
 0x28d   : > { %v10443_v39 = vpop.f32.mrf.mxu1  ;;  %v7731_v52 = vpop.f32.mrf.mxu0  ;;  %v4667_v21 = vsel %vm4636_vm1, %v10449_v30, 0.0 }
 0x28e   : > { %v3543_v24 = vadd.f32 %v7731_v52, %v10273_v31  ;;  %v10455_v23 = vadd.f32 %v10354_v46, %v3522_v5  ;;  %v2500_v62 = vpop.permute.xlu0 %2499  ;;  %4668 = vadd.xlane.f32.xlu1 %v4667_v21  ;;  %v2484_v25 = vpop.permute.xlu1 %2483 }
 0x28f   : > { %v10452_v20 = vpop.f32.mrf.mxu1  ;;  %v3535_v48 = vpop.f32.mrf.mxu0  ;;  %v10466_v36 = vmax.f32 %v10137_v43, %v2484_v25 }
 0x290   : > { %v3536_v33 = vadd.f32 %v3535_v48, %v10275_v10  ;;  %v10463_v12 = vadd.f32 %v10362_v54, %v3543_v24 }
 0x291   : > { %v10460_v56 = vpop.f32.mrf.mxu1  ;;  %v7734_v31 = vpop.f32.mrf.mxu0  ;;  %v4676_v54 = vsel %vm4636_vm1, %v10466_v36, 0.0 }
 0x292   : > { %v3557_v46 = vadd.f32 %v7734_v31, %v10277_v1  ;;  %v10472_v10 = vadd.f32 %v10369_v29, %v3536_v33  ;;  %v2498_v16 = vpop.permute.xlu0 %2497  ;;  %4677 = vadd.xlane.f32.xlu1 %v4676_v54  ;;  %v2482_v43 = vpop.permute.xlu1 %2481 }
 0x293   : > { %v10469_v5 = vpop.f32.mrf.mxu1  ;;  %v3549_v52 = vpop.f32.mrf.mxu0  ;;  %v10483_v25 = vmax.f32 %v10152_v51, %v2482_v43 }
 0x294   : > { %v3550_v48 = vadd.f32 %v3549_v52, %v10279_v17  ;;  %v10480_v21 = vadd.f32 %v10377_v37, %v3557_v46 }
 0x295   : > { %v10477_v24 = vpop.f32.mrf.mxu1  ;;  %v7737_v1 = vpop.f32.mrf.mxu0  ;;  %v4673_v37 = vsel %vm4636_vm1, %v10483_v25, 0.0 }
 0x296   : > { %v3571_v29 = vadd.f32 %v7737_v1, %v10281_v8  ;;  %v10489_v17 = vadd.f32 %v10386_v13, %v3550_v48  ;;  %v2504_v42 = vpop.permute.xlu0 %2503  ;;  %4674 = vadd.xlane.f32.xlu1 %v4673_v37  ;;  %v2488_v51 = vpop.permute.xlu1 %2487 }
 0x297   : > { %v10486_v33 = vpop.f32.mrf.mxu1  ;;  %v3563_v31 = vpop.f32.mrf.mxu0  ;;  %v10500_v43 = vmax.f32 %v10167_v38, %v2488_v51 }
 0x298   : > { %13176 = vst [vmem:[#allocation23_spill] sm:$0xff] %v10489_v17  ;;  %v3564_v52 = vadd.f32 %v3563_v31, %v10283_v15  ;;  %v10497_v54 = vadd.f32 %v10395_v27, %v3571_v29 }
 0x299   : > { %v10494_v46 = vpop.f32.mrf.mxu1  ;;  %v7740_v8 = vpop.f32.mrf.mxu0  ;;  %v4682_v27 = vsel %vm4636_vm1, %v10500_v43, 0.0 }
 0x29a   : > { %13177 = vst [vmem:[#allocation37_spill] sm:$0xff] %v10497_v54  ;;  %v3585_v13 = vadd.f32 %v7740_v8, %v10285_v11  ;;  %v10506_v15 = vadd.f32 %v10405_v19, %v3564_v52  ;;  %v2502_v6 = vpop.permute.xlu0 %2501  ;;  %v2486_v38 = vpop.permute.xlu1 %2485  ;;  %4683 = vadd.xlane.f32.xlu0 %v4682_v27 }
 0x29b   : > { %v10503_v48 = vpop.f32.mrf.mxu1  ;;  %v3577_v1 = vpop.f32.mrf.mxu0  ;;  %v10517_v51 = vmax.f32 %v10183_v63, %v2486_v38 }
 0x29c   : > { %13178 = vst [vmem:[#allocation28_spill] sm:$0xff] %v10506_v15  ;;  %v3578_v31 = vadd.f32 %v3577_v1, %v10287_v9  ;;  %v10514_v37 = vadd.f32 %v10414_v3, %v3585_v13  ;;  %v10526_v1 = vmax.f32 %v10133_v22, %v2500_v62 }
 0x29d   : > { %v10511_v29 = vpop.f32.mrf.mxu1  ;;  %v7743_v11 = vpop.f32.mrf.mxu0  ;;  %v4679_v27 = vsel %vm4636_vm1, %v10517_v51, 0.0 }
 0x29e   : > { %13179 = vst [vmem:[#allocation40_spill] sm:$0xff] %v10514_v37  ;;  %v3599_v19 = vadd.f32 %v7743_v11, %v10289_v55  ;;  %v10523_v9 = vadd.f32 %v10424_v47, %v3578_v31  ;;  %13180 = vst [vmem:[#allocation33_spill] sm:$0xff] %v10526_v1  ;;  %v2508_v13 = vpop.permute.xlu0 %2507  ;;  %4680 = vadd.xlane.f32.xlu1 %v4679_v27  ;;  %v13183_v11 = vld [vmem:[#allocation54_spill] sm:$0xff] }
 0x29f   : > { %v10520_v52 = vpop.f32.mrf.mxu1  ;;  %v3591_v8 = vpop.f32.mrf.mxu0 }
 0x2a0   : > { %v3592_v3 = vadd.f32 %v3591_v8, %v10291_v45  ;;  %v10534_v63 = vadd.f32 %v10433_v59, %v3599_v19  ;;  %v13181_v45 = vld [vmem:[#allocation24_spill] sm:$0xff]  ;;  %v4700_v59 = vsel %vm4636_vm1, %v10526_v1, 0.0 }
 0x2a1   : > { %v10531_v37 = vpop.f32.mrf.mxu1  ;;  %v7746_v55 = vpop.f32.mrf.mxu0  ;;  %v10543_v38 = vmax.f32 %v13181_v45, %v2498_v16 }
 0x2a2   : > { %v3613_v47 = vadd.f32 %v7746_v55, %v10295_v57  ;;  %v10540_v22 = vadd.f32 %v10443_v39, %v3592_v3  ;;  %v2506_v15 = vpop.permute.xlu0 %2505  ;;  %4701 = vadd.xlane.f32.xlu1 %v4700_v59  ;;  %v13185_v55 = vld [vmem:[#allocation26_spill] sm:$0xff] }
 0x2a3   : > { %v10537_v31 = vpop.f32.mrf.mxu1  ;;  %v3605_v62 = vpop.f32.mrf.mxu0  ;;  %13182 = vst [vmem:[#allocation36_spill] sm:$0xff] %v10543_v38  ;;  %v4697_v1 = vsel %vm4636_vm1, %v10543_v38, 0.0 }
 0x2a4   : > { %v3606_v8 = vadd.f32 %v3605_v62, %v13183_v11  ;;  %v10551_v27 = vadd.f32 %v10452_v20, %v3613_v47  ;;  %v10561_v62 = vmax.f32 %v13185_v55, %v2504_v42  ;;  %v13188_v42 = vld [vmem:[#allocation56_spill] sm:$0xff] }
 0x2a5   : > { %v10548_v19 = vpop.f32.mrf.mxu1  ;;  %v10553_v57 = vpop.f32.mrf.mxu0  ;;  %v10575_v55 = vmax.f32 %v13188_v42, %v2502_v6 }
 0x2a6   : > { %v10558_v3 = vadd.f32 %v10460_v56, %v3606_v8  ;;  %13186 = vst [vmem:[#allocation44_spill] sm:$0xff] %v10561_v62  ;;  %v2512_v11 = vpop.permute.xlu0 %2511  ;;  %4698 = vadd.xlane.f32.xlu1 %v4697_v1  ;;  %v4706_v1 = vsel %vm4636_vm1, %v10561_v62, 0.0 }
 0x2a7   : > { %v10555_v39 = vpop.f32.mrf.mxu1  ;;  %v3619_v16 = vpop.f32.mrf.mxu0  ;;  %13189 = vst [vmem:[#allocation45_spill] sm:$0xff] %v10575_v55 }
 0x2a8   : > { %13184 = vst [vmem:[#allocation41_spill] sm:$0xff] %v10558_v3  ;;  %v3620_v45 = vadd.f32 %v3619_v16, %v10303_v28 }
 0x2a9   : > { %v10566_v20 = vpop.f32.mrf.mxu1  ;;  %v7808_v47 = vpop.f32.mrf.mxu0 }
 0x2aa   : > { %v4033_v59 = vadd.f32 %v7808_v47, %v10316_v4  ;;  %v10572_v56 = vadd.f32 %v10477_v24, %v3620_v45  ;;  %v2510_v38 = vpop.permute.xlu0 %2509  ;;  %4707 = vadd.xlane.f32.xlu1 %v4706_v1  ;;  %v4703_v1 = vsel %vm4636_vm1, %v10575_v55, 0.0  ;;  %v13198_v55 = vld [vmem:[#allocation34_spill] sm:$0xff] }
 0x2ab   : > { %v10569_v54 = vpop.f32.mrf.mxu1  ;;  %v4026_v8 = vpop.f32.mrf.mxu0 }
 0x2ac   : > { %13187 = vst [vmem:[#allocation43_spill] sm:$0xff] %v10572_v56  ;;  %v10578_v28 = vadd.f32 %v10486_v33, %v4033_v59  ;;  %v4027_v16 = vadd.f32 %v4026_v8, %v10321_v44  ;;  %v13192_v33 = vld [vmem:[#allocation57_spill] sm:$0xff]  ;;  %v13195_v8 = vld [vmem:[#allocation52_spill] sm:$0xff]  ;;  %v13200_v56 = vld [vmem:[#allocation35_spill] sm:$0xff] }
 0x2ad   : > { %v10583_v3 = vpop.f32.mrf.mxu1  ;;  %v7811_v4 = vpop.f32.mrf.mxu0  ;;  %v10592_v59 = vmax.f32 %v13192_v33, %v2508_v13  ;;  %v13197_v13 = vld [vmem:[#allocation31_spill] sm:$0xff]  ;;  %v10634_v17 = vmax.f32 %v13200_v56, %v2510_v38 }
 0x2ae   : > { %13190 = vst [vmem:[#allocation50_spill] sm:$0xff] %v10578_v28  ;;  %v10586_v24 = vadd.f32 %v10494_v46, %v4027_v16  ;;  %v4045_v45 = vadd.f32 %v7811_v4, %v10326_v14  ;;  %v2516_v62 = vpop.permute.xlu0 %2515  ;;  %4704 = vadd.xlane.f32.xlu1 %v4703_v1  ;;  %v10608_v33 = vmax.f32 %v13197_v13, %v2506_v15 }
 0x2af   : > { %v4038_v6 = vpop.f32.mrf.mxu0  ;;  %v10589_v47 = vpop.f32.mrf.mxu1  ;;  %13193 = vst [vmem:[#allocation15_spill] sm:$0xff] %v10592_v59  ;;  %v10616_v28 = vmax.f32 %v13198_v55, %v2512_v11 }
 0x2b0   : > { %13191 = vst [vmem:[#allocation51_spill] sm:$0xff] %v10586_v24  ;;  %v10595_v44 = vadd.f32 %v10503_v48, %v4045_v45  ;;  %v4039_v42 = vadd.f32 %v4038_v6, %v13195_v8  ;;  %v4712_v45 = vsel %vm4636_vm1, %v10592_v59, 0.0  ;;  %v4709_v59 = vsel %vm4636_vm1, %v10608_v33, 0.0 }
 0x2b1   : > { %v7814_v46 = vpop.f32.mrf.mxu0  ;;  %v10600_v16 = vpop.f32.mrf.mxu1 }
 0x2b2   : > { %13194 = vst [vmem:[#allocation7_spill] sm:$0xff] %v10595_v44  ;;  %v10603_v14 = vadd.f32 %v10511_v29, %v4039_v42  ;;  %v2514_v48 = vpop.permute.xlu0 %2513  ;;  %v4057_v6 = vadd.f32 %v7814_v46, %v10341_v50  ;;  %4713 = vadd.xlane.f32.xlu1 %v4712_v45  ;;  %v13199_v46 = vld [vmem:[#allocation30_spill] sm:$0xff] }
 0x2b3   : > { %v4050_v4 = vpop.f32.mrf.mxu0  ;;  %v10605_v24 = vpop.f32.mrf.mxu1 }
 0x2b4   : > { %13196 = vst [vmem:[#allocation53_spill] sm:$0xff] %v10603_v14  ;;  %v4051_v15 = vadd.f32 %v4050_v4, %v10349_v58  ;;  %v4316_v50 = vadd.f32 %v10520_v52, %v4057_v6  ;;  %v4718_v52 = vsel %vm4636_vm1, %v10616_v28, 0.0 }
 0x2b5   : > { %v7817_v8 = vpop.f32.mrf.mxu0  ;;  %v10613_v1 = vpop.f32.mrf.mxu1 }
 0x2b6   : > { %v2520_v13 = vpop.permute.xlu0 %2519  ;;  %4710 = vadd.xlane.f32.xlu1 %v4709_v59  ;;  %v4069_v55 = vadd.f32 %v7817_v8, %v10356_v41  ;;  %v13201_v59 = vld [vmem:[#allocation38_spill] sm:$0xff]  ;;  %v10647_v38 = vmul.f32 0.25, %v4316_v50  ;;  %v13203_v8 = vld [vmem:[#allocation27_spill] sm:$0xff] }
 0x2b7   : > { %v4062_v29 = vpop.f32.mrf.mxu0  ;;  %v10620_v42 = vpop.f32.mrf.mxu1  ;;  %v10627_v45 = vmax.f32 %v13199_v46, %v2520_v13  ;;  %v10642_v13 = vmax.f32 %v13201_v59, %v2516_v62  ;;  %v4310_v46 = vadd.f32 %v10531_v37, %v4051_v15 }
 0x2b8   : > { %v4063_v58 = vadd.f32 %v4062_v29, %v10364_v26  ;;  %13202 = vst [vmem:[#allocation25_spill] sm:$0xff] %v10647_v38  ;;  %v10654_v29 = vmax.f32 %v13203_v8, %v2514_v48  ;;  %v4328_v62 = vadd.f32 %v10537_v31, %v4069_v55  ;;  %v4715_v31 = vsel %vm4636_vm1, %v10634_v17, 0.0 }
 0x2b9   : > { %v7820_v14 = vpop.f32.mrf.mxu0  ;;  %v10629_v11 = vpop.f32.mrf.mxu1  ;;  %v4730_v26 = vsel %vm4636_vm1, %v10627_v45, 0.0 }
 0x2ba   : > { %v4081_v44 = vadd.f32 %v7820_v14, %v10371_v61  ;;  %4719 = vadd.xlane.f32.xlu1 %v4718_v52  ;;  %4731 = vadd.xlane.f32.xlu0 %v4730_v26  ;;  %v2518_v8 = vpop.permute.xlu0 %2517 }
 0x2bb   : > { %v4074_v4 = vpop.f32.mrf.mxu0  ;;  %v10639_v6 = vpop.f32.mrf.mxu1 }
 0x2bc   : > { %v4340_v41 = vadd.f32 %v10555_v39, %v4081_v44  ;;  %v4075_v61 = vadd.f32 %v4074_v4, %v10379_v0  ;;  %v10661_v0 = vstv %s10618_s23  ;;  %v4322_v39 = vadd.f32 %v10548_v19, %v4063_v58 }
 0x2bd   : > { %v7823_v56 = vpop.f32.mrf.mxu0  ;;  %v10651_v14 = vpop.f32.mrf.mxu1  ;;  %13205 = vst [vmem:[#allocation29_spill] sm:$0xff] %v10661_v0  ;;  %v10667_v4 = vmul.f32 0.25, %v4310_v46  ;;  %v4748_v58 = vsel %vm4636_vm1, %v10647_v38, 0.0 }
 0x2be   : > { %v10657_v59 = vmul.f32 0.25, %v4340_v41  ;;  %v4334_v37 = vadd.f32 %v10566_v20, %v4075_v61  ;;  %v4093_v44 = vadd.f32 %v7823_v56, %v10389_v32  ;;  %v4724_v20 = vsel %vm4636_vm1, %v10642_v13, 0.0  ;;  %4716 = vadd.xlane.f32.xlu1 %v4715_v31  ;;  %4749 = vadd.xlane.f32.xlu0 %v4748_v58 }
 0x2bf   : > { %v4086_v15 = vpop.f32.mrf.mxu0  ;;  %v10665_v50 = vpop.f32.mrf.mxu1  ;;  %13206 = vst [vmem:[#allocation32_spill] sm:$0xff] %v10667_v4  ;;  %v10683_v41 = vmul.f32 0.25, %v4328_v62  ;;  %v10691_v56 = vmul.f32 0.25, %v4322_v39 }
 0x2c0   : > { %13204 = vst [vmem:[#allocation9_spill] sm:$0xff] %v10657_v59  ;;  %v4516_v48 = vsub.f32 %v10657_v59, %v10392_v34  ;;  %v10675_v55 = vmul.f32 0.25, %v4334_v37  ;;  %v4352_v19 = vadd.f32 %v10569_v54, %v4093_v44  ;;  %v4087_v32 = vadd.f32 %v4086_v15, %v10398_v2 }
 0x2c1   : > { %v7826_v52 = vpop.f32.mrf.mxu0  ;;  %v10681_v46 = vpop.f32.mrf.mxu1  ;;  %13208 = vst [vmem:[#allocation24_spill] sm:$0xff] %v10683_v41  ;;  %v4721_v54 = vsel %vm4636_vm1, %v10654_v29, 0.0  ;;  %13210 = vst [vmem:[#allocation26_spill] sm:$0xff] %v10691_v56 }
 0x2c2   : > { %13207 = vst [vmem:[#allocation46_spill] sm:$0xff] %v10675_v55  ;;  %v10686_v61 = vmul.f32 %v10661_v0, %v4516_v48  ;;  %v4105_v26 = vadd.f32 %v7826_v52, %v10408_v7  ;;  %v4515_v2 = vsub.f32 %v10675_v55, %v10411_v18  ;;  %v10695_v37 = vmul.f32 0.25, %v4352_v19  ;;  %4725 = vadd.xlane.f32.xlu1 %v4724_v20  ;;  %v13215_v52 = vld [vmem:[#allocation39_spill] sm:$0xff] }
 0x2c3   : > { %v4346_v62 = vadd.f32 %v10583_v3, %v4087_v32  ;;  %v4098_v44 = vpop.f32.mrf.mxu0  ;;  %v10715_v32 = vpop.f32.mrf.mxu1  ;;  %v10718_v7 = vmax.f32 %v13215_v52, %v2518_v8 }
 0x2c4   : > { %13209 = vst [vmem:[#allocation54_spill] sm:$0xff] %v10686_v61  ;;  %13211 = vst [vmem:[#allocation56_spill] sm:$0xff] %v10695_v37  ;;  %v10700_v15 = vadd.f32 %v10686_v61, %v10392_v34  ;;  %v4364_v48 = vadd.f32 %v10589_v47, %v4105_v26  ;;  %v4099_v39 = vadd.f32 %v4098_v44, %v10417_v40  ;;  %v4745_v34 = vsel %vm4636_vm1, %v10667_v4, 0.0 }
 0x2c5   : > { %v10707_v31 = vmul.f32 %v10661_v0, %v4515_v2  ;;  %v4518_v19 = vsub.f32 %v10695_v37, %v10430_v53  ;;  %v10711_v58 = vmul.f32 0.25, %v4346_v62  ;;  %v7829_v3 = vpop.f32.mrf.mxu0  ;;  %4746 = vadd.xlane.f32.xlu0 %v4745_v34 }
 0x2c6   : > { %13212 = vst [vmem:[#allocation57_spill] sm:$0xff] %v10700_v15  ;;  %v10720_v47 = vmul.f32 0.25, %v4364_v48  ;;  %v4358_v40 = vadd.f32 %v10600_v16, %v4099_v39  ;;  %v4117_v26 = vadd.f32 %v7829_v3, %v10427_v49  ;;  %4722 = vadd.xlane.f32.xlu1 %v4721_v54  ;;  %v4754_v3 = vsel %vm4636_vm1, %v10683_v41, 0.0 }
 0x2c7   : > { %13213 = vst [vmem:[#allocation52_spill] sm:$0xff] %v10707_v31  ;;  %13214 = vst [vmem:[#allocation31_spill] sm:$0xff] %v10711_v58  ;;  %v10726_v2 = vadd.f32 %v10707_v31, %v10411_v18  ;;  %v10731_v62 = vmul.f32 %v10661_v0, %v4518_v19  ;;  %v4517_v8 = vsub.f32 %v10711_v58, %v10449_v30  ;;  %v4110_v44 = vpop.f32.mrf.mxu0 }
 0x2c8   : > { %13216 = vst [vmem:[#allocation34_spill] sm:$0xff] %v10720_v47  ;;  %v4520_v16 = vsub.f32 %v10720_v47, %v10466_v36  ;;  %v10737_v48 = vmul.f32 0.25, %v4358_v40  ;;  %v4376_v49 = vadd.f32 %v10605_v24, %v4117_v26  ;;  %v4111_v18 = vadd.f32 %v4110_v44, %v10436_v60  ;;  %v10752_v40 = vpop.f32.mrf.mxu1 }
 0x2c9   : > { %13217 = vst [vmem:[#allocation30_spill] sm:$0xff] %v10726_v2  ;;  %13218 = vst [vmem:[#allocation35_spill] sm:$0xff] %v10731_v62  ;;  %v10743_v39 = vadd.f32 %v10731_v62, %v10430_v53  ;;  %v10748_v34 = vmul.f32 %v10661_v0, %v4517_v8  ;;  %v7832_v52 = vpop.f32.mrf.mxu0  ;;  %4755 = vadd.xlane.f32.xlu0 %v4754_v3  ;;  %v13233_v62 = vld [vmem:[#allocation47_spill] sm:$0xff] }
 0x2ca   : > { %13219 = vst [vmem:[#allocation38_spill] sm:$0xff] %v10737_v48  ;;  %v10755_v24 = vmul.f32 %v10661_v0, %v4520_v16  ;;  %v4519_v53 = vsub.f32 %v10737_v48, %v10483_v25  ;;  %v10759_v60 = vmul.f32 0.25, %v4376_v49  ;;  %v4370_v26 = vadd.f32 %v10613_v1, %v4111_v18  ;;  %v10790_v20 = vpop.f32.mrf.mxu1 }
 0x2cb   : > { %13220 = vst [vmem:[#allocation27_spill] sm:$0xff] %v10743_v39  ;;  %13221 = vst [vmem:[#allocation39_spill] sm:$0xff] %v10748_v34  ;;  %v10764_v54 = vadd.f32 %v10748_v34, %v10449_v30  ;;  %v4129_v44 = vadd.f32 %v7832_v52, %v10446_v35  ;;  %v4122_v19 = vpop.f32.mrf.mxu0  ;;  %v4727_v16 = vsel %vm4636_vm1, %v10718_v7, 0.0  ;;  %v3627_v34 = vadd.f32 %v10553_v57, %v13233_v62 }
 0x2cc   : > { %13222 = vst [vmem:[#allocation58_spill] sm:$0xff] %v10755_v24  ;;  %13223 = vst [vmem:[#allocation59_spill] sm:$0xff] %v10759_v60  ;;  %v10773_v49 = vadd.f32 %v10755_v24, %v10466_v36  ;;  %v10778_v18 = vmul.f32 %v10661_v0, %v4519_v53  ;;  %v4522_v30 = vsub.f32 %v10759_v60, %v10500_v43  ;;  %v10782_v3 = vmul.f32 0.25, %v4370_v26 }
 0x2cd   : > { %13224 = vst [vmem:[#allocation60_spill] sm:$0xff] %v10764_v54  ;;  %v10785_v35 = vadd.f32 %v10620_v42, %v4129_v44  ;;  %v4123_v52 = vadd.f32 %v4122_v19, %v10455_v23  ;;  %v4751_v36 = vsel %vm4636_vm1, %v10691_v56, 0.0  ;;  %4728 = vadd.xlane.f32.xlu1 %v4727_v16  ;;  %v7835_v8 = vpop.f32.mrf.mxu0  ;;  %v3950_v62 = vadd.f32 %v10469_v5, %v3627_v34 }
 0x2ce   : > { %13225 = vst [vmem:[#allocation61_spill] sm:$0xff] %v10773_v49  ;;  %13226 = vst [vmem:[#allocation62_spill] sm:$0xff] %v10778_v18  ;;  %v10794_v53 = vadd.f32 %v10778_v18, %v10483_v25  ;;  %v10799_v1 = vmul.f32 %v10661_v0, %v4522_v30  ;;  %4752 = vadd.xlane.f32.xlu0 %v4751_v36  ;;  %v4141_v23 = vadd.f32 %v7835_v8, %v10463_v12 }
 0x2cf   : > { %13227 = vst [vmem:[#allocation63_spill] sm:$0xff] %v10782_v3  ;;  %v4521_v42 = vsub.f32 %v10782_v3, %v10517_v51  ;;  %v10805_v19 = vadd.f32 %v10629_v11, %v4123_v52  ;;  %v4134_v44 = vpop.f32.mrf.mxu0  ;;  %v4760_v11 = vsel %vm4636_vm1, %v10657_v59, 0.0  ;;  %v4429_v52 = vpop.f32.mrf.mxu1 }
 0x2d0   : > { %13228 = vst [vmem:[#allocation64_spill] sm:$0xff] %v10794_v53  ;;  %13229 = vst [vmem:[#allocation65_spill] sm:$0xff] %v10799_v1  ;;  %v10809_v25 = vadd.f32 %v10799_v1, %v10500_v43  ;;  %v10814_v30 = vadd.f32 %v10639_v6, %v4141_v23  ;;  %v4135_v36 = vadd.f32 %v4134_v44, %v10472_v10  ;;  %v4757_v23 = vsel %vm4636_vm1, %v10675_v55, 0.0 }
 0x2d1   : > { %v10818_v12 = vmul.f32 %v10661_v0, %v4521_v42  ;;  %v7838_v8 = vpop.f32.mrf.mxu0  ;;  %v7899_v44 = vpop.f32.mrf.mxu1 }
 0x2d2   : > { %13230 = vst [vmem:[#allocation66_spill] sm:$0xff] %v10809_v25  ;;  %v10823_v26 = vadd.f32 %v10651_v14, %v4135_v36  ;;  %4761 = vadd.xlane.f32.xlu0 %v4760_v11  ;;  %v4766_v36 = vsel %vm4636_vm1, %v10695_v37, 0.0  ;;  %v4153_v37 = vadd.f32 %v7838_v8, %v10480_v21  ;;  %v4769_v8 = vsel %vm4636_vm1, %v10737_v48, 0.0 }
 0x2d3   : > { %13231 = vst [vmem:[#allocation67_spill] sm:$0xff] %v10818_v12  ;;  %v10827_v43 = vadd.f32 %v10818_v12, %v10517_v51  ;;  %v4146_v10 = vpop.f32.mrf.mxu0  ;;  %v4441_v14 = vpop.f32.mrf.mxu1  ;;  %v4763_v12 = vsel %vm4636_vm1, %v10711_v58, 0.0  ;;  %v4772_v58 = vsel %vm4636_vm1, %v10720_v47, 0.0  ;;  %v4991_v47 = vld [vmem:[%s12452_s3 + $0x8] sm:$0xff] }
 0x2d5   : > { %13232 = vst [vmem:[#allocation68_spill] sm:$0xff] %v10827_v43  ;;  %v10833_v42 = vpop.f32.mrf.mxu0  ;;  %v7902_v1 = vpop.f32.mrf.mxu1 }
 0x2d6   : > { %4758 = vadd.xlane.f32.xlu0 %v4757_v23 }
 0x2d7   : > { %v10835_v16 = vpop.f32.mrf.mxu0 }
 0x2d9   : > { %v10839_v11 = vpop.f32.mrf.mxu0 }
 0x2da   : > { %4767 = vadd.xlane.f32.xlu0 %v4766_v36 }
 0x2db   : > { %v4170_v51 = vpop.f32.mrf.mxu0 }
 0x2dc   : > { %v4171_v6 = vadd.f32 %v4170_v51, %v10523_v9  ;;  %v4453_v51 = vpop.f32.mrf.mxu1 }
 0x2dd   : > { %v7847_v24 = vpop.f32.mrf.mxu0 }
 0x2de   : > { %v4430_v18 = vadd.f32 %v4429_v52, %v4171_v6  ;;  %4764 = vadd.xlane.f32.xlu0 %v4763_v12  ;;  %v4189_v23 = vadd.f32 %v7847_v24, %v10534_v63  ;;  %v13237_v52 = vld [vmem:[#allocation23_spill] sm:$0xff] }
 0x2df   : > { %v4182_v61 = vpop.f32.mrf.mxu0  ;;  %v4147_v6 = vadd.f32 %v4146_v10, %v13237_v52  ;;  %v13242_v10 = vld [vmem:[#allocation18_spill] sm:$0xff] }
 0x2e0   : > { %v10848_v59 = vmul.f32 0.25, %v4430_v18  ;;  %v4448_v36 = vadd.f32 %v7899_v44, %v4189_v23  ;;  %v4183_v9 = vadd.f32 %v4182_v61, %v10540_v22  ;;  %v4412_v18 = vadd.f32 %v10665_v50, %v4153_v37  ;;  %v7905_v44 = vpop.f32.mrf.mxu1 }
 0x2e1   : > { %v7850_v31 = vpop.f32.mrf.mxu0 }
 0x2e2   : > { %13234 = vst [vmem:[#allocation47_spill] sm:$0xff] %v10848_v59  ;;  %v4531_v12 = vsub.f32 %v10848_v59, %v10608_v33  ;;  %v10855_v63 = vmul.f32 0.25, %v4448_v36  ;;  %v4442_v24 = vadd.f32 %v4441_v14, %v4183_v9  ;;  %4773 = vadd.xlane.f32.xlu0 %v4772_v58  ;;  %v4201_v57 = vadd.f32 %v7850_v31, %v10551_v27  ;;  %v13239_v31 = vld [vmem:[#allocation41_spill] sm:$0xff]  ;;  %v13243_v36 = vld [vmem:[#allocation19_spill] sm:$0xff] }
 0x2e3   : > { %v4194_v21 = vpop.f32.mrf.mxu0  ;;  %v10882_v9 = vmax.f32 %v13243_v36, %v13242_v10 }
 0x2e4   : > { %13235 = vst [vmem:[#allocation69_spill] sm:$0xff] %v10855_v63  ;;  %v10861_v22 = vmul.f32 %v10661_v0, %v4531_v12  ;;  %v4534_v61 = vsub.f32 %v10855_v63, %v10616_v28  ;;  %v10868_v58 = vmul.f32 0.25, %v4442_v24  ;;  %v4460_v27 = vadd.f32 %v7902_v1, %v4201_v57 }
 0x2e5   : > { %v4195_v14 = vadd.f32 %v4194_v21, %v13239_v31  ;;  %v7853_v5 = vpop.f32.mrf.mxu0  ;;  %13244 = vst [vmem:[#allocation18_spill] sm:$0xff] %v10882_v9  ;;  %v4465_v31 = vpop.f32.mrf.mxu1  ;;  %v13268_v21 = vld [vmem:[#allocation20_spill] sm:$0xff] }
 0x2e6   : > { %13236 = vst [vmem:[#allocation70_spill] sm:$0xff] %v10861_v22  ;;  %13238 = vst [vmem:[#allocation23_spill] sm:$0xff] %v10868_v58  ;;  %v10873_v50 = vadd.f32 %v10861_v22, %v10608_v33  ;;  %v10878_v34 = vmul.f32 %v10661_v0, %v4534_v61  ;;  %4770 = vadd.xlane.f32.xlu0 %v4769_v8  ;;  %v4213_v23 = vadd.f32 %v7853_v5, %v3950_v62  ;;  %v13247_v62 = vld [vmem:[#allocation43_spill] sm:$0xff] }
 0x2e7   : > { %v4533_v1 = vsub.f32 %v10868_v58, %v10634_v17  ;;  %v10886_v12 = vmul.f32 0.25, %v4460_v27  ;;  %v4454_v24 = vadd.f32 %v4453_v51, %v4195_v14  ;;  %v4206_v33 = vpop.f32.mrf.mxu0  ;;  %v4778_v51 = vsel %vm4636_vm1, %v10759_v60, 0.0 }
 0x2e8   : > { %13240 = vst [vmem:[#allocation41_spill] sm:$0xff] %v10873_v50  ;;  %13241 = vst [vmem:[#allocation71_spill] sm:$0xff] %v10878_v34  ;;  %v10890_v57 = vadd.f32 %v10878_v34, %v10616_v28  ;;  %v4472_v61 = vadd.f32 %v7905_v44, %v4213_v23  ;;  %v4207_v8 = vadd.f32 %v4206_v33, %v13247_v62  ;;  %v10904_v28 = vmul.f32 0.25, %v4412_v18  ;;  %v13266_v62 = vld [vmem:[#allocation28_spill] sm:$0xff] }
 0x2e9   : > { %13245 = vst [vmem:[#allocation19_spill] sm:$0xff] %v10886_v12  ;;  %v10896_v52 = vmul.f32 %v10661_v0, %v4533_v1  ;;  %v4536_v27 = vsub.f32 %v10886_v12, %v10642_v13  ;;  %v10900_v5 = vmul.f32 0.25, %v4454_v24  ;;  %v4406_v14 = vadd.f32 %v10681_v46, %v4147_v6  ;;  %v13254_v24 = vld [vmem:[#allocation37_spill] sm:$0xff] }
 0x2ea   : > { %13246 = vst [vmem:[#allocation72_spill] sm:$0xff] %v10890_v57  ;;  %13250 = vst [vmem:[#allocation74_spill] sm:$0xff] %v10904_v28  ;;  %v10907_v10 = vmul.f32 0.25, %v4472_v61  ;;  %v4466_v44 = vadd.f32 %v4465_v31, %v4207_v8  ;;  %4779 = vadd.xlane.f32.xlu0 %v4778_v51  ;;  %v4165_v46 = vadd.f32 %v10833_v42, %v13254_v24  ;;  %v4775_v42 = vsel %vm4636_vm1, %v10782_v3, 0.0  ;;  %v13259_v51 = vld [vmem:[#allocation5_spill] sm:$0xff] }
 0x2eb   : > { %13248 = vst [vmem:[#allocation43_spill] sm:$0xff] %v10896_v52  ;;  %13249 = vst [vmem:[#allocation73_spill] sm:$0xff] %v10900_v5  ;;  %v10911_v23 = vadd.f32 %v10896_v52, %v10634_v17  ;;  %v10916_v1 = vmul.f32 %v10661_v0, %v4536_v27  ;;  %v4535_v18 = vsub.f32 %v10900_v5, %v10654_v29 }
 0x2ec   : > { %13251 = vst [vmem:[#allocation75_spill] sm:$0xff] %v10907_v10  ;;  %v4538_v6 = vsub.f32 %v10907_v10, %v10627_v45  ;;  %v10924_v33 = vmul.f32 0.25, %v4466_v44  ;;  %v4826_v17 = vsel %vm4636_vm1, %v10907_v10, 0.0  ;;  %v13288_v10 = vld [vmem:[#allocation13_spill] sm:$0xff] }
 0x2ed   : > { %13252 = vst [vmem:[#allocation76_spill] sm:$0xff] %v10911_v23  ;;  %13253 = vst [vmem:[#allocation77_spill] sm:$0xff] %v10916_v1  ;;  %v10930_v61 = vadd.f32 %v10916_v1, %v10642_v13  ;;  %v10935_v8 = vmul.f32 %v10661_v0, %v4535_v18  ;;  %4827 = vadd.xlane.f32.xlu1 %v4826_v17  ;;  %v13260_v13 = vld [vmem:[#allocation17_spill] sm:$0xff]  ;;  %v4159_v18 = vadd.f32 %v10835_v16, %v13266_v62  ;;  %v13272_v62 = vld [vmem:[#allocation40_spill] sm:$0xff] }
 0x2ee   : > { %13255 = vst [vmem:[#allocation37_spill] sm:$0xff] %v10924_v33  ;;  %v10940_v31 = vmul.f32 %v10661_v0, %v4538_v6  ;;  %v4537_v27 = vsub.f32 %v10924_v33, %v10718_v7  ;;  %4776 = vadd.xlane.f32.xlu0 %v4775_v42  ;;  %v10946_v44 = vmax.f32 %v13260_v13, %v13259_v51  ;;  %v4694_v51 = vsel %vm4636_vm1, %v10882_v9, 0.0 }
 0x2ef   : > { %13256 = vst [vmem:[#allocation78_spill] sm:$0xff] %v10930_v61  ;;  %13257 = vst [vmem:[#allocation79_spill] sm:$0xff] %v10935_v8  ;;  %v10950_v24 = vadd.f32 %v10935_v8, %v10654_v29  ;;  %v10965_v13 = vmul.f32 0.25, %v4406_v14  ;;  %v4424_v29 = vadd.f32 %v10715_v32, %v4165_v46  ;;  %v13269_v14 = vld [vmem:[#allocation22_spill] sm:$0xff]  ;;  %v4418_v46 = vadd.f32 %v10752_v40, %v4159_v18  ;;  %v13278_v18 = vld [vmem:[#allocation16_spill] sm:$0xff] }
 0x2f0   : > { %13258 = vst [vmem:[#allocation80_spill] sm:$0xff] %v10940_v31  ;;  %13261 = vst [vmem:[#allocation5_spill] sm:$0xff] %v10946_v44  ;;  %v10956_v17 = vadd.f32 %v10940_v31, %v10627_v45  ;;  %v10961_v42 = vmul.f32 %v10661_v0, %v4537_v27  ;;  %v4796_v45 = vsel %vm4636_vm1, %v10904_v28, 0.0  ;;  %v10980_v36 = vmax.f32 %v13269_v14, %v13268_v21  ;;  %v13274_v27 = vld [vmem:[#allocation21_spill] sm:$0xff] }
 0x2f1   : > { %13262 = vst [vmem:[#allocation17_spill] sm:$0xff] %v10950_v24  ;;  %13265 = vst [vmem:[#allocation83_spill] sm:$0xff] %v10965_v13  ;;  %4695 = vadd.xlane.f32.xlu1 %v4694_v51  ;;  %v4646_v32 = vsel %vm4636_vm1, %v10946_v44, 0.0  ;;  %v10984_v16 = vmul.f32 0.25, %v4424_v29  ;;  %v4177_v51 = vadd.f32 %v10839_v11, %v13272_v62  ;;  %v10997_v14 = vmul.f32 0.25, %v4418_v46  ;;  %v13277_v11 = vld [vmem:[#allocation12_spill] sm:$0xff] }
 0x2f2   : > { %13263 = vst [vmem:[#allocation81_spill] sm:$0xff] %v10956_v17  ;;  %13264 = vst [vmem:[#allocation82_spill] sm:$0xff] %v10961_v42  ;;  %v10974_v6 = vadd.f32 %v10961_v42, %v10718_v7  ;;  %4797 = vadd.xlane.f32.xlu0 %v4796_v45  ;;  %v4793_v7 = vsel %vm4636_vm1, %v10965_v13, 0.0  ;;  %v13273_v45 = vld [vmem:[#allocation48_spill] sm:$0xff]  ;;  %v4691_v21 = vsel %vm4636_vm1, %v10980_v36, 0.0  ;;  %v4823_v1 = vsel %vm4636_vm1, %v10924_v33, 0.0 }
 0x2f3   : > { %13270 = vst [vmem:[#allocation20_spill] sm:$0xff] %v10980_v36  ;;  %13271 = vst [vmem:[#allocation22_spill] sm:$0xff] %v10984_v16  ;;  %v10993_v37 = vmax.f32 %v13274_v27, %v13273_v45  ;;  %v4436_v29 = vadd.f32 %v10790_v20, %v4177_v51  ;;  %v4802_v40 = vsel %vm4636_vm1, %v10984_v16, 0.0  ;;  %v4799_v46 = vsel %vm4636_vm1, %v10997_v14, 0.0  ;;  %v13281_v20 = vld [vmem:[#allocation42_spill] sm:$0xff]  ;;  %v13294_v33 = vld [vmem:[#allocation53_spill] sm:$0xff] }
 0x2f4   : > { %13267 = vst [vmem:[#allocation28_spill] sm:$0xff] %v10974_v6  ;;  %13276 = vst [vmem:[#allocation48_spill] sm:$0xff] %v10997_v14  ;;  %v13282_v51 = vld [vmem:[#allocation10_spill] sm:$0xff] }
 0x2f5   : > { %4647 = vadd.xlane.f32.xlu1 %v4646_v32  ;;  %13275 = vst [vmem:[#allocation40_spill] sm:$0xff] %v10993_v37  ;;  %v11004_v32 = vmax.f32 %v13278_v18, %v13277_v11  ;;  %v4643_v27 = vsel %vm4636_vm1, %v10993_v37, 0.0  ;;  %v11008_v62 = vmul.f32 0.25, %v4436_v29  ;;  %v11016_v45 = vmax.f32 %v13282_v51, %v13281_v20  ;;  %v13284_v29 = vld [vmem:[#allocation14_spill] sm:$0xff]  ;;  %v13285_v18 = vld [vmem:[#allocation49_spill] sm:$0xff]  ;;  %v13287_v51 = vld [vmem:[#allocation55_spill] sm:$0xff] }
 0x2f6   : > { %4794 = vadd.xlane.f32.xlu0 %v4793_v7  ;;  %v11026_v31 = vmax.f32 %v13285_v18, %v13284_v29  ;;  %v11036_v42 = vmax.f32 %v13288_v10, %v13287_v51 }
 0x2f7   : > { %13279 = vst [vmem:[#allocation21_spill] sm:$0xff] %v11004_v32  ;;  %13280 = vst [vmem:[#allocation12_spill] sm:$0xff] %v11008_v62 }
 0x2f8   : > { %13283 = vst [vmem:[#allocation16_spill] sm:$0xff] %v11016_v45  ;;  %13286 = vst [vmem:[#allocation42_spill] sm:$0xff] %v11026_v31  ;;  %v4637_v18 = vsel %vm4636_vm1, %v11036_v42, 0.0 }
 0x2f9   : > { %4692 = vadd.xlane.f32.xlu1 %v4691_v21  ;;  %v4688_v21 = vsel %vm4636_vm1, %v11004_v32, 0.0  ;;  %13289 = vst [vmem:[#allocation10_spill] sm:$0xff] %v11036_v42 }
 0x2fa   : > { %4803 = vadd.xlane.f32.xlu0 %v4802_v40  ;;  %v4808_v40 = vsel %vm4636_vm1, %v11008_v62, 0.0 }
 0x2fb   : > { %v11012_v7 = vpop.xlane.xlu1 %4653 }
 0x2fd   : > { %4644 = vadd.xlane.f32.xlu1 %v4643_v27  ;;  %v4640_v27 = vsel %vm4636_vm1, %v11016_v45, 0.0 }
 0x2fe   : > { %4800 = vadd.xlane.f32.xlu0 %v4799_v46  ;;  %v4805_v46 = vsel %vm4636_vm1, %v10848_v59, 0.0 }
 0x2ff   : > { %v11022_v11 = vpop.xlane.xlu1 %4650 }
 0x301   : > { %4689 = vadd.xlane.f32.xlu1 %v4688_v21  ;;  %v4685_v21 = vsel %vm4636_vm1, %v11026_v31, 0.0 }
 0x302   : > { %4809 = vadd.xlane.f32.xlu0 %v4808_v40  ;;  %v4814_v40 = vsel %vm4636_vm1, %v10855_v63, 0.0  ;;  %v13297_v63 = vld [vmem:[#allocation50_spill] sm:$0xff] }
 0x303   : > { %v11032_v20 = vpop.xlane.xlu1 %4659 }
 0x305   : > { %4641 = vadd.xlane.f32.xlu1 %v4640_v27  ;;  %v4811_v27 = vsel %vm4636_vm1, %v10868_v58, 0.0  ;;  %v13300_v58 = vld [vmem:[#allocation51_spill] sm:$0xff] }
 0x306   : > { %4806 = vadd.xlane.f32.xlu0 %v4805_v46  ;;  %v4820_v46 = vsel %vm4636_vm1, %v10886_v12, 0.0 }
 0x307   : > { %v11042_v29 = vpop.xlane.xlu1 %4656 }
 0x309   : > { %4686 = vadd.xlane.f32.xlu1 %v4685_v21  ;;  %v4817_v21 = vsel %vm4636_vm1, %v10900_v5, 0.0  ;;  %v11076_v5 = vmul.f32 0.25, %v13294_v33 }
 0x30a   : > { %4815 = vadd.xlane.f32.xlu0 %v4814_v40  ;;  %v11057_v40 = vmul.f32 0.25, %v10814_v30 }
 0x30b   : > { %v11048_v10 = vpop.xlane.xlu1 %4665  ;;  %13295 = vst [vmem:[#allocation13_spill] sm:$0xff] %v11076_v5 }
 0x30c   : > { %13290 = vst [vmem:[#allocation14_spill] sm:$0xff] %v11057_v40 }
 0x30d   : > { %4638 = vadd.xlane.f32.xlu1 %v4637_v18 }
 0x30e   : > { %4812 = vadd.xlane.f32.xlu0 %v4811_v27  ;;  %v13291_v27 = vld [vmem:[#allocation7_spill] sm:$0xff] }
 0x30f   : > { %v11052_v51 = vpop.xlane.xlu1 %4662  ;;  %v11064_v8 = vmul.f32 0.25, %v13291_v27 }
 0x311   : > { %13292 = vst [vmem:[#allocation49_spill] sm:$0xff] %v11064_v8  ;;  %v4742_v30 = vsel %vm4636_vm1, %v11064_v8, 0.0 }
 0x312   : > { %4821 = vadd.xlane.f32.xlu0 %v4820_v46  ;;  %v4790_v46 = vsel %vm4636_vm1, %v11057_v40, 0.0 }
 0x313   : > { %v11061_v18 = vpop.xlane.xlu1 %4671 }
 0x316   : > { %4818 = vadd.xlane.f32.xlu0 %v4817_v21  ;;  %v11071_v21 = vmul.f32 0.25, %v10823_v26  ;;  %v4739_v26 = vsel %vm4636_vm1, %v11076_v5, 0.0 }
 0x317   : > { %v11068_v12 = vpop.xlane.xlu1 %4668 }
 0x318   : > { %13293 = vst [vmem:[#allocation55_spill] sm:$0xff] %v11071_v21 }
 0x31a   : > { %4824 = vadd.xlane.f32.xlu0 %v4823_v1  ;;  %v4787_v1 = vsel %vm4636_vm1, %v11071_v21, 0.0 }
 0x31b   : > { %v11080_v27 = vpop.xlane.xlu1 %4677 }
 0x31e   : > { %4791 = vadd.xlane.f32.xlu0 %v4790_v46  ;;  %v11083_v46 = vmul.f32 0.25, %v10785_v35 }
 0x31f   : > { %v11087_v34 = vpop.xlane.xlu1 %4674 }
 0x320   : > { %13296 = vst [vmem:[#allocation7_spill] sm:$0xff] %v11083_v46  ;;  %v4784_v33 = vsel %vm4636_vm1, %v11083_v46, 0.0 }
 0x322   : > { %4743 = vadd.xlane.f32.xlu0 %v4742_v30  ;;  %v11090_v30 = vmul.f32 0.25, %v13297_v63 }
 0x323   : > { %v4684_v60 = vpop.xlane.xlu0 %4683 }
 0x324   : > { %13298 = vst [vmem:[#allocation53_spill] sm:$0xff] %v11090_v30  ;;  %v4736_v35 = vsel %vm4636_vm1, %v11090_v30, 0.0 }
 0x326   : > { %4788 = vadd.xlane.f32.xlu0 %v4787_v1  ;;  %v11097_v1 = vmul.f32 0.25, %v10805_v19 }
 0x327   : > { %v11094_v52 = vpop.xlane.xlu1 %4680 }
 0x328   : > { %13299 = vst [vmem:[#allocation50_spill] sm:$0xff] %v11097_v1  ;;  %v4781_v63 = vsel %vm4636_vm1, %v11097_v1, 0.0 }
 0x32a   : > { %4740 = vadd.xlane.f32.xlu0 %v4739_v26  ;;  %v11102_v26 = vmul.f32 0.25, %v13300_v58 }
 0x32b   : > { %v11106_v22 = vpop.xlane.xlu1 %4701 }
 0x32c   : > { %13301 = vst [vmem:[#allocation51_spill] sm:$0xff] %v11102_v26 }
 0x32e   : > { %4785 = vadd.xlane.f32.xlu0 %v4784_v33  ;;  %v4733_v33 = vsel %vm4636_vm1, %v11102_v26, 0.0 }
 0x32f   : > { %v11110_v59 = vpop.xlane.xlu1 %4698 }
 0x332   : > { %4737 = vadd.xlane.f32.xlu0 %v4736_v35 }
 0x333   : > { %v11112_v19 = vpop.xlane.xlu1 %4707 }
 0x336   : > { %4782 = vadd.xlane.f32.xlu0 %v4781_v63  ;;  %v11121_v63 = vand.u32 4294901760, %v4991_v47 }
 0x337   : > { %v11114_v35 = vpop.xlane.xlu1 %4704 }
 0x338   : > { %13302 = vst [vmem:[#allocation84_spill] sm:$0xff] %v11121_v63  ;;  %5346 = vmatprep.mubr.f32.mxu1 %v11121_v63 }
 0x33a   : > { %4734 = vadd.xlane.f32.xlu0 %v4733_v33  ;;  %v11126_v33 = vsub.f32 %v4991_v47, %v11121_v63 }
 0x33b   : > { %v11119_v48 = vpop.xlane.xlu1 %4713 }
 0x33c   : > { %13303 = vst [vmem:[#allocation85_spill] sm:$0xff] %v11126_v33  ;;  %v12702_v17 = vand.u32 4294901760, %v11126_v33 }
 0x33e   : > { %v5093_v24 = vsub.f32 %v11126_v33, %v12702_v17 }
 0x33f   : > { %v11132_v61 = vpop.xlane.xlu1 %4710 }
 0x340   : > { %v5094_v57 = vand.u32 4294901760, %v5093_v24 }
 0x342   : > { %5095 = vmatprep.mubr.f32.mxu0 %v5094_v57 }
 0x343   : > { %v4732_v3 = vpop.xlane.xlu0 %4731  ;;  %v11139_v50 = vpop.xlane.xlu1 %4719 }
 0x347   : > { %v4750_v58 = vpop.xlane.xlu0 %4749  ;;  %v11145_v43 = vpop.xlane.xlu1 %4716 }
 0x348   : > { %v4834_v57 = vsub.f32 %v4750_v58, %v11012_v7 }
 0x34a   : > { %v4866_v14 = vmul.f32 %v4834_v57, %v10661_v0 }
 0x34b   : > { %v11149_v53 = vpop.xlane.xlu1 %4725 }
 0x34c   : > { %v4898_v31 = vadd.f32 %v4866_v14, %v11012_v7  ;;  %v4930_v57 = vsub.f32 %v4750_v58, %v4866_v14 }
 0x34e   : > { %v11123_v55 = vpop.xlane.xlu0 %4746 }
 0x34f   : > { %v11155_v24 = vpop.xlane.xlu1 %4722 }
 0x352   : > { %v11130_v6 = vpop.xlane.xlu0 %4755 }
 0x353   : > { %v4836_v28 = vsub.f32 %v11130_v6, %v11032_v20 }
 0x355   : > { %v4868_v41 = vmul.f32 %v4836_v28, %v10661_v0  ;;  %v4963_v28 = vsel %vm4957_vm2, %v4898_v31, %v4930_v57 }
 0x356   : > { %v11160_v15 = vpop.xlane.xlu1 %4728 }
 0x357   : > { %v11137_v23 = vpop.xlane.xlu0 %4752  ;;  %v4932_v38 = vsub.f32 %v11130_v6, %v4868_v41 }
 0x358   : > { %v4835_v40 = vsub.f32 %v11137_v23, %v11042_v29 }
 0x35a   : > { %v4867_v7 = vmul.f32 %v4835_v40, %v10661_v0 }
 0x35b   : > { %v11141_v47 = vpop.xlane.xlu0 %4761 }
 0x35c   : > { %v4838_v32 = vsub.f32 %v11141_v47, %v11048_v10  ;;  %v4931_v31 = vsub.f32 %v11137_v23, %v4867_v7 }
 0x35f   : > { %v11143_v25 = vpop.xlane.xlu0 %4758 }
 0x363   : > { %v11147_v49 = vpop.xlane.xlu0 %4767 }
 0x367   : > { %v11151_v39 = vpop.xlane.xlu0 %4764 }
 0x368   : > { %v4839_v14 = vsub.f32 %v11151_v39, %v11068_v12 }
 0x36a   : > { %v4871_v6 = vmul.f32 %v4839_v14, %v10661_v0 }
 0x36b   : > { %v11153_v54 = vpop.xlane.xlu0 %4773 }
 0x36c   : > { %v4935_v8 = vsub.f32 %v11151_v39, %v4871_v6 }
 0x36f   : > { %v11157_v17 = vpop.xlane.xlu0 %4770 }
 0x373   : > { %v4780_v2 = vpop.xlane.xlu0 %4779 }
 0x374   : > { %v4844_v62 = vsub.f32 %v4780_v2, %v4684_v60 }
 0x376   : > { %v4876_v16 = vmul.f32 %v4844_v62, %v10661_v0  ;;  %v4828_v13 = vpop.xlane.xlu1 %4827  ;;  %v4833_v62 = vsub.f32 %v11123_v55, %v11022_v11 }
 0x377   : > { %v11166_v21 = vpop.xlane.xlu0 %4776  ;;  %v4860_v36 = vsub.f32 %v4828_v13, %v4732_v3 }
 0x378   : > { %v4908_v9 = vadd.f32 %v4876_v16, %v4684_v60  ;;  %v4940_v1 = vsub.f32 %v4780_v2, %v4876_v16  ;;  %v4865_v40 = vmul.f32 %v4833_v62, %v10661_v0  ;;  %v11211_v62 = vand.u32 4294901760, %v4963_v28 }
 0x379   : > { %v4892_v46 = vmul.f32 %v4860_v36, %v10661_v0  ;;  %v4840_v36 = vsub.f32 %v11147_v49, %v11061_v18 }
 0x37a   : > { %v4973_v56 = vsel %vm4957_vm2, %v4908_v9, %v4940_v1  ;;  %v4900_v1 = vadd.f32 %v4868_v41, %v11032_v20 }
 0x37b   : > { %v11178_v4 = vand.u32 4294901760, %v4973_v56  ;;  %v4924_v60 = vadd.f32 %v4892_v46, %v4732_v3  ;;  %v4956_v2 = vsub.f32 %v4828_v13, %v4892_v46  ;;  %v11180_v16 = vpop.xlane.xlu0 %4797  ;;  %v4870_v3 = vmul.f32 %v4838_v32, %v10661_v0 }
 0x37c   : > { %v4842_v13 = vsub.f32 %v11153_v54, %v11080_v27  ;;  %v4837_v32 = vsub.f32 %v11143_v25, %v11052_v51  ;;  %v4872_v41 = vmul.f32 %v4840_v36, %v10661_v0 }
 0x37d   : > { %13304 = vst [vmem:[#allocation86_spill] sm:$0xff] %v11178_v4  ;;  %v11188_v58 = vsub.f32 %v4973_v56, %v11178_v4  ;;  %v4989_v9 = vsel %vm4957_vm2, %v4924_v60, %v4956_v2  ;;  %v4899_v60 = vadd.f32 %v4867_v7, %v11042_v29  ;;  %v4902_v20 = vadd.f32 %v4870_v3, %v11048_v10 }
 0x37e   : > { %v11195_v46 = vand.u32 4294901760, %v4989_v9  ;;  %v4934_v23 = vsub.f32 %v11141_v47, %v4870_v3  ;;  %v4874_v29 = vmul.f32 %v4842_v13, %v10661_v0  ;;  %v4897_v7 = vadd.f32 %v4865_v40, %v11022_v11 }
 0x37f   : > { %13305 = vst [vmem:[#allocation87_spill] sm:$0xff] %v11188_v58  ;;  %v11200_v5 = vpop.xlane.xlu0 %4794  ;;  %v4841_v56 = vsub.f32 %v11157_v17, %v11087_v34  ;;  %v13308_v14 = vand.u32 4294901760, %v11188_v58  ;;  %v4965_v10 = vsel %vm4957_vm2, %v4900_v1, %v4932_v38  ;;  %v4964_v47 = vsel %vm4957_vm2, %v4899_v60, %v4931_v31 }
 0x380   : > { %13306 = vst [vmem:[#allocation88_spill] sm:$0xff] %v11195_v46  ;;  %v11208_v57 = vsub.f32 %v4989_v9, %v11195_v46  ;;  %7036 = vmatprep.subr.mxu0 %v11195_v46  ;;  %v4929_v9 = vsub.f32 %v11123_v55, %v4865_v40  ;;  %v4869_v3 = vmul.f32 %v4837_v32, %v10661_v0 }
 0x381   : > { %7037 = vmatpush3.msra.mxu0 %v11178_v4  ;;  %v5125_v37 = vsub.f32 %v11188_v58, %v13308_v14  ;;  %v4904_v55 = vadd.f32 %v4872_v41, %v11061_v18  ;;  %v4936_v13 = vsub.f32 %v11147_v49, %v4872_v41  ;;  %v4903_v40 = vadd.f32 %v4871_v6, %v11068_v12  ;;  %v4990_v49 = vld [vmem:[%s12452_s3] sm:$0xff] }
 0x382   : > { %13307 = vst [vmem:[#allocation89_spill] sm:$0xff] %v11208_v57  ;;  %v12743_v2 = vand.u32 4294901760, %v11208_v57  ;;  %v4967_v14 = vsel %vm4957_vm2, %v4902_v20, %v4934_v23  ;;  %v4906_v38 = vadd.f32 %v4874_v29, %v11080_v27  ;;  %v4938_v1 = vsub.f32 %v11153_v54, %v4874_v29 }
 0x383   : > { %v11224_v36 = vpop.xlane.xlu0 %4803  ;;  %v4873_v31 = vmul.f32 %v4841_v56, %v10661_v0  ;;  %v4962_v12 = vsel %vm4957_vm2, %v4897_v7, %v4929_v9  ;;  %v11249_v18 = vand.u32 4294901760, %v4965_v10  ;;  %v4901_v39 = vadd.f32 %v4869_v3, %v11052_v51 }
 0x384   : > { %v5237_v11 = vsub.f32 %v11208_v57, %v12743_v2  ;;  %v5126_v2 = vand.u32 4294901760, %v5125_v37  ;;  %v4933_v27 = vsub.f32 %v11143_v25, %v4869_v3  ;;  %v11253_v54 = vand.u32 4294901760, %v4964_v47 }
 0x385   : > { %v11255_v41 = vand.u32 4294901760, %v4967_v14  ;;  %v4969_v56 = vsel %vm4957_vm2, %v4904_v55, %v4936_v13  ;;  %v4968_v37 = vsel %vm4957_vm2, %v4903_v40, %v4935_v8  ;;  %v11260_v6 = vsub.f32 %v4963_v28, %v11211_v62 }
 0x386   : > { %v5238_v60 = vand.u32 4294901760, %v5237_v11  ;;  %13309 = vst [vmem:[#allocation90_spill] sm:$0xff] %v11253_v54  ;;  %v4971_v20 = vsel %vm4957_vm2, %v4906_v38, %v4938_v1  ;;  %v11263_v23 = vand.u32 4294901760, %v4990_v49  ;;  %v11265_v51 = vand.u32 4294901760, %v4962_v12 }
 0x387   : > { %v11243_v32 = vpop.xlane.xlu0 %4800  ;;  %13310 = vst [vmem:[#allocation91_spill] sm:$0xff] %v11260_v6  ;;  %v4905_v25 = vadd.f32 %v4873_v31, %v11087_v34  ;;  %v4937_v29 = vsub.f32 %v11157_v17, %v4873_v31  ;;  %v4843_v7 = vsub.f32 %v11166_v21, %v11094_v52  ;;  %v11274_v8 = vsub.f32 %v4965_v10, %v11249_v18 }
 0x388   : > { %7074 = vmatprep.subr.mxu1 %v5238_v60  ;;  %13311 = vst [vmem:[#allocation92_spill] sm:$0xff] %v11263_v23  ;;  %13312 = vst [vmem:[#allocation93_spill] sm:$0xff] %v11265_v51  ;;  %v4966_v28 = vsel %vm4957_vm2, %v4901_v39, %v4933_v27  ;;  %v11279_v3 = vand.u32 4294901760, %v4968_v37  ;;  %v11282_v11 = vsub.f32 %v4964_v47, %v11253_v54  ;;  %v11287_v17 = vand.u32 4294901760, %v4971_v20 }
 0x389   : > { %7075 = vmatpush3.msra.mxu1 %v5126_v2  ;;  %13313 = vst [vmem:[#allocation94_spill] sm:$0xff] %v11274_v8  ;;  %v11277_v2 = vand.u32 4294901760, %v4969_v56  ;;  %v11285_v34 = vsub.f32 %v4967_v14, %v11255_v41  ;;  %v12746_v55 = vand.u32 4294901760, %v11260_v6  ;;  %v11291_v13 = vsub.f32 %v4990_v49, %v11263_v23 }
 0x38a   : > { %13314 = vst [vmem:[#allocation95_spill] sm:$0xff] %v11282_v11  ;;  %v11294_v10 = vsub.f32 %v4962_v12, %v11265_v51  ;;  %v11296_v40 = vand.u32 4294901760, %v4966_v28  ;;  %v4970_v38 = vsel %vm4957_vm2, %v4905_v25, %v4937_v29  ;;  %v4875_v47 = vmul.f32 %v4843_v7, %v10661_v0 }
 0x38b   : > { %v11271_v9 = vpop.xlane.xlu0 %4809  ;;  %13315 = vst [vmem:[#allocation96_spill] sm:$0xff] %v11285_v34  ;;  %13316 = vst [vmem:[#allocation97_spill] sm:$0xff] %v11291_v13  ;;  %v11303_v14 = vsub.f32 %v4969_v56, %v11277_v2  ;;  %v11306_v60 = vsub.f32 %v4968_v37, %v11279_v3  ;;  %v11310_v49 = vsub.f32 %v4971_v20, %v11287_v17  ;;  %v11314_v27 = vand.u32 4294901760, %v4970_v38 }
 0x38c   : > { %13317 = vst [vmem:[#allocation98_spill] sm:$0xff] %v11294_v10  ;;  %v4850_v25 = vsub.f32 %v11180_v16, %v11106_v22  ;;  %v11321_v56 = vsub.f32 %v11260_v6, %v12746_v55  ;;  %v11325_v29 = vsub.f32 %v4966_v28, %v11296_v40  ;;  %v4907_v20 = vadd.f32 %v4875_v47, %v11094_v52  ;;  %v4993_v28 = vld [vmem:[%s12452_s3 + $0x18] sm:$0xff] }
 0x38d   : > { %13318 = vst [vmem:[#allocation99_spill] sm:$0xff] %v11303_v14  ;;  %13319 = vst [vmem:[#allocation100_spill] sm:$0xff] %v11306_v60  ;;  %v4939_v7 = vsub.f32 %v11166_v21, %v4875_v47  ;;  %v13323_v55 = vand.u32 4294901760, %v11274_v8  ;;  %v13324_v21 = vand.u32 4294901760, %v11285_v34  ;;  %v13325_v31 = vand.u32 4294901760, %v11282_v11 }
 0x38e   : > { %13320 = vst [vmem:[#allocation101_spill] sm:$0xff] %v11310_v49  ;;  %13321 = vst [vmem:[#allocation102_spill] sm:$0xff] %v11321_v56  ;;  %v11357_v12 = vsub.f32 %v4970_v38, %v11314_v27  ;;  %v4882_v37 = vmul.f32 %v4850_v25, %v10661_v0  ;;  %v13328_v42 = vand.u32 4294901760, %v11291_v13  ;;  %v13330_v63 = vand.u32 4294901760, %v11294_v10 }
 0x38f   : > { %v11300_v1 = vpop.xlane.xlu0 %4806  ;;  %13322 = vst [vmem:[#allocation103_spill] sm:$0xff] %v11325_v29  ;;  %v11337_v26 = vsub.f32 %v11274_v8, %v13323_v55  ;;  %v11346_v47 = vsub.f32 %v11285_v34, %v13324_v21  ;;  %v11351_v44 = vsub.f32 %v11282_v11, %v13325_v31  ;;  %v4992_v55 = vld [vmem:[%s12452_s3 + $0x10] sm:$0xff]  ;;  %v4972_v30 = vsel %vm4957_vm2, %v4907_v20, %v4939_v7 }
 0x390   : > { %13327 = vst [vmem:[#allocation105_spill] sm:$0xff] %v11357_v12  ;;  %v11364_v21 = vsub.f32 %v11291_v13, %v13328_v42  ;;  %v11373_v38 = vsub.f32 %v11294_v10, %v13330_v63  ;;  %v11375_v6 = vand.u32 4294901760, %v4993_v28  ;;  %v13333_v25 = vand.u32 4294901760, %v11303_v14  ;;  %v11390_v13 = vpop.xlane.xlu1 %4695 }
 0x391   : > { %13326 = vst [vmem:[#allocation104_spill] sm:$0xff] %v11351_v44  ;;  %v13334_v42 = vand.u32 4294901760, %v11306_v60  ;;  %v11388_v45 = vand.u32 4294901760, %v4992_v55  ;;  %v13336_v10 = vand.u32 4294901760, %v11310_v49  ;;  %v4914_v7 = vadd.f32 %v4882_v37, %v11106_v22  ;;  %v5931_v44 = vld [vmem:[#allocation2] sm:$0x1] }
 0x392   : > { %13329 = vst [vmem:[#allocation106_spill] sm:$0xff] %v11364_v21  ;;  %13331 = vst [vmem:[#allocation107_spill] sm:$0xff] %v11373_v38  ;;  %v11380_v52 = vsub.f32 %v11303_v14, %v13333_v25  ;;  %v4946_v34 = vsub.f32 %v11180_v16, %v4882_v37  ;;  %v4849_v4 = vsub.f32 %v11200_v5, %v11110_v59  ;;  %v13337_v23 = vand.u32 4294901760, %v11325_v29 }
 0x393   : > { %v11329_v39 = vpop.xlane.xlu0 %4815  ;;  %13332 = vst [vmem:[#allocation108_spill] sm:$0xff] %v11375_v6  ;;  %v11385_v20 = vsub.f32 %v11306_v60, %v13334_v42  ;;  %13335 = vst [vmem:[#allocation109_spill] sm:$0xff] %v11388_v45  ;;  %v11397_v11 = vsub.f32 %v11310_v49, %v13336_v10  ;;  %v11401_v42 = vand.u32 4294901760, %v4972_v30  ;;  %v11416_v8 = vsub.f32 %v4993_v28, %v11375_v6 }
 0x394   : > { %v4856_v63 = vsub.f32 %v11329_v39, %v11139_v50  ;;  %v11413_v25 = vsub.f32 %v11325_v29, %v13337_v23  ;;  %v11422_v60 = vsub.f32 %v4992_v55, %v11388_v45  ;;  %v4854_v46 = vsub.f32 %v11271_v9, %v11119_v48  ;;  %v11445_v49 = vpop.xlane.xlu1 %4647 }
 0x395   : > { %v4853_v33 = vsub.f32 %v11300_v1, %v11132_v61  ;;  %v11431_v6 = vsub.f32 %v4972_v30, %v11401_v42  ;;  %v11434_v16 = vsel %vm4957_vm2, %v4914_v7, %v4946_v34  ;;  %v13339_v55 = vand.u32 4294901760, %v11357_v12 }
 0x396   : > { %13338 = vst [vmem:[#allocation110_spill] sm:$0xff] %v11422_v60  ;;  %v4888_v23 = vmul.f32 %v4856_v63, %v10661_v0  ;;  %v11443_v29 = vmul.f32 %v4849_v4, %v10661_v0  ;;  %v4852_v63 = vsub.f32 %v11224_v36, %v11112_v19  ;;  %v4851_v30 = vsub.f32 %v11243_v32, %v11114_v35  ;;  %v5914_v4 = vld [vmem:[%s12453_s4] sm:$0xff] }
 0x397   : > { %v11367_v31 = vpop.xlane.xlu0 %4812  ;;  %v11440_v45 = vsub.f32 %v11357_v12, %v13339_v55  ;;  %v5915_v12 = vld [vmem:[%s12453_s4 + $0x8] sm:$0xff]  ;;  %v11461_v58 = vand.u32 4294901760, %v11434_v16  ;;  %v4886_v57 = vmul.f32 %v4854_v46, %v10661_v0  ;;  %v12798_v56 = vand.u32 4294901760, %v11431_v6 }
 0x398   : > { %v4855_v14 = vsub.f32 %v11367_v31, %v11145_v43  ;;  %v4913_v46 = vadd.f32 %v11443_v29, %v11110_v59 }
 0x399   : > { %v4950_v59 = vsub.f32 %v11271_v9, %v4886_v57 }
 0x39a   : > { %v4887_v34 = vmul.f32 %v4855_v14, %v10661_v0  ;;  %v4885_v14 = vmul.f32 %v4853_v33, %v10661_v0  ;;  %v4884_v33 = vmul.f32 %v4852_v63, %v10661_v0 }
 0x39b   : > { %v4822_v10 = vpop.xlane.xlu0 %4821 }
 0x39c   : > { %v4858_v22 = vsub.f32 %v4822_v10, %v11149_v53  ;;  %v4951_v60 = vsub.f32 %v11367_v31, %v4887_v34  ;;  %v4917_v63 = vadd.f32 %v4885_v14, %v11132_v61  ;;  %v4949_v31 = vsub.f32 %v11300_v1, %v4885_v14 }
 0x39e   : > { %v4890_v37 = vmul.f32 %v4858_v22, %v10661_v0 }
 0x39f   : > { %v4819_v7 = vpop.xlane.xlu0 %4818 }
 0x3a0   : > { %v4922_v22 = vadd.f32 %v4890_v37, %v11149_v53  ;;  %v4954_v28 = vsub.f32 %v4822_v10, %v4890_v37  ;;  %v4857_v55 = vsub.f32 %v4819_v7, %v11155_v24  ;;  %v4920_v53 = vadd.f32 %v4888_v23, %v11139_v50 }
 0x3a1   : > { %v8022_v10 = vmov 0   ;;  %v4952_v37 = vsub.f32 %v11329_v39, %v4888_v23  ;;  %v4919_v50 = vadd.f32 %v4887_v34, %v11145_v43  ;;  %v4883_v39 = vmul.f32 %v4851_v30, %v10661_v0 }
 0x3a2   : > { %7967 = vset.pattern.permute.xlu0 %v8022_v10  ;;  %7966 = vset.pattern.permute.xlu1 %v8022_v10  ;;  %v4987_v21 = vsel %vm4957_vm2, %v4922_v22, %v4954_v28  ;;  %v4889_v38 = vmul.f32 %v4857_v55, %v10661_v0  ;;  %v11478_v55 = vpop.xlane.xlu1 %4692 }
 0x3a3   : > { %5918 = vperm.xlu0 %7967, %v5914_v4   ;;  %5923 = vperm.xlu1 %7966, %v5915_v12   ;;  %v4825_v10 = vpop.xlane.xlu0 %4824  ;;  %v4918_v12 = vadd.f32 %v4886_v57, %v11119_v48  ;;  %v11483_v43 = vand.u32 4294901760, %v4987_v21  ;;  %v4985_v34 = vsel %vm4957_vm2, %v4920_v53, %v4952_v37  ;;  %v4984_v48 = vsel %vm4957_vm2, %v4919_v50, %v4951_v60 }
 0x3a4   : > { %v4921_v23 = vadd.f32 %v4889_v38, %v11155_v24  ;;  %v4953_v28 = vsub.f32 %v4819_v7, %v4889_v38  ;;  %v4859_v22 = vsub.f32 %v4825_v10, %v11160_v15  ;;  %v4916_v38 = vadd.f32 %v4884_v33, %v11112_v19 }
 0x3a5   : > { %v4948_v7 = vsub.f32 %v11224_v36, %v4884_v33  ;;  %v4915_v9 = vadd.f32 %v4883_v39, %v11114_v35  ;;  %v4947_v1 = vsub.f32 %v11243_v32, %v4883_v39  ;;  %v4983_v19 = vsel %vm4957_vm2, %v4918_v12, %v4950_v59 }
 0x3a6   : > { %v4986_v30 = vsel %vm4957_vm2, %v4921_v23, %v4953_v28  ;;  %v4891_v24 = vmul.f32 %v4859_v22, %v10661_v0  ;;  %v11502_v53 = vand.u32 4294901760, %v4985_v34  ;;  %v11505_v36 = vsub.f32 %v4987_v21, %v11483_v43  ;;  %v11513_v32 = vpop.xlane.xlu1 %4644 }
 0x3a7   : > { %5934 = vperm.xlu1 %7966, %v5931_v44   ;;  %v11492_v57 = vand.u32 4294901760, %v4986_v30  ;;  %v11494_v61 = vpop.xlane.xlu0 %4791  ;;  %v4945_v44 = vsub.f32 %v11200_v5, %v11443_v29  ;;  %v4982_v60 = vsel %vm4957_vm2, %v4917_v63, %v4949_v31  ;;  %v11508_v37 = vand.u32 4294901760, %v4984_v48 }
 0x3a8   : > { %v4923_v4 = vadd.f32 %v4891_v24, %v11160_v15  ;;  %v4955_v14 = vsub.f32 %v4825_v10, %v4891_v24  ;;  %v4848_v15 = vsub.f32 %v11494_v61, %v11390_v13  ;;  %v5132_v21 = vsub.f32 %v11431_v6, %v12798_v56 }
 0x3a9   : > { %13340 = vst [vmem:[#allocation111_spill] sm:$0xff] %v11492_v57  ;;  %13341 = vst [vmem:[#allocation112_spill] sm:$0xff] %v11508_v37  ;;  %v11516_v5 = vsub.f32 %v4986_v30, %v11492_v57  ;;  %v4981_v10 = vsel %vm4957_vm2, %v4916_v38, %v4948_v7  ;;  %v4980_v39 = vsel %vm4957_vm2, %v4915_v9, %v4947_v1  ;;  %v11528_v23 = vand.u32 4294901760, %v4983_v19 }
 0x3aa   : > { %v4988_v35 = vsel %vm4957_vm2, %v4923_v4, %v4955_v14  ;;  %v11532_v22 = vand.u32 4294901760, %v4982_v60  ;;  %v11535_v12 = vsub.f32 %v4985_v34, %v11502_v53  ;;  %v12802_v63 = vand.u32 4294901760, %v11505_v36 }
 0x3ab   : > { %v11518_v29 = vand.u32 4294901760, %v4988_v35  ;;  %v11520_v33 = vpop.xlane.xlu0 %4743  ;;  %v11544_v31 = vsub.f32 %v11434_v16, %v11461_v58  ;;  %v11547_v30 = vsel %vm4957_vm2, %v4913_v46, %v4945_v44  ;;  %v11550_v24 = vsub.f32 %v4984_v48, %v11508_v37  ;;  %v11567_v44 = vpop.xlane.xlu1 %4689 }
 0x3ac   : > { %v4832_v28 = vsub.f32 %v11520_v33, %v11445_v49  ;;  %v4880_v34 = vmul.f32 %v4848_v15, %v10661_v0  ;;  %v5133_v1 = vand.u32 4294901760, %v5132_v21  ;;  %v11558_v4 = vand.u32 4294901760, %v4981_v10 }
 0x3ad   : > { %v11538_v59 = vsub.f32 %v4988_v35, %v11518_v29  ;;  %7038 = vmatprep.subr.mxu0 %v11518_v29  ;;  %v11560_v46 = vand.u32 4294901760, %v4980_v39  ;;  %v11563_v48 = vsub.f32 %v4983_v19, %v11528_v23  ;;  %v11570_v35 = vsub.f32 %v4982_v60, %v11532_v22 }
 0x3ae   : > { %7039 = vmatpush3.msra.mxu0 %v11401_v42  ;;  %v4864_v38 = vmul.f32 %v4832_v28, %v10661_v0  ;;  %v5251_v19 = vsub.f32 %v11505_v36, %v12802_v63  ;;  %v4912_v28 = vadd.f32 %v4880_v34, %v11390_v13  ;;  %v4944_v56 = vsub.f32 %v11494_v61, %v4880_v34 }
 0x3af   : > { %7040 = vmatprep.subr.mxu0 %v11483_v43  ;;  %v4789_v7 = vpop.xlane.xlu0 %4788  ;;  %v12799_v9 = vand.u32 4294901760, %v11538_v59  ;;  %13342 = vst [vmem:[#allocation113_spill] sm:$0xff] %v11560_v46  ;;  %v13343_v21 = vand.u32 4294901760, %v11516_v5  ;;  %v11592_v61 = vsub.f32 %v4981_v10, %v11558_v4 }
 0x3b0   : > { %v4847_v14 = vsub.f32 %v4789_v7, %v11478_v55  ;;  %7041 = vmatpush3.msra.mxu0 %v11287_v17  ;;  %v4896_v16 = vadd.f32 %v4864_v38, %v11445_v49  ;;  %v11598_v49 = vsub.f32 %v4980_v39, %v11560_v46  ;;  %v12805_v39 = vand.u32 4294901760, %v11570_v35 }
 0x3b1   : > { %7042 = vmatprep.subr.mxu0 %v11492_v57  ;;  %v5244_v15 = vsub.f32 %v11538_v59, %v12799_v9  ;;  %v4928_v9 = vsub.f32 %v11520_v33, %v4864_v38  ;;  %v5258_v13 = vsub.f32 %v11516_v5, %v13343_v21  ;;  %v5252_v33 = vand.u32 4294901760, %v5251_v19 }
 0x3b2   : > { %v4879_v50 = vmul.f32 %v4847_v14, %v10661_v0  ;;  %7043 = vmatpush3.msra.mxu0 %v11314_v27  ;;  %v13344_v38 = vand.u32 4294901760, %v11535_v12 }
 0x3b3   : > { %7044 = vmatprep.subr.mxu0 %v11502_v53  ;;  %v4741_v57 = vpop.xlane.xlu0 %4740  ;;  %v5245_v63 = vand.u32 4294901760, %v5244_v15  ;;  %v4961_v19 = vsel %vm4957_vm2, %v4896_v16, %v4928_v9  ;;  %v5259_v10 = vand.u32 4294901760, %v5258_v13  ;;  %v13347_v9 = vand.u32 4294901760, %v11397_v11 }
 0x3b4   : > { %v4911_v34 = vadd.f32 %v4879_v50, %v11478_v55  ;;  %v4943_v14 = vsub.f32 %v4789_v7, %v4879_v50  ;;  %v4831_v60 = vsub.f32 %v4741_v57, %v11513_v32  ;;  %7045 = vmatpush3.msra.mxu0 %v11277_v2  ;;  %v5265_v15 = vsub.f32 %v11535_v12, %v13344_v38 }
 0x3b5   : > { %7046 = vmatprep.subr.mxu0 %v11508_v37  ;;  %7076 = vmatprep.subr.mxu1 %v5245_v63  ;;  %v11606_v55 = vand.u32 4294901760, %v11547_v30  ;;  %v4977_v50 = vsel %vm4957_vm2, %v4912_v28, %v4944_v56  ;;  %v4642_v63 = vpop.xlane.xlu1 %4641  ;;  %v13346_v37 = vand.u32 4294901760, %v11550_v24  ;;  %v11635_v11 = vand.u32 4294901760, %v4961_v19 }
 0x3b6   : > { %v4863_v7 = vmul.f32 %v4831_v60, %v10661_v0  ;;  %7047 = vmatpush3.msra.mxu0 %v11279_v3  ;;  %7077 = vmatpush3.msra.mxu1 %v5133_v1  ;;  %v4976_v21 = vsel %vm4957_vm2, %v4911_v34, %v4943_v14  ;;  %v11624_v34 = vand.u32 4294901760, %v4977_v50  ;;  %v5266_v13 = vand.u32 4294901760, %v5265_v15 }
 0x3b7   : > { %13345 = vst [vmem:[#allocation114_spill] sm:$0xff] %v11606_v55  ;;  %7048 = vmatprep.subr.mxu0 %v11528_v23  ;;  %7078 = vmatprep.subr.mxu1 %v5252_v33  ;;  %v4786_v38 = vpop.xlane.xlu0 %4785  ;;  %v5272_v56 = vsub.f32 %v11550_v24, %v13346_v37  ;;  %v13349_v37 = vand.u32 4294901760, %v11563_v48  ;;  %v11633_v14 = vsub.f32 %v11547_v30, %v11606_v55  ;;  %v13350_v15 = vand.u32 4294901760, %v11440_v45 }
 0x3b8   : > { %v4895_v28 = vadd.f32 %v4863_v7, %v11513_v32  ;;  %v4927_v60 = vsub.f32 %v4741_v57, %v4863_v7  ;;  %v4846_v1 = vsub.f32 %v4786_v38, %v11567_v44  ;;  %7049 = vmatpush3.msra.mxu0 %v11255_v41  ;;  %7079 = vmatpush3.msra.mxu1 %v13347_v9  ;;  %v13352_v45 = vand.u32 4294901760, %v11380_v52 }
 0x3b9   : > { %13348 = vst [vmem:[#allocation115_spill] sm:$0xff] %v11624_v34  ;;  %7050 = vmatprep.subr.mxu0 %v11532_v22  ;;  %7080 = vmatprep.subr.mxu1 %v5259_v10  ;;  %v5279_v32 = vsub.f32 %v11563_v48, %v13349_v37  ;;  %v11642_v10 = vand.u32 4294901760, %v4976_v21  ;;  %v5273_v37 = vand.u32 4294901760, %v5272_v56  ;;  %v4687_v16 = vpop.xlane.xlu1 %4686  ;;  %v11666_v52 = vsub.f32 %v4961_v19, %v11635_v11 }
 0x3ba   : > { %v4960_v33 = vsel %vm4957_vm2, %v4895_v28, %v4927_v60  ;;  %v4878_v7 = vmul.f32 %v4846_v1, %v10661_v0  ;;  %7051 = vmatpush3.msra.mxu0 %v11296_v40  ;;  %7081 = vmatpush3.msra.mxu1 %v13350_v15  ;;  %v5286_v28 = vsub.f32 %v11570_v35, %v12805_v39  ;;  %v13353_v39 = vand.u32 4294901760, %v11592_v61 }
 0x3bb   : > { %v11644_v9 = vand.u32 4294901760, %v4960_v33  ;;  %7052 = vmatprep.subr.mxu0 %v11558_v4  ;;  %7082 = vmatprep.subr.mxu1 %v5266_v13  ;;  %v4738_v30 = vpop.xlane.xlu0 %4737  ;;  %v11656_v13 = vsub.f32 %v4977_v50, %v11624_v34  ;;  %v5280_v56 = vand.u32 4294901760, %v5279_v32  ;;  %v12808_v32 = vand.u32 4294901760, %v11633_v14 }
 0x3bc   : > { %v4910_v60 = vadd.f32 %v4878_v7, %v11567_v44  ;;  %v4942_v1 = vsub.f32 %v4786_v38, %v4878_v7  ;;  %v4830_v57 = vsub.f32 %v4738_v30, %v4642_v63  ;;  %7053 = vmatpush3.msra.mxu0 %v11249_v18  ;;  %7083 = vmatpush3.msra.mxu1 %v13352_v45  ;;  %v13354_v38 = vand.u32 4294901760, %v11598_v49 }
 0x3bd   : > { %13351 = vst [vmem:[#allocation116_spill] sm:$0xff] %v11644_v9  ;;  %7054 = vmatprep.subr.mxu0 %v11560_v46  ;;  %7084 = vmatprep.subr.mxu1 %v5273_v37  ;;  %v5293_v44 = vsub.f32 %v11592_v61, %v13353_v39  ;;  %v13355_v37 = vand.u32 4294901760, %v11385_v20  ;;  %v11675_v39 = vsub.f32 %v4976_v21, %v11642_v10  ;;  %v13356_v20 = vand.u32 4294901760, %v11346_v47 }
 0x3be   : > { %v5300_v7 = vsub.f32 %v11598_v49, %v13354_v38  ;;  %v4975_v45 = vsel %vm4957_vm2, %v4910_v60, %v4942_v1  ;;  %v4862_v50 = vmul.f32 %v4830_v57, %v10661_v0  ;;  %7055 = vmatpush3.msra.mxu0 %v11253_v54  ;;  %v11678_v15 = vsub.f32 %v4960_v33, %v11644_v9 }
 0x3bf   : > { %7085 = vmatpush3.msra.mxu1 %v13355_v37  ;;  %v11680_v38 = vand.u32 4294901760, %v4975_v45  ;;  %7056 = vmatprep.subr.mxu0 %v11461_v58  ;;  %v4783_v19 = vpop.xlane.xlu0 %4782  ;;  %v5287_v57 = vand.u32 4294901760, %v5286_v28  ;;  %v5175_v21 = vand.u32 4294901760, %v11413_v25  ;;  %v5294_v37 = vand.u32 4294901760, %v5293_v44  ;;  %v13369_v25 = vld [vmem:[#allocation107_spill] sm:$0xff] }
 0x3c0   : > { %7086 = vmatprep.subr.mxu1 %v5280_v56  ;;  %v4894_v60 = vadd.f32 %v4862_v50, %v4642_v63  ;;  %v4926_v1 = vsub.f32 %v4738_v30, %v4862_v50  ;;  %v4845_v54 = vsub.f32 %v4783_v19, %v4687_v16  ;;  %7057 = vmatpush3.msra.mxu0 %v11211_v62  ;;  %v13358_v56 = vand.u32 4294901760, %v11544_v31  ;;  %v4639_v50 = vpop.xlane.xlu1 %4638 }
 0x3c1   : > { %7087 = vmatpush3.msra.mxu1 %v13356_v20  ;;  %v11688_v33 = vsub.f32 %v4975_v45, %v11680_v38  ;;  %7058 = vmatprep.subr.mxu0 %v11606_v55  ;;  %v12809_v30 = vand.u32 4294901760, %v11656_v13  ;;  %v5301_v20 = vand.u32 4294901760, %v5300_v7  ;;  %v13359_v45 = vand.u32 4294901760, %v11337_v26 }
 0x3c2   : > { %7088 = vmatprep.subr.mxu1 %v5287_v57  ;;  %v5307_v63 = vsub.f32 %v11544_v31, %v13358_v56  ;;  %v4959_v28 = vsel %vm4957_vm2, %v4894_v60, %v4926_v1  ;;  %v4877_v47 = vmul.f32 %v4845_v54, %v10661_v0  ;;  %7059 = vmatpush3.msra.mxu0 %v11265_v51 }
 0x3c3   : > { %13357 = vst [vmem:[#allocation117_spill] sm:$0xff] %v11688_v33  ;;  %7089 = vmatpush3.msra.mxu1 %v5175_v21  ;;  %v11700_v57 = vand.u32 4294901760, %v4959_v28  ;;  %7060 = vmatprep.subr.mxu0 %v11624_v34  ;;  %v4735_v44 = vpop.xlane.xlu0 %4734  ;;  %v5314_v60 = vsub.f32 %v11633_v14, %v12808_v32 }
 0x3c4   : > { %7090 = vmatprep.subr.mxu1 %v5294_v37  ;;  %v4909_v1 = vadd.f32 %v4877_v47, %v4687_v16  ;;  %v4941_v21 = vsub.f32 %v4783_v19, %v4877_v47  ;;  %v4829_v56 = vsub.f32 %v4735_v44, %v4639_v50  ;;  %7061 = vmatpush3.msra.mxu0 %v11635_v11  ;;  %v5308_v7 = vand.u32 4294901760, %v5307_v63  ;;  %v13364_v63 = vld [vmem:[#allocation110_spill] sm:$0xff] }
 0x3c5   : > { %7091 = vmatpush3.msra.mxu1 %v13359_v45  ;;  %v11712_v37 = vsub.f32 %v4959_v28, %v11700_v57  ;;  %7062 = vmatprep.subr.mxu0 %v11642_v10  ;;  %v5321_v16 = vsub.f32 %v11656_v13, %v12809_v30  ;;  %v13361_v45 = vld [vmem:[#allocation104_spill] sm:$0xff]  ;;  %v13363_v28 = vand.u32 4294901760, %v11666_v52  ;;  %v5315_v30 = vand.u32 4294901760, %v5314_v60  ;;  %v13367_v19 = vld [vmem:[#allocation102_spill] sm:$0xff] }
 0x3c6   : > { %7092 = vmatprep.subr.mxu1 %v5301_v20  ;;  %v4974_v47 = vsel %vm4957_vm2, %v4909_v1, %v4941_v21  ;;  %v4861_v26 = vmul.f32 %v4829_v56, %v10661_v0  ;;  %7063 = vmatpush3.msra.mxu0 %v11644_v9  ;;  %v13362_v32 = vand.u32 4294901760, %v13361_v45  ;;  %v13366_v1 = vand.u32 4294901760, %v11675_v39 }
 0x3c7   : > { %13360 = vst [vmem:[#allocation118_spill] sm:$0xff] %v11712_v37  ;;  %v5209_v20 = vsub.f32 %v11666_v52, %v13363_v28  ;;  %v11728_v54 = vand.u32 4294901760, %v4974_v47  ;;  %7064 = vmatprep.subr.mxu0 %v11680_v38  ;;  %v12816_v56 = vand.u32 4294901760, %v11712_v37  ;;  %v13368_v28 = vand.u32 4294901760, %v13367_v19 }
 0x3c8   : > { %7093 = vmatpush3.msra.mxu1 %v13362_v32  ;;  %v5328_v21 = vsub.f32 %v11675_v39, %v13366_v1  ;;  %v4893_v45 = vadd.f32 %v4861_v26, %v4639_v50  ;;  %v4925_v32 = vsub.f32 %v4735_v44, %v4861_v26  ;;  %7065 = vmatpush3.msra.mxu0 %v11700_v57  ;;  %v5203_v0 = vand.u32 4294901760, %v13369_v25  ;;  %v13372_v50 = vld [vmem:[#allocation106_spill] sm:$0xff] }
 0x3c9   : > { %13365 = vst [vmem:[#allocation104_spill] sm:$0xff] %v11728_v54  ;;  %7094 = vmatprep.subr.mxu1 %v5308_v7  ;;  %v13370_v9 = vand.u32 4294901760, %v11678_v15  ;;  %v11743_v60 = vsub.f32 %v4974_v47, %v11728_v54  ;;  %7066 = vmatprep.subr.mxu0 %v11728_v54  ;;  %v5322_v1 = vand.u32 4294901760, %v5321_v16  ;;  %v5100_v44 = vand.u32 4294901760, %v13372_v50 }
 0x3ca   : > { %7095 = vmatpush3.msra.mxu1 %v13368_v28  ;;  %v13373_v26 = vand.u32 4294901760, %v11688_v33  ;;  %v4958_v28 = vsel %vm4957_vm2, %v4893_v45, %v4925_v32  ;;  %v5210_v25 = vand.u32 4294901760, %v5209_v20  ;;  %v13374_v47 = vand.u32 4294901760, %v11416_v8 }
 0x3cb   : > { %v5216_v7 = vsub.f32 %v11678_v15, %v13370_v9  ;;  %13371 = vst [vmem:[#allocation102_spill] sm:$0xff] %v11743_v60  ;;  %7096 = vmatprep.subr.mxu1 %v5315_v30  ;;  %v5223_v9 = vsub.f32 %v11712_v37, %v12816_v56  ;;  %v11757_v30 = vand.u32 4294901760, %v4958_v28  ;;  %v5329_v16 = vand.u32 4294901760, %v5328_v21  ;;  %v13377_v21 = vld [vmem:[#allocation89_spill] sm:$0xff] }
 0x3cc   : > { %v5335_v19 = vsub.f32 %v11688_v33, %v13373_v26  ;;  %7097 = vmatpush3.msra.mxu1 %v5203_v0  ;;  %v5108_v54 = vsub.f32 %v11416_v8, %v13374_v47  ;;  %v12818_v50 = vand.u32 4294901760, %v11743_v60  ;;  %v13375_v26 = vand.u32 4294901760, %v13364_v63 }
 0x3cd   : > { %7098 = vmatprep.subr.mxu1 %v5322_v1  ;;  %v5217_v0 = vand.u32 4294901760, %v5216_v7  ;;  %v11764_v20 = vsub.f32 %v4958_v28, %v11757_v30  ;;  %7067 = vmatpush3.msra.mxu0 %v11757_v30  ;;  %v5224_v47 = vand.u32 4294901760, %v5223_v9  ;;  %v13380_v9 = vld [vmem:[#allocation85_spill] sm:$0xff] }
 0x3ce   : > { %v5114_v45 = vsub.f32 %v13364_v63, %v13375_v26  ;;  %7099 = vmatpush3.msra.mxu1 %v5210_v25  ;;  %v5336_v32 = vand.u32 4294901760, %v5335_v19  ;;  %v5342_v1 = vsub.f32 %v11743_v60, %v12818_v50  ;;  %7112 = vmatprep.subr.mxu0 %v13377_v21  ;;  %v5109_v56 = vand.u32 4294901760, %v5108_v54  ;;  %v13378_v26 = vld [vmem:[#allocation87_spill] sm:$0xff]  ;;  %v13395_v63 = vld [vmem:[#allocation90_spill] sm:$0xff] }
 0x3cf   : > { %13376 = vst [vmem:[#allocation107_spill] sm:$0xff] %v11764_v20  ;;  %7100 = vmatprep.subr.mxu1 %v5329_v16  ;;  %5101 = vmatmul.mubr.f32.vlgmr.msra.gmra.mxu0 %v5100_v44  ;;  %v12817_v7 = vand.u32 4294901760, %v11764_v20  ;;  %v13379_v44 = vld [vmem:[#allocation101_spill] sm:$0xff]  ;;  %v13393_v50 = vld [vmem:[#allocation91_spill] sm:$0xff] }
 0x3d0   : > { %7101 = vmatpush3.msra.mxu1 %v5217_v0  ;;  %v5343_v25 = vand.u32 4294901760, %v5342_v1  ;;  %v5115_v28 = vand.u32 4294901760, %v5114_v45  ;;  %7113 = vmatpush3.msra.mxu0 %v13378_v26  ;;  %v13381_v16 = vld [vmem:[#allocation105_spill] sm:$0xff]  ;;  %v13382_v45 = vld [vmem:[#allocation88_spill] sm:$0xff] }
 0x3d1   : > { %7102 = vmatprep.subr.mxu1 %v5336_v32  ;;  %7114 = vmatprep.subr.mxu0 %v11538_v59  ;;  %v5230_v19 = vsub.f32 %v11764_v20, %v12817_v7  ;;  %v13383_v0 = vld [vmem:[#allocation92_spill] sm:$0xff]  ;;  %v13385_v32 = vld [vmem:[#allocation86_spill] sm:$0xff]  ;;  %v13392_v7 = vld [vmem:[#allocation95_spill] sm:$0xff] }
 0x3d2   : > { %7103 = vmatpush3.msra.mxu1 %v5224_v47  ;;  %7115 = vmatpush3.msra.mxu0 %v11431_v6  ;;  %v13386_v1 = vld [vmem:[#allocation100_spill] sm:$0xff] }
 0x3d3   : > { %7104 = vmatprep.subr.mxu1 %v5343_v25  ;;  %5110 = vmatprep.mubr.f32.mxu0 %v5109_v56  ;;  %v5231_v54 = vand.u32 4294901760, %v5230_v19  ;;  %v13384_v56 = vld [vmem:[#allocation99_spill] sm:$0xff]  ;;  %v13387_v47 = vld [vmem:[#allocation96_spill] sm:$0xff]  ;;  %v13390_v19 = vld [vmem:[#allocation94_spill] sm:$0xff] }
 0x3d4   : > { %7116 = vmatprep.subr.mxu0 %v11505_v36  ;;  %5116 = vmatmul.mubr.f32.gmra.mxu0 %v5115_v28  ;;  %v13388_v25 = vld [vmem:[#allocation111_spill] sm:$0xff] }
 0x3d5   : > { %7117 = vmatpush3.msra.mxu0 %v13379_v44  ;;  %5490 = vmatprep.mubr.f32.mxu0 %v13380_v9  ;;  %v13389_v28 = vld [vmem:[#allocation103_spill] sm:$0xff] }
 0x3d6   : > { %7118 = vmatprep.subr.mxu0 %v11516_v5  ;;  %7105 = vmatpush3.msra.mxu1 %v5231_v54  ;;  %v13391_v54 = vld [vmem:[#allocation112_spill] sm:$0xff] }
 0x3d7   : > { %7119 = vmatpush3.msra.mxu0 %v13381_v16  ;;  %7150 = vmatprep.subr.mxu1 %v13382_v45 }
 0x3d8   : > { %7120 = vmatprep.subr.mxu0 %v11535_v12  ;;  %5348 = vmatmul.mubr.f32.vlgmr.msra.gmra.mxu1 %v13383_v0  ;;  %v13394_v0 = vld [vmem:[#allocation98_spill] sm:$0xff] }
 0x3d9   : > { %7121 = vmatpush3.msra.mxu0 %v13384_v56  ;;  %7151 = vmatpush3.msra.mxu1 %v13385_v32 }
 0x3da   : > { %7122 = vmatprep.subr.mxu0 %v11550_v24  ;;  %7152 = vmatprep.subr.mxu1 %v11518_v29 }
 0x3db   : > { %7123 = vmatpush3.msra.mxu0 %v13386_v1  ;;  %7153 = vmatpush3.msra.mxu1 %v11401_v42 }
 0x3dc   : > { %7124 = vmatprep.subr.mxu0 %v11563_v48  ;;  %7154 = vmatprep.subr.mxu1 %v11483_v43 }
 0x3dd   : > { %7125 = vmatpush3.msra.mxu0 %v13387_v47  ;;  %7155 = vmatpush3.msra.mxu1 %v11287_v17 }
 0x3de   : > { %7126 = vmatprep.subr.mxu0 %v11570_v35  ;;  %7156 = vmatprep.subr.mxu1 %v13388_v25 }
 0x3df   : > { %7127 = vmatpush3.msra.mxu0 %v13389_v28  ;;  %7157 = vmatpush3.msra.mxu1 %v11314_v27 }
 0x3e0   : > { %7128 = vmatprep.subr.mxu0 %v11592_v61  ;;  %7158 = vmatprep.subr.mxu1 %v11502_v53 }
 0x3e1   : > { %7129 = vmatpush3.msra.mxu0 %v13390_v19  ;;  %7159 = vmatpush3.msra.mxu1 %v11277_v2 }
 0x3e2   : > { %7130 = vmatprep.subr.mxu0 %v11598_v49  ;;  %7160 = vmatprep.subr.mxu1 %v13391_v54 }
 0x3e3   : > { %7131 = vmatpush3.msra.mxu0 %v13392_v7  ;;  %7161 = vmatpush3.msra.mxu1 %v11279_v3 }
 0x3e4   : > { %7132 = vmatprep.subr.mxu0 %v11544_v31  ;;  %7162 = vmatprep.subr.mxu1 %v11528_v23 }
 0x3e5   : > { %7133 = vmatpush3.msra.mxu0 %v13393_v50  ;;  %7163 = vmatpush3.msra.mxu1 %v11255_v41 }
 0x3e6   : > { %7134 = vmatprep.subr.mxu0 %v11633_v14  ;;  %7164 = vmatprep.subr.mxu1 %v11532_v22 }
 0x3e7   : > { %7135 = vmatpush3.msra.mxu0 %v13394_v0  ;;  %7165 = vmatpush3.msra.mxu1 %v11296_v40 }
 0x3e8   : > { %7136 = vmatprep.subr.mxu0 %v11656_v13  ;;  %7166 = vmatprep.subr.mxu1 %v11558_v4 }
 0x3e9   : > { %7137 = vmatpush3.msra.mxu0 %v11666_v52  ;;  %7167 = vmatpush3.msra.mxu1 %v11249_v18 }
 0x3ea   : > { %7138 = vmatprep.subr.mxu0 %v11675_v39  ;;  %7168 = vmatprep.subr.mxu1 %v11560_v46  ;;  %v13396_v46 = vld [vmem:[#allocation97_spill] sm:$0xff] }
 0x3eb   : > { %7139 = vmatpush3.msra.mxu0 %v11678_v15  ;;  %7169 = vmatpush3.msra.mxu1 %v13395_v63 }
 0x3ec   : > { %7140 = vmatprep.subr.mxu0 %v11688_v33  ;;  %7170 = vmatprep.subr.mxu1 %v11461_v58  ;;  %v13397_v33 = vand.u32 4294901760, %v13377_v21  ;;  %v13411_v21 = vand.u32 4294901760, %v11535_v12  ;;  %v13415_v12 = vand.u32 4294901760, %v11563_v48  ;;  %v13422_v48 = vand.u32 4294901760, %v13392_v7  ;;  %v13444_v7 = vld [vmem:[#allocation84_spill] sm:$0xff] }
 0x3ed   : > { %7141 = vmatpush3.msra.mxu0 %v11712_v37  ;;  %7171 = vmatpush3.msra.mxu1 %v11211_v62  ;;  %v13398_v37 = vand.u32 4294901760, %v13378_v26  ;;  %v13412_v26 = vand.u32 4294901760, %v13384_v56 }
 0x3ee   : > { %7142 = vmatprep.subr.mxu0 %v11743_v60  ;;  %7172 = vmatprep.subr.mxu1 %v11606_v55  ;;  %v13399_v55 = vand.u32 4294901760, %v11538_v59  ;;  %v13402_v60 = vand.u32 4294901760, %v11431_v6  ;;  %v13406_v59 = vld [vmem:[#allocation104_spill] sm:$0xff]  ;;  %v13408_v6 = vand.u32 4294901760, %v13380_v9 }
 0x3ef   : > { %7143 = vmatpush3.msra.mxu0 %v11764_v20  ;;  %7173 = vmatpush3.msra.mxu1 %v11265_v51  ;;  %v13400_v20 = vld [vmem:[#allocation108_spill] sm:$0xff] }
 0x3f0   : > { %5493 = vmatmul.mubr.f32.vlgmr.msra.gmra.mxu0 %v13396_v46  ;;  %7174 = vmatprep.subr.mxu1 %v11624_v34  ;;  %v13401_v51 = vld [vmem:[#allocation116_spill] sm:$0xff]  ;;  %v13403_v34 = vld [vmem:[#allocation109_spill] sm:$0xff] }
 0x3f1   : > { %7188 = vmatprep.subr.mxu0 %v13397_v33  ;;  %7175 = vmatpush3.msra.mxu1 %v11635_v11  ;;  %v13404_v33 = vand.u32 4294901760, %v11505_v36  ;;  %v13410_v36 = vand.u32 4294901760, %v13396_v46  ;;  %v13416_v46 = vand.u32 4294901760, %v13387_v47  ;;  %v13446_v9 = vld [vmem:[#allocation92_spill] sm:$0xff] }
 0x3f2   : > { %7189 = vmatpush3.msra.mxu0 %v13398_v37  ;;  %7176 = vmatprep.subr.mxu1 %v11642_v10  ;;  %v13405_v37 = vand.u32 4294901760, %v13379_v44  ;;  %v13414_v44 = vand.u32 4294901760, %v13386_v1 }
 0x3f3   : > { %7190 = vmatprep.subr.mxu0 %v13399_v55  ;;  %5353 = vmatprep.mubr.f32.mxu1 %v13400_v20  ;;  %v13407_v55 = vand.u32 4294901760, %v11516_v5  ;;  %v13413_v5 = vand.u32 4294901760, %v11550_v24  ;;  %v13417_v24 = vand.u32 4294901760, %v11570_v35  ;;  %v13426_v35 = vand.u32 4294901760, %v13394_v0 }
 0x3f4   : > { %7177 = vmatpush3.msra.mxu1 %v13401_v51  ;;  %7191 = vmatpush3.msra.mxu0 %v13402_v60  ;;  %v13409_v60 = vand.u32 4294901760, %v13381_v16 }
 0x3f5   : > { %5355 = vmatmul.mubr.f32.gmra.mxu1 %v13403_v34  ;;  %7178 = vmatprep.subr.mxu1 %v11680_v38 }
 0x3f6   : > { %7192 = vmatprep.subr.mxu0 %v13404_v33  ;;  %7179 = vmatpush3.msra.mxu1 %v11700_v57 }
 0x3f7   : > { %7193 = vmatpush3.msra.mxu0 %v13405_v37  ;;  %7180 = vmatprep.subr.mxu1 %v13406_v59 }
 0x3f8   : > { %7194 = vmatprep.subr.mxu0 %v13407_v55  ;;  %7181 = vmatpush3.msra.mxu1 %v11757_v30  ;;  %v5930_v55 = vld [vmem:[%s12454_s5] sm:$0x1] }
 0x3f9   : > { %5606 = vmatprep.mubr.f32.mxu1 %v13408_v6  ;;  %7195 = vmatpush3.msra.mxu0 %v13409_v60 }
 0x3fa   : > { %5610 = vmatmul.mubr.f32.vlgmr.msra.gmra.mxu1 %v13410_v36  ;;  %7196 = vmatprep.subr.mxu0 %v13411_v21 }
 0x3fb   : > { %7226 = vmatprep.subr.mxu1 %v13382_v45  ;;  %7197 = vmatpush3.msra.mxu0 %v13412_v26  ;;  %v5942_v26 = vsel %vm536_vm0, %v5930_v55, 0 }
 0x3fc   : > { %7227 = vmatpush3.msra.mxu1 %v13385_v32  ;;  %7198 = vmatprep.subr.mxu0 %v13413_v5 }
 0x3fd   : > { %7228 = vmatprep.subr.mxu1 %v11518_v29  ;;  %7199 = vmatpush3.msra.mxu0 %v13414_v44  ;;  %v13418_v29 = vand.u32 4294901760, %v13389_v28 }
 0x3fe   : > { %7229 = vmatpush3.msra.mxu1 %v11401_v42  ;;  %7200 = vmatprep.subr.mxu0 %v13415_v12  ;;  %v13419_v42 = vand.u32 4294901760, %v11592_v61 }
 0x3ff   : > { %7230 = vmatprep.subr.mxu1 %v11483_v43  ;;  %7201 = vmatpush3.msra.mxu0 %v13416_v46  ;;  %v13420_v43 = vand.u32 4294901760, %v13390_v19 }
 0x400   : > { %7231 = vmatpush3.msra.mxu1 %v11287_v17  ;;  %7202 = vmatprep.subr.mxu0 %v13417_v24  ;;  %v13421_v17 = vand.u32 4294901760, %v11598_v49 }
 0x401   : > { %7232 = vmatprep.subr.mxu1 %v13388_v25  ;;  %7203 = vmatpush3.msra.mxu0 %v13418_v29 }
 0x402   : > { %7233 = vmatpush3.msra.mxu1 %v11314_v27  ;;  %7204 = vmatprep.subr.mxu0 %v13419_v42  ;;  %v13423_v27 = vand.u32 4294901760, %v11544_v31  ;;  %v13431_v31 = vand.u32 4294901760, %v11675_v39  ;;  %v13441_v39 = vld [vmem:[#allocation114_spill] sm:$0xff] }
 0x403   : > { %7234 = vmatprep.subr.mxu1 %v11502_v53  ;;  %7205 = vmatpush3.msra.mxu0 %v13420_v43  ;;  %v13424_v53 = vand.u32 4294901760, %v13393_v50  ;;  %v13442_v50 = vld [vmem:[#allocation107_spill] sm:$0xff] }
 0x404   : > { %7235 = vmatpush3.msra.mxu1 %v11277_v2  ;;  %7206 = vmatprep.subr.mxu0 %v13421_v17  ;;  %v13425_v2 = vand.u32 4294901760, %v11633_v14 }
 0x405   : > { %7236 = vmatprep.subr.mxu1 %v13391_v54  ;;  %7207 = vmatpush3.msra.mxu0 %v13422_v48  ;;  %v11967_v48 = vand.u32 4294901760, %v5942_v26 }
 0x406   : > { %7237 = vmatpush3.msra.mxu1 %v11279_v3  ;;  %7208 = vmatprep.subr.mxu0 %v13423_v27  ;;  %v13427_v3 = vand.u32 4294901760, %v11656_v13  ;;  %v13439_v13 = vld [vmem:[#allocation102_spill] sm:$0xff] }
 0x407   : > { %7238 = vmatprep.subr.mxu1 %v11528_v23  ;;  %7209 = vmatpush3.msra.mxu0 %v13424_v53  ;;  %v13428_v23 = vld [vmem:[#allocation110_spill] sm:$0xff] }
 0x408   : > { %7239 = vmatpush3.msra.mxu1 %v11255_v41  ;;  %7210 = vmatprep.subr.mxu0 %v13425_v2  ;;  %v13429_v41 = vand.u32 4294901760, %v11666_v52  ;;  %v13433_v61 = vand.u32 4294901760, %v13428_v23  ;;  %v13440_v52 = vand.u32 4294901760, %v13439_v13 }
 0x409   : > { %7240 = vmatprep.subr.mxu1 %v11532_v22  ;;  %7211 = vmatpush3.msra.mxu0 %v13426_v35  ;;  %v13430_v22 = vand.u32 4294901760, %v11416_v8 }
 0x40a   : > { %7241 = vmatpush3.msra.mxu1 %v11296_v40  ;;  %5499 = vmatprep.mubr.f32.mxu0 %v11416_v8  ;;  %v13432_v40 = vld [vmem:[#allocation113_spill] sm:$0xff]  ;;  %v13437_v8 = vld [vmem:[#allocation118_spill] sm:$0xff] }
 0x40b   : > { %7212 = vmatprep.subr.mxu0 %v13427_v3  ;;  %7242 = vmatprep.subr.mxu1 %v11558_v4  ;;  %v13434_v4 = vand.u32 4294901760, %v11678_v15  ;;  %v13438_v14 = vand.u32 4294901760, %v13437_v8  ;;  %v13443_v15 = vand.u32 4294901760, %v13442_v50 }
 0x40c   : > { %5502 = vmatmul.mubr.f32.gmra.mxu0 %v13428_v23  ;;  %7243 = vmatpush3.msra.mxu1 %v11249_v18  ;;  %v13435_v18 = vld [vmem:[#allocation117_spill] sm:$0xff] }
 0x40d   : > { %7213 = vmatpush3.msra.mxu0 %v13429_v41  ;;  %5617 = vmatprep.mubr.f32.mxu1 %v13430_v22  ;;  %v13436_v49 = vand.u32 4294901760, %v13435_v18 }
 0x40e   : > { %7214 = vmatprep.subr.mxu0 %v13431_v31  ;;  %7244 = vmatprep.subr.mxu1 %v13432_v40  ;;  %v6012_v40 = vsub.f32 %v5942_v26, %v11967_v48 }
 0x40f   : > { %5621 = vmatmul.mubr.f32.gmra.mxu1 %v13433_v61  ;;  %7215 = vmatpush3.msra.mxu0 %v13434_v4 }
 0x410   : > { %7245 = vmatpush3.msra.mxu1 %v13395_v63  ;;  %7216 = vmatprep.subr.mxu0 %v13436_v49  ;;  %v13445_v63 = vld [vmem:[#allocation93_spill] sm:$0xff] }
 0x411   : > { %7246 = vmatprep.subr.mxu1 %v11461_v58  ;;  %7217 = vmatpush3.msra.mxu0 %v13438_v14  ;;  %v13447_v58 = vld [vmem:[#allocation115_spill] sm:$0xff]  ;;  %v6013_v14 = vand.u32 4294901760, %v6012_v40 }
 0x412   : > { %7247 = vmatpush3.msra.mxu1 %v11211_v62  ;;  %7218 = vmatprep.subr.mxu0 %v13440_v52  ;;  %v8023_v62 = vmov 0.0  }
 0x413   : > { %7248 = vmatprep.subr.mxu1 %v13441_v39  ;;  %7219 = vmatpush3.msra.mxu0 %v13443_v15 }
 0x414   : > { %5787 = vmatprep.mubr.f32.mxu0 %v13444_v7  ;;  %7249 = vmatpush3.msra.mxu1 %v13445_v63 }
 0x415   : > { %5789 = vmatmul.mubr.f32.vlgmr.msra.gmra.mxu0 %v13446_v9  ;;  %7250 = vmatprep.subr.mxu1 %v13447_v58 }
 0x416   : > { %7251 = vmatpush3.msra.mxu1 %v11635_v11  ;;  %5794 = vmatprep.mubr.f32.mxu0 %v13400_v20 }
 0x417   : > { %7252 = vmatprep.subr.mxu1 %v11642_v10  ;;  %5898 = vmatprep.mubr.f32.mxu1 %v13444_v7  ;;  %v6014_v7 = vsub.f32 %v6012_v40, %v6013_v14 }
 0x418   : > { %7253 = vmatpush3.msra.mxu1 %v13401_v51  ;;  %7906 = vmatprep.subr.mxu0 %v8023_v62 }
 0x419   : > { %5796 = vmatmul.mubr.f32.gmra.mxu0 %v13403_v34  ;;  %7254 = vmatprep.subr.mxu1 %v11680_v38 }
 0x41a   : > { %7255 = vmatpush3.msra.mxu1 %v11700_v57  ;;  %7910 = vmatprep.mubr.msk.f32.mxu0 %vm8024_vm3, %v8023_v62 }
 0x41b   : > { %7256 = vmatprep.subr.mxu1 %v13406_v59 }
 0x41c   : > { %7257 = vmatpush3.msra.mxu1 %v11757_v30 }
 0x41d   : > { %5900 = vmatmul.mubr.f32.vlgmr.msra.gmra.mxu1 %v13446_v9  ;;  %7913 = vmatprep.subr.mxu1 %v8023_v62 }
 0x41e   : > { %5905 = vmatprep.mubr.f32.mxu1 %v13400_v20  ;;  %v5919_v31 = vpop.permute.xlu0 %5918  ;;  %v5924_v39 = vpop.permute.xlu1 %5923 }
 0x421   : > { %5907 = vmatmul.mubr.f32.gmra.mxu1 %v13403_v34 }
 0x422   : > { %7917 = vmatprep.mubr.msk.f32.mxu1 %vm8024_vm3, %v8023_v62 }
 0x48f   : > { %v7068_v51 = vpop.f32.mrf.mxu0 }
 0x491   : > { %v7069_v11 = vpop.f32.mrf.mxu0 }
 0x492   : > { %v7070_v54 = vadd.f32 %v7069_v11, %v7068_v51  ;;  %v6015_v51 = vand.u32 4294901760, %v6014_v7  ;;  %v13455_v7 = vld [vmem:[#allocation13_spill] sm:$0xff] }
 0x494   : > { %v7071_v10 = vpop.f32.mrf.mxu0 }
 0x496   : > { %v7072_v57 = vpop.f32.mrf.mxu0 }
 0x497   : > { %v7073_v33 = vadd.f32 %v7072_v57, %v7071_v10 }
 0x498   : > { %v7106_v38 = vpop.f32.mrf.mxu1 }
 0x49a   : > { %v7107_v30 = vpop.f32.mrf.mxu1 }
 0x49b   : > { %v7108_v25 = vadd.f32 %v7107_v30, %v7106_v38 }
 0x49d   : > { %v5350_v60 = vadd.f32 %v7108_v25, %v7070_v54 }
 0x4b0   : > { %v7144_v20 = vpop.f32.mrf.mxu0 }
 0x4b2   : > { %v7145_v16 = vpop.f32.mrf.mxu0 }
 0x4b3   : > { %v7146_v37 = vadd.f32 %v7145_v16, %v7144_v20  ;;  %v5937_v16 = vlaneseq }
 0x4b5   : > { %v7109_v34 = vpop.f32.mrf.mxu1  ;;  %v5495_v5 = vadd.f32 %v7146_v37, %v5350_v60 }
 0x4b7   : > { %v7110_v45 = vpop.f32.mrf.mxu1 }
 0x4b8   : > { %v7111_v59 = vadd.f32 %v7110_v45, %v7109_v34  ;;  %v5938_v45 = vshrl.u32 %v5937_v16, 7 }
 0x4ba   : > { %v7182_v0 = vpop.f32.mrf.mxu1  ;;  %v5357_v44 = vadd.f32 %v7111_v59, %v7073_v33 }
 0x4bc   : > { %v7183_v32 = vpop.f32.mrf.mxu1 }
 0x4bd   : > { %v7184_v36 = vadd.f32 %v7183_v32, %v7182_v0  ;;  %v5935_v32 = vpop.permute.xlu1 %5934 }
 0x4bf   : > { %v5612_v42 = vadd.f32 %v7184_v36, %v5495_v5 }
 0x4cc   : > { %v7147_v56 = vpop.f32.mrf.mxu0 }
 0x4ce   : > { %v7148_v1 = vpop.f32.mrf.mxu0 }
 0x4cf   : > { %v7185_v28 = vpop.f32.mrf.mxu1  ;;  %v7149_v12 = vadd.f32 %v7148_v1, %v7147_v56  ;;  %v5939_v56 = vsub.s32 0, %v5938_v45  ;;  %v13461_v45 = vld [vmem:[#allocation8_spill] sm:$0xff] }
 0x4d1   : > { %v7186_v21 = vpop.f32.mrf.mxu1  ;;  %v5504_v27 = vadd.f32 %v7149_v12, %v5357_v44  ;;  %v5940_v25 = vrot.slane %v5935_v32, %v5939_v56 }
 0x4d2   : > { %v7187_v43 = vadd.f32 %v7186_v21, %v7185_v28 }
 0x4d4   : > { %v5623_v23 = vadd.f32 %v7187_v43, %v5504_v27 }
 0x4d5   : > { %v7220_v47 = vpop.f32.mrf.mxu0 }
 0x4d7   : > { %v7221_v19 = vpop.f32.mrf.mxu0 }
 0x4d8   : > { %v7222_v46 = vadd.f32 %v7221_v19, %v7220_v47 }
 0x4d9   : > { %v7223_v6 = vpop.f32.mrf.mxu0 }
 0x4da   : > { %v5791_v53 = vadd.f32 %v7222_v46, %v5612_v42 }
 0x4db   : > { %v7224_v24 = vpop.f32.mrf.mxu0 }
 0x4dc   : > { %v7225_v2 = vadd.f32 %v7224_v24, %v7223_v6 }
 0x4dd   : > { %v7258_v29 = vpop.f32.mrf.mxu1 }
 0x4de   : > { %v5798_v61 = vadd.f32 %v7225_v2, %v5623_v23 }
 0x4df   : > { %v7259_v17 = vpop.f32.mrf.mxu1 }
 0x4e0   : > { %v7260_v35 = vadd.f32 %v7259_v17, %v7258_v29 }
 0x4e1   : > { %v7261_v3 = vpop.f32.mrf.mxu1 }
 0x4e2   : > { %v5902_v41 = vadd.f32 %v7260_v35, %v5791_v53 }
 0x4e3   : > { %v7262_v22 = vpop.f32.mrf.mxu1 }
 0x4e4   : > { %v7263_v4 = vadd.f32 %v7262_v22, %v7261_v3  ;;  %v5912_v18 = vmul.f32 0.015625, %v5902_v41 }
 0x4e6   : > { %v5909_v49 = vadd.f32 %v7263_v4, %v5798_v61  ;;  %v5926_v8 = vadd.f32 %v5919_v31, %v5912_v18  ;;  %v13448_v4 = vld [vmem:[#allocation16_spill] sm:$0xff]  ;;  %v13449_v18 = vld [vmem:[#allocation53_spill] sm:$0xff] }
 0x4e8   : > { %v5928_v13 = vmax.f32 %v5926_v8, 0.0  ;;  %v5913_v52 = vmul.f32 0.015625, %v5909_v49  ;;  %v4508_v49 = vsub.f32 %v13449_v18, %v13448_v4  ;;  %v13450_v8 = vld [vmem:[#allocation10_spill] sm:$0xff] }
 0x4ea   : > { %v5976_v50 = vand.u32 4294901760, %v5928_v13  ;;  %v5927_v15 = vadd.f32 %v5924_v39, %v5913_v52  ;;  %v13452_v52 = vld [vmem:[#allocation5_spill] sm:$0xff] }
 0x4eb   : > { %v13453_v39 = vld [vmem:[#allocation49_spill] sm:$0xff] }
 0x4ec   : > { %v6058_v63 = vsub.f32 %v5928_v13, %v5976_v50  ;;  %v5929_v9 = vmax.f32 %v5927_v15, 0.0  ;;  %v13454_v15 = vld [vmem:[#allocation40_spill] sm:$0xff] }
 0x4ee   : > { %v5973_v58 = vand.u32 4294901760, %v5929_v9  ;;  %v6059_v11 = vand.u32 4294901760, %v6058_v63 }
 0x4f0   : > { %v6051_v10 = vsub.f32 %v5929_v9, %v5973_v58  ;;  %7907 = vmatpush3.msra.mxu0 %v5973_v58  ;;  %v6060_v57 = vsub.f32 %v6058_v63, %v6059_v11  ;;  %v13456_v9 = vld [vmem:[#allocation29_spill] sm:$0xff] }
 0x4f1   : > { %7908 = vmatprep.subr.mxu0 %v8023_v62 }
 0x4f2   : > { %v6052_v38 = vand.u32 4294901760, %v6051_v10  ;;  %7909 = vmatpush3.msra.mxu0 %v5976_v50  ;;  %v6061_v34 = vand.u32 4294901760, %v6060_v57 }
 0x4f3   : > { %7911 = vmatmul.mubr.f32.vlgmr.msra.gmra.mxu0 %v6015_v51  ;;  %7920 = vmatprep.subr.mxu0 %v8023_v62 }
 0x4f4   : > { %v6053_v30 = vsub.f32 %v6051_v10, %v6052_v38  ;;  %7921 = vmatpush3.msra.mxu0 %v6051_v10  ;;  %7924 = vmatprep.mubr.msk.f32.mxu0 %vm8024_vm3, %v8023_v62  ;;  %v13458_v10 = vld [vmem:[#allocation25_spill] sm:$0xff] }
 0x4f5   : > { %7922 = vmatprep.subr.mxu0 %v8023_v62 }
 0x4f6   : > { %7923 = vmatpush3.msra.mxu0 %v6058_v63  ;;  %v6054_v20 = vand.u32 4294901760, %v6053_v30  ;;  %v4509_v63 = vsub.f32 %v13455_v7, %v13454_v15  ;;  %v13459_v30 = vld [vmem:[#allocation6_spill] sm:$0xff] }
 0x4f7   : > { %7934 = vmatprep.subr.mxu0 %v8023_v62  ;;  %7925 = vmatmul.mubr.f32.vlgmr.msra.gmra.mxu0 %v6012_v40 }
 0x4f8   : > { %7914 = vmatpush3.msra.mxu1 %v6054_v20  ;;  %7935 = vmatpush3.msra.mxu0 %v6052_v38  ;;  %v13460_v20 = vld [vmem:[#allocation32_spill] sm:$0xff]  ;;  %v12013_v16 = vmul.f32 %v13456_v9, %v4509_v63 }
 0x4f9   : > { %7915 = vmatprep.subr.mxu1 %v8023_v62  ;;  %7936 = vmatprep.subr.mxu0 %v8023_v62  ;;  %v13482_v63 = vld [vmem:[#allocation12_spill] sm:$0xff] }
 0x4fa   : > { %7916 = vmatpush3.msra.mxu1 %v6061_v34  ;;  %7937 = vmatpush3.msra.mxu0 %v6059_v11  ;;  %v13457_v11 = vld [vmem:[#allocation4_spill] sm:$0xff]  ;;  %v4511_v34 = vsub.f32 %v13460_v20, %v13459_v30 }
 0x4fb   : > { %7918 = vmatmul.mubr.f32.vlgmr.msra.gmra.mxu1 %v11967_v48  ;;  %7927 = vmatprep.subr.mxu1 %v8023_v62  ;;  %v4512_v38 = vsub.f32 %v13458_v10, %v13457_v11 }
 0x4fc   : > { %7928 = vmatpush3.msra.mxu1 %v5973_v58  ;;  %7931 = vmatprep.mubr.msk.f32.mxu1 %vm8024_vm3, %v8023_v62 }
 0x4fd   : > { %7929 = vmatprep.subr.mxu1 %v8023_v62  ;;  %7938 = vmatprep.mubr.msk.f32.mxu0 %vm8024_vm3, %v8023_v62 }
 0x4fe   : > { %7930 = vmatpush3.msra.mxu1 %v5976_v50  ;;  %7939 = vmatmul.mubr.f32.vlgmr.msra.gmra.mxu0 %v11967_v48 }
 0x4ff   : > { %7932 = vmatmul.mubr.f32.vlgmr.msra.gmra.mxu1 %v6013_v14  ;;  %7941 = vmatprep.subr.mxu1 %v8023_v62  ;;  %v13451_v14 = vld [vmem:[#allocation51_spill] sm:$0xff] }
 0x500   : > { %7942 = vmatpush3.msra.mxu1 %v5973_v58  ;;  %7945 = vmatprep.mubr.msk.f32.mxu1 %vm8024_vm3, %v8023_v62  ;;  %v4507_v13 = vsub.f32 %v13451_v14, %v13450_v8  ;;  %v12000_v58 = vmul.f32 %v13456_v9, %v4508_v49  ;;  %v13480_v49 = vld [vmem:[#allocation48_spill] sm:$0xff] }
 0x501   : > { %7943 = vmatprep.subr.mxu1 %v8023_v62 }
 0x502   : > { %7944 = vmatpush3.msra.mxu1 %v5976_v50  ;;  %v4510_v50 = vsub.f32 %v13453_v39, %v13452_v52  ;;  %v12003_v51 = vmul.f32 %v13456_v9, %v4507_v13  ;;  %v4573_v32 = vadd.f32 %v12000_v58, %v13448_v4  ;;  %v13479_v4 = vld [vmem:[#allocation45_spill] sm:$0xff] }
 0x503   : > { %7946 = vmatmul.mubr.f32.vlgmr.msra.gmra.mxu1 %v11967_v48 }
 0x504   : > { %v12008_v57 = vmul.f32 %v13456_v9, %v4510_v50 }
 0x5b3   : > { %v6017_v0 = vpop.f32.mrf.mxu0 }
 0x5b4   : > { %v6018_v19 = vadd.f32 %v6017_v0, %v5940_v25  ;;  %v13462_v0 = vld [vmem:[#allocation24_spill] sm:$0xff]  ;;  %v13464_v25 = vld [vmem:[#allocation26_spill] sm:$0xff] }
 0x5b5   : > { %v7912_v1 = vpop.f32.mrf.mxu0  ;;  %v4514_v56 = vsub.f32 %v13462_v0, %v13461_v45 }
 0x5b7   : > { %v6174_v47 = vpop.f32.mrf.mxu0 }
 0x5b9   : > { %v7926_v28 = vpop.f32.mrf.mxu0 }
 0x5bb   : > { %v6098_v54 = vpop.f32.mrf.mxu1 }
 0x5bc   : > { %v6099_v33 = vadd.f32 %v6098_v54, %v6018_v19  ;;  %v4572_v19 = vadd.f32 %v12003_v51, %v13450_v8  ;;  %v4529_v8 = vsub.f32 %v13480_v49, %v13479_v4 }
 0x5bd   : > { %v7919_v37 = vpop.f32.mrf.mxu1 }
 0x5be   : > { %v6175_v59 = vadd.f32 %v6174_v47, %v6099_v33  ;;  %v6326_v55 = vpop.f32.mrf.mxu0  ;;  %v13463_v47 = vld [vmem:[#allocation11_spill] sm:$0xff]  ;;  %v12028_v33 = vmul.f32 %v13456_v9, %v4512_v38  ;;  %v13465_v37 = vld [vmem:[#allocation21_spill] sm:$0xff] }
 0x5bf   : > { %v6249_v6 = vpop.f32.mrf.mxu1  ;;  %v4513_v28 = vsub.f32 %v13464_v25, %v13463_v47 }
 0x5c0   : > { %v6250_v62 = vadd.f32 %v6249_v6, %v6175_v59  ;;  %v7940_v60 = vpop.f32.mrf.mxu0  ;;  %v13466_v59 = vld [vmem:[#allocation7_spill] sm:$0xff]  ;;  %v4575_v6 = vadd.f32 %v12008_v57, %v13452_v52 }
 0x5c1   : > { %v7933_v36 = vpop.f32.mrf.mxu1  ;;  %v12037_v60 = vmul.f32 %v13456_v9, %v4511_v34 }
 0x5c2   : > { %v6327_v21 = vadd.f32 %v6326_v55, %v6250_v62  ;;  %v4524_v55 = vsub.f32 %v13466_v59, %v13465_v37  ;;  %v13467_v36 = vld [vmem:[#allocation42_spill] sm:$0xff] }
 0x5c3   : > { %v6399_v26 = vpop.f32.mrf.mxu1  ;;  %v4576_v52 = vadd.f32 %v12037_v60, %v13459_v30  ;;  %v12105_v30 = vmul.f32 %v13456_v9, %v4529_v8 }
 0x5c4   : > { %v6400_v5 = vadd.f32 %v6399_v26, %v6327_v21  ;;  %v13468_v21 = vld [vmem:[#allocation50_spill] sm:$0xff] }
 0x5c5   : > { %v7947_v44 = vpop.f32.mrf.mxu1  ;;  %v4523_v26 = vsub.f32 %v13468_v21, %v13467_v36 }
 0x5c6   : > { %v6403_v12 = vsub.f32 0.0, %v6400_v5  ;;  %v4574_v5 = vadd.f32 %v12013_v16, %v13454_v15  ;;  %v12044_v44 = vmul.f32 %v13456_v9, %v4514_v56  ;;  %v13481_v15 = vld [vmem:[#allocation15_spill] sm:$0xff] }
 0x5c7   : > { %v12073_v50 = vmul.f32 %v13456_v9, %v4523_v26 }
 0x5c8   : > { %v6404_v46 = vmul.f32 1.442695, %v6403_v12  ;;  %v13469_v12 = vld [vmem:[#allocation18_spill] sm:$0xff]  ;;  %v4579_v34 = vadd.f32 %v12044_v44, %v13461_v45 }
 0x5ca   : > { %7968 = vpow2.f32 %v6404_v46  ;;  %v13470_v46 = vld [vmem:[#allocation14_spill] sm:$0xff] }
 0x5d7   : > { %v7969_v24 = vpop.eup %7968 }
 0x5d8   : > { %v6406_v29 = vadd.f32 1.0, %v7969_v24  ;;  %v4526_v24 = vsub.f32 %v13470_v46, %v13469_v12 }
 0x5da   : > { %7970 = vrcp.f32 %v6406_v29  ;;  %v13471_v29 = vld [vmem:[#allocation20_spill] sm:$0xff]  ;;  %v12082_v56 = vmul.f32 %v13456_v9, %v4526_v24 }
 0x5e7   : > { %v7971_v42 = vpop.eup %7970 }
 0x5e8   : > { %v6409_v43 = vadd.f32 1e-10, %v7971_v42  ;;  %v6412_v17 = vsub.f32 1.0, %v7971_v42  ;;  %v13472_v42 = vld [vmem:[#allocation55_spill] sm:$0xff] }
 0x5ea   : > { %7972 = vlog2.f32 %v6409_v43  ;;  %v6413_v48 = vadd.f32 1e-10, %v6412_v17  ;;  %v4525_v43 = vsub.f32 %v13472_v42, %v13471_v29 }
 0x5ec   : > { %7974 = vlog2.f32 %v6413_v48  ;;  %v12053_v48 = vmul.f32 %v13456_v9, %v4513_v28  ;;  %v12085_v28 = vmul.f32 %v13456_v9, %v4525_v43 }
 0x5ee   : > { %v4590_v8 = vadd.f32 %v12085_v28, %v13471_v29 }
 0x5f7   : > { %v7973_v27 = vpop.eup %7972 }
 0x5f8   : > { %v6411_v2 = vmul.f32 0.6931472, %v7973_v27  ;;  %v13473_v27 = vld [vmem:[#allocation33_spill] sm:$0xff] }
 0x5f9   : > { %v7975_v53 = vpop.eup %7974 }
 0x5fa   : > { %v6415_v35 = vmul.f32 0.6931472, %v7975_v53  ;;  %v13474_v53 = vld [vmem:[#allocation74_spill] sm:$0xff] }
 0x5fc   : > { %v6416_v3 = vsub.f32 %v6411_v2, %v6415_v35  ;;  %v4528_v2 = vsub.f32 %v13474_v53, %v13473_v27  ;;  %v13475_v35 = vld [vmem:[#allocation36_spill] sm:$0xff] }
 0x5fe   : > { %v6417_v23 = vsub.f32 0.0, %v6416_v3  ;;  %v13476_v3 = vld [vmem:[#allocation83_spill] sm:$0xff]  ;;  %v12092_v26 = vmul.f32 %v13456_v9, %v4528_v2  ;;  %v4588_v2 = vadd.f32 %v12073_v50, %v13467_v36 }
 0x600   : > { %v6418_v41 = vmul.f32 1.442695, %v6417_v23  ;;  %v4527_v23 = vsub.f32 %v13476_v3, %v13475_v35  ;;  %v4593_v36 = vadd.f32 %v12092_v26, %v13473_v27  ;;  %v4626_v27 = vsub.f32 %v13480_v49, %v12105_v30 }
 0x602   : > { %7976 = vpow2.f32 %v6418_v41  ;;  %v4577_v41 = vadd.f32 %v12028_v33, %v13457_v11  ;;  %v4532_v11 = vsub.f32 %v13482_v63, %v13481_v15  ;;  %v12095_v13 = vmul.f32 %v13456_v9, %v4527_v23 }
 0x604   : > { %v12114_v45 = vmul.f32 %v13456_v9, %v4532_v11  ;;  %v4592_v11 = vadd.f32 %v12095_v13, %v13475_v35 }
 0x606   : > { %v4629_v35 = vsub.f32 %v13482_v63, %v12114_v45  ;;  %v13484_v63 = vld [vmem:[#allocation57_spill] sm:$0xff] }
 0x60f   : > { %v7977_v22 = vpop.eup %7976 }
 0x610   : > { %v6420_v31 = vadd.f32 1.0, %v7977_v22  ;;  %v12062_v22 = vmul.f32 %v13456_v9, %v4524_v55  ;;  %v4578_v55 = vadd.f32 %v12053_v48, %v13463_v47  ;;  %v4594_v47 = vadd.f32 %v12105_v30, %v13479_v4 }
 0x612   : > { %7978 = vrcp.f32 %v6420_v31  ;;  %v13477_v31 = vld [vmem:[#allocation44_spill] sm:$0xff]  ;;  %v4589_v24 = vadd.f32 %v12062_v22, %v13465_v37  ;;  %v4591_v37 = vadd.f32 %v12082_v56, %v13469_v12  ;;  %v4624_v12 = vsub.f32 %v13476_v3, %v12095_v13 }
 0x61f   : > { %v7979_v40 = vpop.eup %7978 }
 0x620   : > { %6459 = vrot.lane.b32.xlu1 %v7979_v40, %s8025_s17  ;;  %7948 = vpush %v7979_v40  ;;  %v13478_v40 = vld [vmem:[#allocation22_spill] sm:$0xff] }
 0x651   : > { %s7949_s18 = spop %7948 }
 0x652   : > { %v6425_v38 = vstv %s7949_s18 }
 0x653   : > { %v12144_v23 = vmul.f32 %v6425_v38, %v4572_v19  ;;  %v12146_v3 = vmul.f32 %v6425_v38, %v4573_v32  ;;  %v12150_v13 = vmul.f32 %v6425_v38, %v4575_v6  ;;  %v12154_v4 = vmul.f32 %v6425_v38, %v4577_v41  ;;  %v13485_v32 = vld [vmem:[#allocation60_spill] sm:$0xff]  ;;  %v13489_v41 = vld [vmem:[#allocation61_spill] sm:$0xff] }
 0x654   : > { %v12158_v49 = vmul.f32 %v6425_v38, %v4579_v34  ;;  %v12164_v19 = vmul.f32 %v6425_v38, %v13484_v63  ;;  %v13491_v34 = vld [vmem:[#allocation68_spill] sm:$0xff]  ;;  %v12184_v63 = vmul.f32 %v6425_v38, %v4588_v2  ;;  %v12186_v54 = vmul.f32 %v6425_v38, %v4589_v24 }
 0x655   : > { %v12179_v17 = vmul.f32 %v6425_v38, %v13491_v34  ;;  %v13497_v34 = vld [vmem:[#allocation41_spill] sm:$0xff]  ;;  %v13500_v2 = vld [vmem:[#allocation76_spill] sm:$0xff] }
 0x656   : > { %v12206_v24 = vmul.f32 %v6425_v38, %v13500_v2  ;;  %v13512_v2 = vsub.f32 %v13451_v14, %v12003_v51  ;;  %v13517_v14 = vsub.f32 %v13458_v10, %v12028_v33 }
 0x657   : > { %13492 = vst [vmem:[#allocation87_spill] sm:$0xff] %v12179_v17  ;;  %v12201_v17 = vmul.f32 %v6425_v38, %v13497_v34  ;;  %v13510_v34 = vld [vmem:[#allocation81_spill] sm:$0xff] }
 0x658   : > { %13501 = vst [vmem:[#allocation86_spill] sm:$0xff] %v12206_v24 }
 0x659   : > { %13498 = vst [vmem:[#allocation88_spill] sm:$0xff] %v12201_v17  ;;  %v12221_v17 = vmul.f32 %v6425_v38, %v13510_v34 }
 0x65b   : > { %13511 = vst [vmem:[#allocation94_spill] sm:$0xff] %v12221_v17  ;;  %v13527_v17 = vld [vmem:[#allocation39_spill] sm:$0xff] }
 0x692   : > { %v6460_v61 = vpop.permute.xlu1 %6459 }
 0x693   : > { %7950 = vpush %v6460_v61  ;;  %v4530_v61 = vsub.f32 %v13478_v40, %v13477_v31 }
 0x695   : > { %v12102_v43 = vmul.f32 %v13456_v9, %v4530_v61  ;;  %v4597_v9 = vadd.f32 %v12114_v45, %v13481_v15  ;;  %v13483_v15 = vld [vmem:[#allocation30_spill] sm:$0xff]  ;;  %v12167_v45 = vmul.f32 %v6425_v38, %v13485_v32  ;;  %v12188_v32 = vmul.f32 %v6425_v38, %v4590_v8  ;;  %v13502_v8 = vld [vmem:[#allocation72_spill] sm:$0xff] }
 0x696   : > { %v12161_v30 = vmul.f32 %v6425_v38, %v13483_v15  ;;  %v13493_v15 = vld [vmem:[#allocation66_spill] sm:$0xff] }
 0x697   : > { %v4595_v61 = vadd.f32 %v12102_v43, %v13477_v31  ;;  %v4627_v29 = vsub.f32 %v13478_v40, %v12102_v43  ;;  %v12148_v31 = vmul.f32 %v6425_v38, %v4574_v5  ;;  %v12152_v40 = vmul.f32 %v6425_v38, %v4576_v52  ;;  %v13486_v5 = vld [vmem:[#allocation27_spill] sm:$0xff]  ;;  %v13488_v52 = vld [vmem:[#allocation64_spill] sm:$0xff]  ;;  %13494 = vst [vmem:[#allocation101_spill] sm:$0xff] %v12188_v32 }
 0x698   : > { %v12156_v43 = vmul.f32 %v6425_v38, %v4578_v55  ;;  %v12170_v6 = vmul.f32 %v6425_v38, %v13486_v5  ;;  %v12173_v62 = vmul.f32 %v6425_v38, %v13488_v52  ;;  %v12176_v55 = vmul.f32 %v6425_v38, %v13489_v41 }
 0x699   : > { %v12182_v1 = vmul.f32 %v6425_v38, %v13493_v15  ;;  %v12190_v5 = vmul.f32 %v6425_v38, %v4591_v37  ;;  %v12194_v52 = vmul.f32 %v6425_v38, %v4593_v36  ;;  %v12196_v41 = vmul.f32 %v6425_v38, %v4594_v47  ;;  %v13504_v37 = vld [vmem:[#allocation17_spill] sm:$0xff]  ;;  %v13506_v36 = vld [vmem:[#allocation78_spill] sm:$0xff] }
 0x69a   : > { %13487 = vst [vmem:[#allocation106_spill] sm:$0xff] %v12170_v6  ;;  %13490 = vst [vmem:[#allocation89_spill] sm:$0xff] %v12176_v55  ;;  %v12192_v6 = vmul.f32 %v6425_v38, %v4592_v11  ;;  %v12198_v55 = vmul.f32 %v6425_v38, %v4595_v61  ;;  %v12203_v15 = vmul.f32 %v6425_v38, %v4597_v9  ;;  %v13508_v61 = vld [vmem:[#allocation28_spill] sm:$0xff] }
 0x69b   : > { %13495 = vst [vmem:[#allocation85_spill] sm:$0xff] %v12196_v41  ;;  %v12209_v32 = vmul.f32 %v6425_v38, %v13502_v8  ;;  %v12212_v11 = vmul.f32 %v6425_v38, %v13504_v37  ;;  %v12215_v47 = vmul.f32 %v6425_v38, %v13506_v36  ;;  %v13513_v8 = vsub.f32 %v13449_v18, %v12000_v58  ;;  %v13541_v41 = vld [vmem:[#allocation59_spill] sm:$0xff] }
 0x69c   : > { %13496 = vst [vmem:[#allocation105_spill] sm:$0xff] %v12198_v55  ;;  %13499 = vst [vmem:[#allocation99_spill] sm:$0xff] %v12203_v15  ;;  %v12218_v55 = vmul.f32 %v6425_v38, %v13508_v61  ;;  %v13515_v61 = vsub.f32 %v13453_v39, %v12008_v57  ;;  %v13516_v38 = vsub.f32 %v13460_v20, %v12037_v60  ;;  %v13536_v15 = vld [vmem:[#allocation58_spill] sm:$0xff] }
 0x69d   : > { %13503 = vst [vmem:[#allocation100_spill] sm:$0xff] %v12209_v32  ;;  %13505 = vst [vmem:[#allocation96_spill] sm:$0xff] %v12212_v11  ;;  %v13514_v11 = vsub.f32 %v13455_v7, %v12013_v16  ;;  %v13518_v18 = vsub.f32 %v13464_v25, %v12053_v48  ;;  %v13519_v7 = vsub.f32 %v13462_v0, %v12044_v44  ;;  %v13533_v32 = vld [vmem:[#allocation62_spill] sm:$0xff] }
 0x69e   : > { %13507 = vst [vmem:[#allocation111_spill] sm:$0xff] %v12215_v47  ;;  %13509 = vst [vmem:[#allocation103_spill] sm:$0xff] %v12218_v55  ;;  %v13530_v47 = vld [vmem:[#allocation35_spill] sm:$0xff] }
 0x6c4   : > { %s7951_s19 = spop %7950 }
 0x6c5   : > { %v6462_v9 = vstv %s7951_s19 }
 0x6c6   : > { %v6464_v24 = vmul.f32 %v6462_v9, %v13512_v2  ;;  %v6465_v37 = vmul.f32 %v6462_v9, %v13513_v8  ;;  %v6466_v36 = vmul.f32 %v6462_v9, %v13514_v11  ;;  %v6467_v55 = vmul.f32 %v6462_v9, %v13515_v61  ;;  %v13520_v11 = vld [vmem:[#allocation46_spill] sm:$0xff]  ;;  %v13521_v2 = vld [vmem:[#allocation52_spill] sm:$0xff]  ;;  %v13523_v8 = vld [vmem:[#allocation9_spill] sm:$0xff] }
 0x6c7   : > { %v6468_v34 = vmul.f32 %v6462_v9, %v13516_v38  ;;  %v6469_v51 = vmul.f32 %v6462_v9, %v13517_v14  ;;  %v6470_v58 = vmul.f32 %v6462_v9, %v13518_v18  ;;  %v6471_v16 = vmul.f32 %v6462_v9, %v13519_v7  ;;  %v13524_v61 = vld [vmem:[#allocation54_spill] sm:$0xff]  ;;  %v13526_v38 = vld [vmem:[#allocation31_spill] sm:$0xff]  ;;  %v13529_v14 = vld [vmem:[#allocation56_spill] sm:$0xff] }
 0x6c8   : > { %v13522_v39 = vsub.f32 %v13520_v11, %v13521_v2  ;;  %v13525_v20 = vsub.f32 %v13523_v8, %v13524_v61  ;;  %v13528_v10 = vsub.f32 %v13526_v38, %v13527_v17  ;;  %v13531_v25 = vsub.f32 %v13529_v14, %v13530_v47  ;;  %v13532_v18 = vld [vmem:[#allocation38_spill] sm:$0xff]  ;;  %v13539_v8 = vld [vmem:[#allocation67_spill] sm:$0xff]  ;;  %v13542_v17 = vld [vmem:[#allocation65_spill] sm:$0xff] }
 0x6c9   : > { %v13534_v0 = vsub.f32 %v13532_v18, %v13533_v32  ;;  %v13535_v7 = vld [vmem:[#allocation34_spill] sm:$0xff]  ;;  %v13543_v38 = vsub.f32 %v13541_v41, %v13542_v17  ;;  %v13544_v47 = vsub.f32 %v13468_v21, %v12073_v50  ;;  %v13545_v32 = vsub.f32 %v13466_v59, %v12062_v22  ;;  %v13549_v59 = vld [vmem:[#allocation47_spill] sm:$0xff]  ;;  %v13555_v17 = vld [vmem:[#allocation69_spill] sm:$0xff] }
 0x6ca   : > { %v6472_v57 = vmul.f32 %v6462_v9, %v13522_v39  ;;  %v6473_v60 = vmul.f32 %v6462_v9, %v13525_v20  ;;  %v6474_v33 = vmul.f32 %v6462_v9, %v13528_v10  ;;  %v6475_v48 = vmul.f32 %v6462_v9, %v13531_v25  ;;  %v13538_v39 = vld [vmem:[#allocation63_spill] sm:$0xff]  ;;  %v13550_v22 = vld [vmem:[#allocation70_spill] sm:$0xff] }
 0x6cb   : > { %v6476_v44 = vmul.f32 %v6462_v9, %v13534_v0  ;;  %v13537_v11 = vsub.f32 %v13535_v7, %v13536_v15  ;;  %v13540_v61 = vsub.f32 %v13538_v39, %v13539_v8  ;;  %v6479_v10 = vmul.f32 %v6462_v9, %v13543_v38 }
 0x6cc   : > { %v6480_v14 = vmul.f32 %v6462_v9, %v13544_v47  ;;  %v6481_v25 = vmul.f32 %v6462_v9, %v13545_v32  ;;  %v13546_v15 = vsub.f32 %v13472_v42, %v12085_v28  ;;  %v13547_v0 = vsub.f32 %v13470_v46, %v12082_v56  ;;  %v13552_v46 = vld [vmem:[#allocation23_spill] sm:$0xff] }
 0x6cd   : > { %v6477_v2 = vmul.f32 %v6462_v9, %v13537_v11  ;;  %v6478_v20 = vmul.f32 %v6462_v9, %v13540_v61  ;;  %v12283_v11 = vmul.f32 %v6462_v9, %v4624_v12  ;;  %v13548_v41 = vsub.f32 %v13474_v53, %v12092_v26  ;;  %v13553_v56 = vld [vmem:[#allocation43_spill] sm:$0xff] }
 0x6ce   : > { %v6482_v18 = vmul.f32 %v6462_v9, %v13546_v15  ;;  %v6483_v7 = vmul.f32 %v6462_v9, %v13547_v0  ;;  %v12290_v21 = vmul.f32 %v6462_v9, %v4626_v27  ;;  %v12292_v50 = vmul.f32 %v6462_v9, %v4627_v29  ;;  %v13556_v53 = vld [vmem:[#allocation71_spill] sm:$0xff]  ;;  %v13558_v29 = vld [vmem:[#allocation73_spill] sm:$0xff] }
 0x6cf   : > { %v12288_v39 = vmul.f32 %v6462_v9, %v13548_v41  ;;  %v13551_v8 = vsub.f32 %v13549_v59, %v13550_v22  ;;  %v12299_v28 = vmul.f32 %v6462_v9, %v4629_v35  ;;  %v13554_v12 = vsub.f32 %v13552_v46, %v13553_v56  ;;  %v13559_v27 = vld [vmem:[#allocation79_spill] sm:$0xff]  ;;  %v13562_v15 = vld [vmem:[#allocation77_spill] sm:$0xff]  ;;  %v13565_v22 = vld [vmem:[#allocation82_spill] sm:$0xff] }
 0x6d0   : > { %v13557_v26 = vsub.f32 %v13555_v17, %v13556_v53  ;;  %v13560_v35 = vsub.f32 %v13558_v29, %v13559_v27  ;;  %v13561_v32 = vld [vmem:[#allocation19_spill] sm:$0xff]  ;;  %v13564_v59 = vld [vmem:[#allocation37_spill] sm:$0xff]  ;;  %v6497_v29 = vmax.f32 %v12146_v3, %v6465_v37  ;;  %v6498_v27 = vmax.f32 %v12148_v31, %v6466_v36 }
 0x6d1   : > { %v12297_v42 = vmul.f32 %v6462_v9, %v13551_v8  ;;  %v12304_v61 = vmul.f32 %v6462_v9, %v13554_v12  ;;  %v13563_v0 = vsub.f32 %v13561_v32, %v13562_v15  ;;  %v13566_v8 = vsub.f32 %v13564_v59, %v13565_v22  ;;  %v13567_v56 = vld [vmem:[#allocation75_spill] sm:$0xff]  ;;  %v13568_v12 = vld [vmem:[#allocation80_spill] sm:$0xff] }
 0x6d2   : > { %v12309_v38 = vmul.f32 %v6462_v9, %v13557_v26  ;;  %v12321_v47 = vmul.f32 %v6462_v9, %v13560_v35  ;;  %v13569_v17 = vsub.f32 %v13567_v56, %v13568_v12  ;;  %v6496_v26 = vmax.f32 %v12144_v23, %v6464_v24  ;;  %v13570_v24 = vld [vmem:[#allocation106_spill] sm:$0xff]  ;;  %6529 = vst.msk [vmem:[%s12316_s22 + $0x8] sm:$0xff] %vm4636_vm1, %v6497_v29 }
 0x6d3   : > { %v12326_v41 = vmul.f32 %v6462_v9, %v13563_v0  ;;  %v12331_v46 = vmul.f32 %v6462_v9, %v13566_v8  ;;  %v6499_v35 = vmax.f32 %v12150_v13, %v6467_v55  ;;  %v6500_v32 = vmax.f32 %v12152_v40, %v6468_v34  ;;  %6530 = vst.msk [vmem:[%s12316_s22 + $0x10] sm:$0xff] %vm4636_vm1, %v6498_v27  ;;  %v13573_v55 = vld [vmem:[#allocation101_spill] sm:$0xff] }
 0x6d4   : > { %v12336_v53 = vmul.f32 %v6462_v9, %v13569_v17  ;;  %v6501_v15 = vmax.f32 %v12154_v4, %v6469_v51  ;;  %v6502_v0 = vmax.f32 %v12156_v43, %v6470_v58  ;;  %v6503_v9 = vmax.f32 %v12158_v49, %v6471_v16  ;;  %6528 = vst.msk [vmem:[%s12316_s22] sm:$0xff] %vm4636_vm1, %v6496_v26  ;;  %v13571_v4 = vld [vmem:[#allocation89_spill] sm:$0xff]  ;;  %v13572_v49 = vld [vmem:[#allocation87_spill] sm:$0xff] }
 0x6d5   : > { %v6504_v23 = vmax.f32 %v12161_v30, %v6472_v57  ;;  %v6505_v3 = vmax.f32 %v12164_v19, %v6473_v60  ;;  %v6506_v31 = vmax.f32 %v12167_v45, %v6474_v33  ;;  %v6507_v13 = vmax.f32 %v13570_v24, %v6475_v48  ;;  %6531 = vst.msk [vmem:[%s12316_s22 + $0x18] sm:$0xff] %vm4636_vm1, %v6499_v35  ;;  %v13575_v34 = vld [vmem:[#allocation105_spill] sm:$0xff]  ;;  %v13577_v58 = vld [vmem:[#allocation99_spill] sm:$0xff]  ;;  %v13578_v57 = vld [vmem:[#allocation86_spill] sm:$0xff] }
 0x6d6   : > { %v6508_v40 = vmax.f32 %v12173_v62, %v6476_v44  ;;  %v6509_v43 = vmax.f32 %v13571_v4, %v6477_v2  ;;  %v6510_v30 = vmax.f32 %v13572_v49, %v6478_v20  ;;  %v6511_v19 = vmax.f32 %v12182_v1, %v6479_v10  ;;  %6532 = vst.msk [vmem:[%s12316_s22 + $0x20] sm:$0xff] %vm4636_vm1, %v6500_v32  ;;  %v13579_v33 = vld [vmem:[#allocation100_spill] sm:$0xff]  ;;  %v13581_v20 = vld [vmem:[#allocation111_spill] sm:$0xff] }
 0x6d7   : > { %6533 = vst.msk [vmem:[%s12316_s22 + $0x28] sm:$0xff] %vm4636_vm1, %v6501_v15  ;;  %6534 = vst.msk [vmem:[%s12316_s22 + $0x30] sm:$0xff] %vm4636_vm1, %v6502_v0  ;;  %v6512_v62 = vmax.f32 %v12184_v63, %v6480_v14  ;;  %v6513_v45 = vmax.f32 %v12186_v54, %v6481_v25  ;;  %v6514_v37 = vmax.f32 %v13573_v55, %v6482_v18  ;;  %v13580_v44 = vld [vmem:[#allocation96_spill] sm:$0xff]  ;;  %v13582_v14 = vld [vmem:[#allocation103_spill] sm:$0xff] }
 0x6d8   : > { %6535 = vst.msk [vmem:[%s12316_s22 + $0x38] sm:$0xff] %vm4636_vm1, %v6503_v9  ;;  %v6515_v1 = vmax.f32 %v12190_v5, %v6483_v7  ;;  %6536 = vst.msk [vmem:[%s12316_s22 + $0x40] sm:$0xff] %vm4636_vm1, %v6504_v23  ;;  %v6516_v63 = vmax.f32 %v12192_v6, %v12283_v11  ;;  %v6517_v54 = vmax.f32 %v12194_v52, %v12288_v39  ;;  %v13574_v5 = vld [vmem:[#allocation85_spill] sm:$0xff]  ;;  %v13576_v6 = vld [vmem:[#allocation88_spill] sm:$0xff] }
 0x6d9   : > { %6537 = vst.msk [vmem:[%s12316_s22 + $0x48] sm:$0xff] %vm4636_vm1, %v6505_v3  ;;  %6538 = vst.msk [vmem:[%s12316_s22 + $0x50] sm:$0xff] %vm4636_vm1, %v6506_v31  ;;  %v6518_v36 = vmax.f32 %v13574_v5, %v12290_v21  ;;  %v6519_v51 = vmax.f32 %v13575_v34, %v12292_v50  ;;  %v6520_v52 = vmax.f32 %v13576_v6, %v12297_v42  ;;  %v13583_v18 = vld [vmem:[#allocation94_spill] sm:$0xff] }
 0x6da   : > { %6539 = vst.msk [vmem:[%s12316_s22 + $0x58] sm:$0xff] %vm4636_vm1, %v6507_v13  ;;  %6540 = vst.msk [vmem:[%s12316_s22 + $0x60] sm:$0xff] %vm4636_vm1, %v6508_v40  ;;  %v6521_v16 = vmax.f32 %v13577_v58, %v12299_v28  ;;  %v6522_v60 = vmax.f32 %v13578_v57, %v12304_v61  ;;  %v6523_v48 = vmax.f32 %v13579_v33, %v12309_v38 }
 0x6db   : > { %6541 = vst.msk [vmem:[%s12316_s22 + $0x68] sm:$0xff] %vm4636_vm1, %v6509_v43  ;;  %6542 = vst.msk [vmem:[%s12316_s22 + $0x70] sm:$0xff] %vm4636_vm1, %v6510_v30  ;;  %v6524_v2 = vmax.f32 %v13580_v44, %v12321_v47  ;;  %v6525_v10 = vmax.f32 %v13581_v20, %v12326_v41  ;;  %v6526_v25 = vmax.f32 %v13582_v14, %v12331_v46 }
 0x6dc   : > { %6543 = vst.msk [vmem:[%s12316_s22 + $0x78] sm:$0xff] %vm4636_vm1, %v6511_v19  ;;  %6544 = vst.msk [vmem:[%s12316_s22 + $0x80] sm:$0xff] %vm4636_vm1, %v6512_v62  ;;  %v6527_v7 = vmax.f32 %v13583_v18, %v12336_v53 }
 0x6dd   : > { %6545 = vst.msk [vmem:[%s12316_s22 + $0x88] sm:$0xff] %vm4636_vm1, %v6513_v45  ;;  %6546 = vst.msk [vmem:[%s12316_s22 + $0x90] sm:$0xff] %vm4636_vm1, %v6514_v37 }
 0x6de   : > { %6547 = vst.msk [vmem:[%s12316_s22 + $0x98] sm:$0xff] %vm4636_vm1, %v6515_v1  ;;  %6548 = vst.msk [vmem:[%s12316_s22 + $0xa0] sm:$0xff] %vm4636_vm1, %v6516_v63 }
 0x6df   : > { %6549 = vst.msk [vmem:[%s12316_s22 + $0xa8] sm:$0xff] %vm4636_vm1, %v6517_v54  ;;  %6550 = vst.msk [vmem:[%s12316_s22 + $0xb0] sm:$0xff] %vm4636_vm1, %v6518_v36 }
 0x6e0   : > { %6551 = vst.msk [vmem:[%s12316_s22 + $0xb8] sm:$0xff] %vm4636_vm1, %v6519_v51  ;;  %6552 = vst.msk [vmem:[%s12316_s22 + $0xc0] sm:$0xff] %vm4636_vm1, %v6520_v52 }
 0x6e1   : > { %6553 = vst.msk [vmem:[%s12316_s22 + $0xc8] sm:$0xff] %vm4636_vm1, %v6521_v16  ;;  %6554 = vst.msk [vmem:[%s12316_s22 + $0xd0] sm:$0xff] %vm4636_vm1, %v6522_v60 }
 0x6e2   : > { %6555 = vst.msk [vmem:[%s12316_s22 + $0xd8] sm:$0xff] %vm4636_vm1, %v6523_v48  ;;  %6556 = vst.msk [vmem:[%s12316_s22 + $0xe0] sm:$0xff] %vm4636_vm1, %v6524_v2 }
 0x6e3   : > { %6557 = vst.msk [vmem:[%s12316_s22 + $0xe8] sm:$0xff] %vm4636_vm1, %v6525_v10  ;;  %6558 = vst.msk [vmem:[%s12316_s22 + $0xf0] sm:$0xff] %vm4636_vm1, %v6526_v25 }
 0x6e4   : > { %6559 = vst.msk [vmem:[%s12316_s22 + $0xf8] sm:$0xff] %vm4636_vm1, %v6527_v7 }
 0x6e5 PF: > { %s21_s9 = sadd.s32 1, %s8018_s9  }
 0x6e6   : > { %p18_p4 = scmp.ge.s32.totalorder %s21_s9, 4  }
 0x6e8   :  { %20 = sbr.rel (!%p18_p4) target bundleno = 3 (0x3), region = 82 }

</bundles_post_ra>
